<compile_context>
chip_gen: v7x
topology: tpu7x:2x2x1
jax: 0.10.0
libtpu: 0.0.40
codegen_flags: <defaults>
</compile_context>

<pallas_src>
import functools

import jax
import jax.numpy as jnp
from jax.experimental import pallas as pl
from jax.experimental.pallas import tpu as pltpu

BN_EPS = 1e-5
LANE = 128
# Blocks here are tiny (<4 MiB/step); 48 MiB stays under v7x's 64 MiB physical
# VMEM and is a no-op headroom bump on v5e/v6e (128 MiB).
VMEM_LIMIT = 48 * 1024 * 1024


def _round_up(x, m):
    return (x + m - 1) // m * m


# ----------------------------------------------------------------------------
# Kernels
# ----------------------------------------------------------------------------
def _conv_stats_kernel(x_ref, w_ref, scale_ref, shift_ref, y_ref, stats_ref,
                       xpad_ref, *, apply_act):
    """3x3 conv (pad=1, stride=1) of one image + per-image BN partial stats.

    x_ref:     (1, H, W, Cin)   raw input (or previous stage's *raw* conv out)
    w_ref:     (9*Cin, Cout)    3x3 weights folded into the contraction dim
    scale_ref: (1, Cin)         previous-stage BN scale (used iff apply_act)
    shift_ref: (1, Cin)         previous-stage BN shift (used iff apply_act)
    y_ref:     (1, H*W, Cout)   raw conv output (pre-BN), lane-dense Cout
    stats_ref: (1, 2, Cout)     per-image [sum, sum-of-squares]
    xpad_ref:  (H+2, W+2, Cin)  VMEM scratch holding the zero-padded input
    """
    _, H, W, cin = x_ref.shape
    cout = y_ref.shape[-1]

    x = x_ref[0]                                               # (H, W, Cin)
    if apply_act:
        # Fuse the previous stage's BatchNorm (folded to scale/shift) + ReLU so
        # the normalized activation never round-trips HBM.
        x = jnp.maximum(x * scale_ref[...] + shift_ref[...], 0.0)

    # Zero-pad (pad=1) into VMEM scratch -- replaces a wrapper-side jnp.pad
    # (which would cost an extra HBM write+read of the whole activation).
    xpad_ref[...] = jnp.zeros_like(xpad_ref)
    xpad_ref[1:H + 1, 1:W + 1, :] = x

    if cin % LANE == 0:
        # Fold all 9 taps into the contraction dim: one (H*W, 9*Cin) slab and a
        # single MXU matmul with K = 9*Cin.  The lane concat offsets are
        # 128-aligned, and the (H,W,C)->(H*W,C) reshape is a layout no-op when
        # W is a multiple of 8.
        taps = [xpad_ref[ky:ky + H, kx:kx + W, :].reshape(H * W, cin)
                for ky in range(3) for kx in range(3)]
        slab = jnp.concatenate(taps, axis=-1)                  # (H*W, 9*Cin)
        acc = jnp.dot(slab, w_ref[...], preferred_element_type=jnp.float32)
    else:
        # Tiny / unaligned Cin (e.g. the very first UNet layer): fall back to 9
        # accumulated dots.  At real channel counts (>=128) the folded single
        # big-K matmul above is used.
        acc = jnp.zeros((H * W, cout), jnp.float32)
        for t in range(9):
            ky, kx = t // 3, t % 3
            tap = xpad_ref[ky:ky + H, kx:kx + W, :].reshape(H * W, cin)
            acc = acc + jnp.dot(tap, w_ref[t * cin:(t + 1) * cin, :],
                                preferred_element_type=jnp.float32)

    y_ref[0] = acc.astype(y_ref.dtype)
    # One sweep over acc for both BN batch-stat moments (sum & sum of squares);
    # the global reduction over images happens in the wrapper.
    stats_ref[0, 0:1, :] = jnp.sum(acc, axis=0, keepdims=True)
    stats_ref[0, 1:2, :] = jnp.sum(acc * acc, axis=0, keepdims=True)


def _bn_relu_kernel(y_ref, scale_ref, shift_ref, o_ref):
    # y_ref/o_ref: (rows, C); scale/shift: (1, C).  Lane-dense elementwise pass.
    o_ref[...] = jnp.maximum(
        y_ref[...] * scale_ref[...] + shift_ref[...], 0.0).astype(o_ref.dtype)


# ----------------------------------------------------------------------------
# pallas_call wrappers
# ----------------------------------------------------------------------------
def _conv_pass(x_nhwc, w_folded, scale, shift, cout_p, *, apply_act):
    """One conv stage over an (N,) 'parallel' grid (one image per step)."""
    N, H, W, cin = x_nhwc.shape
    kernel = functools.partial(_conv_stats_kernel, apply_act=apply_act)
    grid_spec = pltpu.PrefetchScalarGridSpec(
        num_scalar_prefetch=0,
        grid=(N,),
        in_specs=[
            pl.BlockSpec((1, H, W, cin), lambda n: (n, 0, 0, 0)),
            pl.BlockSpec(w_folded.shape, lambda n: (0, 0)),
            pl.BlockSpec((1, cin), lambda n: (0, 0)),
            pl.BlockSpec((1, cin), lambda n: (0, 0)),
        ],
        out_specs=(
            pl.BlockSpec((1, H * W, cout_p), lambda n: (n, 0, 0)),
            pl.BlockSpec((1, 2, cout_p), lambda n: (n, 0, 0)),
        ),
        scratch_shapes=[pltpu.VMEM((H + 2, W + 2, cin), jnp.float32)],
    )
    y, stats = pl.pallas_call(
        kernel,
        grid_spec=grid_spec,
        out_shape=(
            jax.ShapeDtypeStruct((N, H * W, cout_p), jnp.float32),
            jax.ShapeDtypeStruct((N, 2, cout_p), jnp.float32),
        ),
        compiler_params=pltpu.CompilerParams(
            dimension_semantics=("parallel",),
            vmem_limit_bytes=VMEM_LIMIT,
        ),
    )(x_nhwc, w_folded, scale, shift)
    return y, stats


def _bn_relu_pass(y_flat, scale, shift, out_dtype):
    """Final normalize + ReLU over lane-dense (rows, C) tiles."""
    P, cp = y_flat.shape
    rows = P
    for cand in (4096, 2048, 1024, 512, 256, 128, 64, 32, 16, 8):
        if P % cand == 0:
            rows = cand
            break
    grid_spec = pltpu.PrefetchScalarGridSpec(
        num_scalar_prefetch=0,
        grid=(P // rows,),
        in_specs=[
            pl.BlockSpec((rows, cp), lambda i: (i, 0)),
            pl.BlockSpec((1, cp), lambda i: (0, 0)),
            pl.BlockSpec((1, cp), lambda i: (0, 0)),
        ],
        out_specs=pl.BlockSpec((rows, cp), lambda i: (i, 0)),
    )
    return pl.pallas_call(
        _bn_relu_kernel,
        grid_spec=grid_spec,
        out_shape=jax.ShapeDtypeStruct((P, cp), out_dtype),
        compiler_params=pltpu.CompilerParams(
            dimension_semantics=("parallel",),
            vmem_limit_bytes=VMEM_LIMIT,
        ),
    )(y_flat, scale, shift)


# ----------------------------------------------------------------------------
# Parameter plumbing (tiny, wrapper-side)
# ----------------------------------------------------------------------------
def _fold_weight(w_oihw, cin_p, cout_p):
    """OIHW (Cout, Cin, 3, 3) -> (9*Cin_p, Cout_p); K ordering = (ky, kx, ci)."""
    cout, cin, kh, kw = w_oihw.shape
    w = jnp.transpose(w_oihw, (2, 3, 1, 0))                    # (3, 3, Cin, Cout)
    w = jnp.pad(w, ((0, 0), (0, 0), (0, cin_p - cin), (0, cout_p - cout)))
    return w.reshape(kh * kw * cin_p, cout_p).astype(jnp.float32)


def _pad_channels(v, cp):
    return jnp.pad(v.astype(jnp.float32), (0, cp - v.shape[0]))


def _bn_scale_shift(stats, gamma_p, beta_p, count):
    """Reduce per-image [sum, sumsq] partials to global BN scale/shift."""
    s = jnp.sum(stats[:, 0, :], axis=0)
    ss = jnp.sum(stats[:, 1, :], axis=0)
    mean = s / count
    # E[x^2] - E[x]^2 in f32; the clamp guards the tiny-cancellation case.
    var = jnp.maximum(ss / count - mean * mean, 0.0)
    scale = gamma_p * jax.lax.rsqrt(var + BN_EPS)
    shift = beta_p - mean * scale
    return scale.reshape(1, -1), shift.reshape(1, -1)


# ----------------------------------------------------------------------------
# DoubleConv forward
# ----------------------------------------------------------------------------
def double_conv(x_nchw, params):
    """Forward of DoubleConv (training-mode BN batch stats). NCHW in/out."""
    w1, g1, b1, w2, g2, b2 = params
    N, cin, H, W = x_nchw.shape
    f = w1.shape[0]
    cp = _round_up(f, LANE)        # lane-dense channel count for both stages
    count = N * H * W

    x = jnp.transpose(x_nchw, (0, 2, 3, 1))                    # NCHW -> NHWC

    # Stage 1: conv1 + per-image BN partial stats.  The raw conv output stays
    # f32 for accuracy; TODO(synk): store bf16 to halve intermediate traffic.
    y1, st1 = _conv_pass(
        x, _fold_weight(w1, cin, cp),
        jnp.ones((1, cin), jnp.float32), jnp.zeros((1, cin), jnp.float32),
        cp, apply_act=False)
    scale1, shift1 = _bn_scale_shift(st1, _pad_channels(g1, cp),
                                     _pad_channels(b1, cp), count)

    # Stage 2: bn1 + relu1 fused into conv2 (+ partial stats).
    y2, st2 = _conv_pass(
        y1.reshape(N, H, W, cp), _fold_weight(w2, cp, cp),
        scale1, shift1, cp, apply_act=True)
    scale2, shift2 = _bn_scale_shift(st2, _pad_channels(g2, cp),
                                     _pad_channels(b2, cp), count)

    # Final bn2 + relu2 over lane-dense row tiles.
    out = _bn_relu_pass(y2.reshape(N * H * W, cp), scale2, shift2, x_nchw.dtype)
    out = out.reshape(N, H, W, cp)[..., :f]
    return jnp.transpose(out, (0, 3, 1, 2))                    # NHWC -> NCHW


# ----------------------------------------------------------------------------
# Pure-JAX reference (matches PyTorch forward in training mode)
# ----------------------------------------------------------------------------
def ref_double_conv(x_nchw, params):
    w1, g1, b1, w2, g2, b2 = params

    def stage(x, w, g, b):
        y = jax.lax.conv_general_dilated(
            x, w, window_strides=(1, 1), padding="SAME",
            dimension_numbers=("NCHW", "OIHW", "NCHW"))
        mean = y.mean(axis=(0, 2, 3), keepdims=True)
        var = jnp.mean((y - mean) ** 2, axis=(0, 2, 3), keepdims=True)
        y = (y - mean) * jax.lax.rsqrt(var + BN_EPS)
        y = y * g.reshape(1, -1, 1, 1) + b.reshape(1, -1, 1, 1)
        return jnp.maximum(y, 0.0)

    return stage(stage(x_nchw, w1, g1, b1), w2, g2, b2)


if __name__ == "__main__":
    key = jax.random.PRNGKey(0)
    k_x, k_w1, k_w2 = jax.random.split(key, 3)

    N, Cin, H, W, F = 2, 4, 16, 16, 8   # DoubleConv(in_channels=4, filters=8)

    x = jax.random.normal(k_x, (N, Cin, H, W), jnp.float32)
    # Conv weights: PyTorch OIHW shape, deterministic init.
    w1 = jax.random.normal(k_w1, (F, Cin, 3, 3), jnp.float32) * 0.1
    w2 = jax.random.normal(k_w2, (F, F, 3, 3), jnp.float32) * 0.1
    # BatchNorm affine params: PyTorch default init (gamma=1, beta=0).
    g1 = jnp.ones((F,), jnp.float32)
    b1 = jnp.zeros((F,), jnp.float32)
    g2 = jnp.ones((F,), jnp.float32)
    b2 = jnp.zeros((F,), jnp.float32)
    params = (w1, g1, b1, w2, g2, b2)

    out = jax.block_until_ready(jax.jit(double_conv)(x, params))
    ref = jax.block_until_ready(ref_double_conv(x, params))

    assert out.shape == (N, F, H, W), out.shape
    max_err = float(jnp.max(jnp.abs(out - ref)))
    assert jnp.allclose(out, ref, rtol=1e-3, atol=1e-3), f"max_err={max_err}"

    print("KERNEL_OK")
</pallas_src>

<mosaic_0001>
module attributes {stable_mosaic.version = 11 : i64} {
  func.func @_conv_stats_kernel(%arg0: i32, %arg1: memref<1x16x16x4xf32, #tpu.memory_space<vmem>>, %arg2: memref<36x128xf32, #tpu.memory_space<vmem>>, %arg3: memref<1x4xf32, #tpu.memory_space<vmem>>, %arg4: memref<1x4xf32, #tpu.memory_space<vmem>>, %arg5: memref<1x256x128xf32, #tpu.memory_space<vmem>>, %arg6: memref<1x2x128xf32, #tpu.memory_space<vmem>>, %arg7: memref<18x18x4xf32, #tpu.memory_space<vmem>>) attributes {dimension_semantics = [#tpu.dimension_semantics<parallel>], iteration_bounds = array<i64: 2>, scalar_prefetch = 0 : i64, scratch_operands = 1 : i64, tpu.core_type = #tpu.core_type<tc>, window_params = [{transform_indices = @transform_0, window_bounds = array<i64: 1, 16, 16, 4>}, {pipeline_mode = #tpu.pipeline_mode<synchronous>, transform_indices = @transform_1, window_bounds = array<i64: 36, 128>}, {pipeline_mode = #tpu.pipeline_mode<synchronous>, transform_indices = @transform_2, window_bounds = array<i64: 1, 4>}, {pipeline_mode = #tpu.pipeline_mode<synchronous>, transform_indices = @transform_3, window_bounds = array<i64: 1, 4>}, {transform_indices = @transform_4, window_bounds = array<i64: 1, 256, 128>}, {transform_indices = @transform_5, window_bounds = array<i64: 1, 2, 128>}]} {
    %c0 = arith.constant 0 : index
    %c0_0 = arith.constant 0 : index
    %c0_1 = arith.constant 0 : index
    %c0_2 = arith.constant 0 : index
    %0 = vector.load %arg1[%c0, %c0_0, %c0_1, %c0_2] : memref<1x16x16x4xf32, #tpu.memory_space<vmem>>, vector<1x16x16x4xf32>
    %1 = vector.shape_cast %0 : vector<1x16x16x4xf32> to vector<16x16x4xf32>
    %cst = arith.constant 0.000000e+00 : f32
    %2 = vector.broadcast %cst : f32 to vector<18x18x4xf32>
    %c0_3 = arith.constant 0 : index
    %c0_4 = arith.constant 0 : index
    %c0_5 = arith.constant 0 : index
    %3 = vector.load %arg7[%c0_3, %c0_4, %c0_5] : memref<18x18x4xf32, #tpu.memory_space<vmem>>, vector<18x18x4xf32>
    tpu.vector_store %arg7[%c0_3, %c0_4, %c0_5], %2 {strides = array<i32>} : memref<18x18x4xf32, #tpu.memory_space<vmem>>, vector<18x18x4xf32>,
    %c1 = arith.constant 1 : index
    %c1_6 = arith.constant 1 : index
    %c0_7 = arith.constant 0 : index
    %4 = vector.load %arg7[%c1, %c1_6, %c0_7] : memref<18x18x4xf32, #tpu.memory_space<vmem>>, vector<16x16x4xf32>
    tpu.vector_store %arg7[%c1, %c1_6, %c0_7], %1 {strides = array<i32>} : memref<18x18x4xf32, #tpu.memory_space<vmem>>, vector<16x16x4xf32>,
    %cst_8 = arith.constant 0.000000e+00 : f32
    %5 = vector.broadcast %cst_8 : f32 to vector<256x128xf32>
    %c0_9 = arith.constant 0 : index
    %c0_10 = arith.constant 0 : index
    %c0_11 = arith.constant 0 : index
    %6 = vector.load %arg7[%c0_9, %c0_10, %c0_11] : memref<18x18x4xf32, #tpu.memory_space<vmem>>, vector<16x16x4xf32>
    %7 = vector.shape_cast %6 : vector<16x16x4xf32> to vector<256x4xf32>
    %c0_12 = arith.constant 0 : index
    %c0_13 = arith.constant 0 : index
    %8 = vector.load %arg2[%c0_12, %c0_13] : memref<36x128xf32, #tpu.memory_space<vmem>>, vector<4x128xf32>
    %cst_14 = arith.constant dense<0.000000e+00> : vector<256x128xf32>
    %9 = tpu.matmul %7, %8, %cst_14 {dimension_numbers = #tpu.dot_dimension_numbers<[1], [0], [0], [1], [0, 0, 1, 1], [], []>} : vector<256x4xf32>, vector<4x128xf32>, vector<256x128xf32> -> vector<256x128xf32>
    %10 = arith.addf %5, %9 : vector<256x128xf32>
    %c0_15 = arith.constant 0 : index
    %c1_16 = arith.constant 1 : index
    %c0_17 = arith.constant 0 : index
    %11 = vector.load %arg7[%c0_15, %c1_16, %c0_17] : memref<18x18x4xf32, #tpu.memory_space<vmem>>, vector<16x16x4xf32>
    %12 = vector.shape_cast %11 : vector<16x16x4xf32> to vector<256x4xf32>
    %c4 = arith.constant 4 : index
    %c0_18 = arith.constant 0 : index
    %13 = vector.load %arg2[%c4, %c0_18] : memref<36x128xf32, #tpu.memory_space<vmem>>, vector<4x128xf32>
    %cst_19 = arith.constant dense<0.000000e+00> : vector<256x128xf32>
    %14 = tpu.matmul %12, %13, %cst_19 {dimension_numbers = #tpu.dot_dimension_numbers<[1], [0], [0], [1], [0, 0, 1, 1], [], []>} : vector<256x4xf32>, vector<4x128xf32>, vector<256x128xf32> -> vector<256x128xf32>
    %15 = arith.addf %10, %14 : vector<256x128xf32>
    %c0_20 = arith.constant 0 : index
    %c2 = arith.constant 2 : index
    %c0_21 = arith.constant 0 : index
    %16 = vector.load %arg7[%c0_20, %c2, %c0_21] : memref<18x18x4xf32, #tpu.memory_space<vmem>>, vector<16x16x4xf32>
    %17 = vector.shape_cast %16 : vector<16x16x4xf32> to vector<256x4xf32>
    %c8 = arith.constant 8 : index
    %c0_22 = arith.constant 0 : index
    %18 = vector.load %arg2[%c8, %c0_22] : memref<36x128xf32, #tpu.memory_space<vmem>>, vector<4x128xf32>
    %cst_23 = arith.constant dense<0.000000e+00> : vector<256x128xf32>
    %19 = tpu.matmul %17, %18, %cst_23 {dimension_numbers = #tpu.dot_dimension_numbers<[1], [0], [0], [1], [0, 0, 1, 1], [], []>} : vector<256x4xf32>, vector<4x128xf32>, vector<256x128xf32> -> vector<256x128xf32>
    %20 = arith.addf %15, %19 : vector<256x128xf32>
    %c1_24 = arith.constant 1 : index
    %c0_25 = arith.constant 0 : index
    %c0_26 = arith.constant 0 : index
    %21 = vector.load %arg7[%c1_24, %c0_25, %c0_26] : memref<18x18x4xf32, #tpu.memory_space<vmem>>, vector<16x16x4xf32>
    %22 = vector.shape_cast %21 : vector<16x16x4xf32> to vector<256x4xf32>
    %c12 = arith.constant 12 : index
    %c0_27 = arith.constant 0 : index
    %23 = vector.load %arg2[%c12, %c0_27] : memref<36x128xf32, #tpu.memory_space<vmem>>, vector<4x128xf32>
    %cst_28 = arith.constant dense<0.000000e+00> : vector<256x128xf32>
    %24 = tpu.matmul %22, %23, %cst_28 {dimension_numbers = #tpu.dot_dimension_numbers<[1], [0], [0], [1], [0, 0, 1, 1], [], []>} : vector<256x4xf32>, vector<4x128xf32>, vector<256x128xf32> -> vector<256x128xf32>
    %25 = arith.addf %20, %24 : vector<256x128xf32>
    %c1_29 = arith.constant 1 : index
    %c1_30 = arith.constant 1 : index
    %c0_31 = arith.constant 0 : index
    %26 = vector.load %arg7[%c1_29, %c1_30, %c0_31] : memref<18x18x4xf32, #tpu.memory_space<vmem>>, vector<16x16x4xf32>
    %27 = vector.shape_cast %26 : vector<16x16x4xf32> to vector<256x4xf32>
    %c16 = arith.constant 16 : index
    %c0_32 = arith.constant 0 : index
    %28 = vector.load %arg2[%c16, %c0_32] : memref<36x128xf32, #tpu.memory_space<vmem>>, vector<4x128xf32>
    %cst_33 = arith.constant dense<0.000000e+00> : vector<256x128xf32>
    %29 = tpu.matmul %27, %28, %cst_33 {dimension_numbers = #tpu.dot_dimension_numbers<[1], [0], [0], [1], [0, 0, 1, 1], [], []>} : vector<256x4xf32>, vector<4x128xf32>, vector<256x128xf32> -> vector<256x128xf32>
    %30 = arith.addf %25, %29 : vector<256x128xf32>
    %c1_34 = arith.constant 1 : index
    %c2_35 = arith.constant 2 : index
    %c0_36 = arith.constant 0 : index
    %31 = vector.load %arg7[%c1_34, %c2_35, %c0_36] : memref<18x18x4xf32, #tpu.memory_space<vmem>>, vector<16x16x4xf32>
    %32 = vector.shape_cast %31 : vector<16x16x4xf32> to vector<256x4xf32>
    %c20 = arith.constant 20 : index
    %c0_37 = arith.constant 0 : index
    %33 = vector.load %arg2[%c20, %c0_37] : memref<36x128xf32, #tpu.memory_space<vmem>>, vector<4x128xf32>
    %cst_38 = arith.constant dense<0.000000e+00> : vector<256x128xf32>
    %34 = tpu.matmul %32, %33, %cst_38 {dimension_numbers = #tpu.dot_dimension_numbers<[1], [0], [0], [1], [0, 0, 1, 1], [], []>} : vector<256x4xf32>, vector<4x128xf32>, vector<256x128xf32> -> vector<256x128xf32>
    %35 = arith.addf %30, %34 : vector<256x128xf32>
    %c2_39 = arith.constant 2 : index
    %c0_40 = arith.constant 0 : index
    %c0_41 = arith.constant 0 : index
    %36 = vector.load %arg7[%c2_39, %c0_40, %c0_41] : memref<18x18x4xf32, #tpu.memory_space<vmem>>, vector<16x16x4xf32>
    %37 = vector.shape_cast %36 : vector<16x16x4xf32> to vector<256x4xf32>
    %c24 = arith.constant 24 : index
    %c0_42 = arith.constant 0 : index
    %38 = vector.load %arg2[%c24, %c0_42] : memref<36x128xf32, #tpu.memory_space<vmem>>, vector<4x128xf32>
    %cst_43 = arith.constant dense<0.000000e+00> : vector<256x128xf32>
    %39 = tpu.matmul %37, %38, %cst_43 {dimension_numbers = #tpu.dot_dimension_numbers<[1], [0], [0], [1], [0, 0, 1, 1], [], []>} : vector<256x4xf32>, vector<4x128xf32>, vector<256x128xf32> -> vector<256x128xf32>
    %40 = arith.addf %35, %39 : vector<256x128xf32>
    %c2_44 = arith.constant 2 : index
    %c1_45 = arith.constant 1 : index
    %c0_46 = arith.constant 0 : index
    %41 = vector.load %arg7[%c2_44, %c1_45, %c0_46] : memref<18x18x4xf32, #tpu.memory_space<vmem>>, vector<16x16x4xf32>
    %42 = vector.shape_cast %41 : vector<16x16x4xf32> to vector<256x4xf32>
    %c28 = arith.constant 28 : index
    %c0_47 = arith.constant 0 : index
    %43 = vector.load %arg2[%c28, %c0_47] : memref<36x128xf32, #tpu.memory_space<vmem>>, vector<4x128xf32>
    %cst_48 = arith.constant dense<0.000000e+00> : vector<256x128xf32>
    %44 = tpu.matmul %42, %43, %cst_48 {dimension_numbers = #tpu.dot_dimension_numbers<[1], [0], [0], [1], [0, 0, 1, 1], [], []>} : vector<256x4xf32>, vector<4x128xf32>, vector<256x128xf32> -> vector<256x128xf32>
    %45 = arith.addf %40, %44 : vector<256x128xf32>
    %c2_49 = arith.constant 2 : index
    %c2_50 = arith.constant 2 : index
    %c0_51 = arith.constant 0 : index
    %46 = vector.load %arg7[%c2_49, %c2_50, %c0_51] : memref<18x18x4xf32, #tpu.memory_space<vmem>>, vector<16x16x4xf32>
    %47 = vector.shape_cast %46 : vector<16x16x4xf32> to vector<256x4xf32>
    %c32 = arith.constant 32 : index
    %c0_52 = arith.constant 0 : index
    %48 = vector.load %arg2[%c32, %c0_52] : memref<36x128xf32, #tpu.memory_space<vmem>>, vector<4x128xf32>
    %cst_53 = arith.constant dense<0.000000e+00> : vector<256x128xf32>
    %49 = tpu.matmul %47, %48, %cst_53 {dimension_numbers = #tpu.dot_dimension_numbers<[1], [0], [0], [1], [0, 0, 1, 1], [], []>} : vector<256x4xf32>, vector<4x128xf32>, vector<256x128xf32> -> vector<256x128xf32>
    %50 = arith.addf %45, %49 : vector<256x128xf32>
    %c0_54 = arith.constant 0 : index
    %c0_55 = arith.constant 0 : index
    %c0_56 = arith.constant 0 : index
    %51 = vector.load %arg5[%c0_54, %c0_55, %c0_56] : memref<1x256x128xf32, #tpu.memory_space<vmem>>, vector<1x256x128xf32>
    %52 = vector.shape_cast %51 : vector<1x256x128xf32> to vector<256x128xf32>
    %53 = vector.shape_cast %50 : vector<256x128xf32> to vector<1x256x128xf32>
    tpu.vector_store %arg5[%c0_54, %c0_55, %c0_56], %53 {strides = array<i32>} : memref<1x256x128xf32, #tpu.memory_space<vmem>>, vector<1x256x128xf32>,
    %cst_57 = arith.constant dense<0.000000e+00> : vector<128xf32>
    %54 = vector.multi_reduction <add>, %50, %cst_57 [0] : vector<256x128xf32> to vector<128xf32>
    %55 = vector.shape_cast %54 : vector<128xf32> to vector<1x128xf32>
    %c0_58 = arith.constant 0 : index
    %c0_59 = arith.constant 0 : index
    %c0_60 = arith.constant 0 : index
    %56 = vector.load %arg6[%c0_58, %c0_59, %c0_60] : memref<1x2x128xf32, #tpu.memory_space<vmem>>, vector<1x1x128xf32>
    %57 = vector.shape_cast %56 : vector<1x1x128xf32> to vector<1x128xf32>
    %58 = vector.shape_cast %55 : vector<1x128xf32> to vector<1x1x128xf32>
    tpu.vector_store %arg6[%c0_58, %c0_59, %c0_60], %58 {strides = array<i32>} : memref<1x2x128xf32, #tpu.memory_space<vmem>>, vector<1x1x128xf32>,
    %59 = arith.mulf %50, %50 : vector<256x128xf32>
    %cst_61 = arith.constant dense<0.000000e+00> : vector<128xf32>
    %60 = vector.multi_reduction <add>, %59, %cst_61 [0] : vector<256x128xf32> to vector<128xf32>
    %61 = vector.shape_cast %60 : vector<128xf32> to vector<1x128xf32>
    %c0_62 = arith.constant 0 : index
    %c1_63 = arith.constant 1 : index
    %c0_64 = arith.constant 0 : index
    %62 = vector.load %arg6[%c0_62, %c1_63, %c0_64] : memref<1x2x128xf32, #tpu.memory_space<vmem>>, vector<1x1x128xf32>
    %63 = vector.shape_cast %62 : vector<1x1x128xf32> to vector<1x128xf32>
    %64 = vector.shape_cast %61 : vector<1x128xf32> to vector<1x1x128xf32>
    tpu.vector_store %arg6[%c0_62, %c1_63, %c0_64], %64 {strides = array<i32>} : memref<1x2x128xf32, #tpu.memory_space<vmem>>, vector<1x1x128xf32>,
    return
  }
  func.func @transform_0(%arg0: i32) -> (i32, i32, i32, i32) {
    %c0_i32 = arith.constant 0 : i32
    %c0_i32_0 = arith.constant 0 : i32
    %c0_i32_1 = arith.constant 0 : i32
    %c0_i32_2 = arith.constant 0 : i32
    return %arg0, %c0_i32, %c0_i32_0, %c0_i32_1 : i32, i32, i32, i32
  }
  func.func @transform_1(%arg0: i32) -> (i32, i32) {
    %c0_i32 = arith.constant 0 : i32
    %c0_i32_0 = arith.constant 0 : i32
    %c0_i32_1 = arith.constant 0 : i32
    return %c0_i32, %c0_i32_0 : i32, i32
  }
  func.func @transform_2(%arg0: i32) -> (i32, i32) {
    %c0_i32 = arith.constant 0 : i32
    %c0_i32_0 = arith.constant 0 : i32
    %c0_i32_1 = arith.constant 0 : i32
    return %c0_i32, %c0_i32_0 : i32, i32
  }
  func.func @transform_3(%arg0: i32) -> (i32, i32) {
    %c0_i32 = arith.constant 0 : i32
    %c0_i32_0 = arith.constant 0 : i32
    %c0_i32_1 = arith.constant 0 : i32
    return %c0_i32, %c0_i32_0 : i32, i32
  }
  func.func @transform_4(%arg0: i32) -> (i32, i32, i32) {
    %c0_i32 = arith.constant 0 : i32
    %c0_i32_0 = arith.constant 0 : i32
    %c0_i32_1 = arith.constant 0 : i32
    return %arg0, %c0_i32, %c0_i32_0 : i32, i32, i32
  }
  func.func @transform_5(%arg0: i32) -> (i32, i32, i32) {
    %c0_i32 = arith.constant 0 : i32
    %c0_i32_0 = arith.constant 0 : i32
    %c0_i32_1 = arith.constant 0 : i32
    return %arg0, %c0_i32, %c0_i32_0 : i32, i32, i32
  }
}

module attributes {stable_mosaic.version = 11 : i64} {
  func.func @_bn_relu_kernel(%arg0: i32, %arg1: memref<512x128xf32, #tpu.memory_space<vmem>>, %arg2: memref<1x128xf32, #tpu.memory_space<vmem>>, %arg3: memref<1x128xf32, #tpu.memory_space<vmem>>, %arg4: memref<512x128xf32, #tpu.memory_space<vmem>>) attributes {dimension_semantics = [#tpu.dimension_semantics<parallel>], iteration_bounds = array<i64: 1>, scalar_prefetch = 0 : i64, scratch_operands = 0 : i64, tpu.core_type = #tpu.core_type<tc>, window_params = [{transform_indices = @transform_0, window_bounds = array<i64: 512, 128>}, {pipeline_mode = #tpu.pipeline_mode<synchronous>, transform_indices = @transform_1, window_bounds = array<i64: 1, 128>}, {pipeline_mode = #tpu.pipeline_mode<synchronous>, transform_indices = @transform_2, window_bounds = array<i64: 1, 128>}, {transform_indices = @transform_3, window_bounds = array<i64: 512, 128>}]} {
    %c0 = arith.constant 0 : index
    %c0_0 = arith.constant 0 : index
    %0 = vector.load %arg1[%c0, %c0_0] : memref<512x128xf32, #tpu.memory_space<vmem>>, vector<512x128xf32>
    %c0_1 = arith.constant 0 : index
    %c0_2 = arith.constant 0 : index
    %1 = vector.load %arg2[%c0_1, %c0_2] : memref<1x128xf32, #tpu.memory_space<vmem>>, vector<1x128xf32>
    %2 = vector.broadcast %1 : vector<1x128xf32> to vector<512x128xf32>
    %3 = arith.mulf %0, %2 : vector<512x128xf32>
    %c0_3 = arith.constant 0 : index
    %c0_4 = arith.constant 0 : index
    %4 = vector.load %arg3[%c0_3, %c0_4] : memref<1x128xf32, #tpu.memory_space<vmem>>, vector<1x128xf32>
    %5 = vector.broadcast %4 : vector<1x128xf32> to vector<512x128xf32>
    %6 = arith.addf %3, %5 : vector<512x128xf32>
    %cst = arith.constant 0.000000e+00 : f32
    %7 = vector.broadcast %cst : f32 to vector<512x128xf32>
    %8 = arith.maximumf %6, %7 : vector<512x128xf32>
    %c0_5 = arith.constant 0 : index
    %c0_6 = arith.constant 0 : index
    %9 = vector.load %arg4[%c0_5, %c0_6] : memref<512x128xf32, #tpu.memory_space<vmem>>, vector<512x128xf32>
    tpu.vector_store %arg4[%c0_5, %c0_6], %8 {strides = array<i32>} : memref<512x128xf32, #tpu.memory_space<vmem>>, vector<512x128xf32>,
    return
  }
  func.func @transform_0(%arg0: i32) -> (i32, i32) {
    %c0_i32 = arith.constant 0 : i32
    %c0_i32_0 = arith.constant 0 : i32
    return %arg0, %c0_i32 : i32, i32
  }
  func.func @transform_1(%arg0: i32) -> (i32, i32) {
    %c0_i32 = arith.constant 0 : i32
    %c0_i32_0 = arith.constant 0 : i32
    %c0_i32_1 = arith.constant 0 : i32
    return %c0_i32, %c0_i32_0 : i32, i32
  }
  func.func @transform_2(%arg0: i32) -> (i32, i32) {
    %c0_i32 = arith.constant 0 : i32
    %c0_i32_0 = arith.constant 0 : i32
    %c0_i32_1 = arith.constant 0 : i32
    return %c0_i32, %c0_i32_0 : i32, i32
  }
  func.func @transform_3(%arg0: i32) -> (i32, i32) {
    %c0_i32 = arith.constant 0 : i32
    %c0_i32_0 = arith.constant 0 : i32
    return %arg0, %c0_i32 : i32, i32
  }
}

module attributes {stable_mosaic.version = 11 : i64} {
  func.func @_conv_stats_kernel(%arg0: i32, %arg1: memref<1x16x16x128xf32, #tpu.memory_space<vmem>>, %arg2: memref<1152x128xf32, #tpu.memory_space<vmem>>, %arg3: memref<1x128xf32, #tpu.memory_space<vmem>>, %arg4: memref<1x128xf32, #tpu.memory_space<vmem>>, %arg5: memref<1x256x128xf32, #tpu.memory_space<vmem>>, %arg6: memref<1x2x128xf32, #tpu.memory_space<vmem>>, %arg7: memref<18x18x128xf32, #tpu.memory_space<vmem>>) attributes {dimension_semantics = [#tpu.dimension_semantics<parallel>], iteration_bounds = array<i64: 2>, scalar_prefetch = 0 : i64, scratch_operands = 1 : i64, tpu.core_type = #tpu.core_type<tc>, window_params = [{transform_indices = @transform_0, window_bounds = array<i64: 1, 16, 16, 128>}, {pipeline_mode = #tpu.pipeline_mode<synchronous>, transform_indices = @transform_1, window_bounds = array<i64: 1152, 128>}, {pipeline_mode = #tpu.pipeline_mode<synchronous>, transform_indices = @transform_2, window_bounds = array<i64: 1, 128>}, {pipeline_mode = #tpu.pipeline_mode<synchronous>, transform_indices = @transform_3, window_bounds = array<i64: 1, 128>}, {transform_indices = @transform_4, window_bounds = array<i64: 1, 256, 128>}, {transform_indices = @transform_5, window_bounds = array<i64: 1, 2, 128>}]} {
    %c0 = arith.constant 0 : index
    %c0_0 = arith.constant 0 : index
    %c0_1 = arith.constant 0 : index
    %c0_2 = arith.constant 0 : index
    %0 = vector.load %arg1[%c0, %c0_0, %c0_1, %c0_2] : memref<1x16x16x128xf32, #tpu.memory_space<vmem>>, vector<1x16x16x128xf32>
    %1 = vector.shape_cast %0 : vector<1x16x16x128xf32> to vector<16x16x128xf32>
    %c0_3 = arith.constant 0 : index
    %c0_4 = arith.constant 0 : index
    %2 = vector.load %arg3[%c0_3, %c0_4] : memref<1x128xf32, #tpu.memory_space<vmem>>, vector<1x128xf32>
    %3 = vector.shape_cast %2 : vector<1x128xf32> to vector<1x1x128xf32>
    %4 = vector.broadcast %3 : vector<1x1x128xf32> to vector<16x16x128xf32>
    %5 = arith.mulf %1, %4 : vector<16x16x128xf32>
    %c0_5 = arith.constant 0 : index
    %c0_6 = arith.constant 0 : index
    %6 = vector.load %arg4[%c0_5, %c0_6] : memref<1x128xf32, #tpu.memory_space<vmem>>, vector<1x128xf32>
    %7 = vector.shape_cast %6 : vector<1x128xf32> to vector<1x1x128xf32>
    %8 = vector.broadcast %7 : vector<1x1x128xf32> to vector<16x16x128xf32>
    %9 = arith.addf %5, %8 : vector<16x16x128xf32>
    %cst = arith.constant 0.000000e+00 : f32
    %10 = vector.broadcast %cst : f32 to vector<16x16x128xf32>
    %11 = arith.maximumf %9, %10 : vector<16x16x128xf32>
    %cst_7 = arith.constant 0.000000e+00 : f32
    %12 = vector.broadcast %cst_7 : f32 to vector<18x18x128xf32>
    %c0_8 = arith.constant 0 : index
    %c0_9 = arith.constant 0 : index
    %c0_10 = arith.constant 0 : index
    %13 = vector.load %arg7[%c0_8, %c0_9, %c0_10] : memref<18x18x128xf32, #tpu.memory_space<vmem>>, vector<18x18x128xf32>
    tpu.vector_store %arg7[%c0_8, %c0_9, %c0_10], %12 {strides = array<i32>} : memref<18x18x128xf32, #tpu.memory_space<vmem>>, vector<18x18x128xf32>,
    %c1 = arith.constant 1 : index
    %c1_11 = arith.constant 1 : index
    %c0_12 = arith.constant 0 : index
    %14 = vector.load %arg7[%c1, %c1_11, %c0_12] : memref<18x18x128xf32, #tpu.memory_space<vmem>>, vector<16x16x128xf32>
    tpu.vector_store %arg7[%c1, %c1_11, %c0_12], %11 {strides = array<i32>} : memref<18x18x128xf32, #tpu.memory_space<vmem>>, vector<16x16x128xf32>,
    %c0_13 = arith.constant 0 : index
    %c0_14 = arith.constant 0 : index
    %c0_15 = arith.constant 0 : index
    %15 = vector.load %arg7[%c0_13, %c0_14, %c0_15] : memref<18x18x128xf32, #tpu.memory_space<vmem>>, vector<16x16x128xf32>
    %16 = vector.shape_cast %15 : vector<16x16x128xf32> to vector<256x128xf32>
    %c0_16 = arith.constant 0 : index
    %c1_17 = arith.constant 1 : index
    %c0_18 = arith.constant 0 : index
    %17 = vector.load %arg7[%c0_16, %c1_17, %c0_18] : memref<18x18x128xf32, #tpu.memory_space<vmem>>, vector<16x16x128xf32>
    %18 = vector.shape_cast %17 : vector<16x16x128xf32> to vector<256x128xf32>
    %c0_19 = arith.constant 0 : index
    %c2 = arith.constant 2 : index
    %c0_20 = arith.constant 0 : index
    %19 = vector.load %arg7[%c0_19, %c2, %c0_20] : memref<18x18x128xf32, #tpu.memory_space<vmem>>, vector<16x16x128xf32>
    %20 = vector.shape_cast %19 : vector<16x16x128xf32> to vector<256x128xf32>
    %c1_21 = arith.constant 1 : index
    %c0_22 = arith.constant 0 : index
    %c0_23 = arith.constant 0 : index
    %21 = vector.load %arg7[%c1_21, %c0_22, %c0_23] : memref<18x18x128xf32, #tpu.memory_space<vmem>>, vector<16x16x128xf32>
    %22 = vector.shape_cast %21 : vector<16x16x128xf32> to vector<256x128xf32>
    %c1_24 = arith.constant 1 : index
    %c1_25 = arith.constant 1 : index
    %c0_26 = arith.constant 0 : index
    %23 = vector.load %arg7[%c1_24, %c1_25, %c0_26] : memref<18x18x128xf32, #tpu.memory_space<vmem>>, vector<16x16x128xf32>
    %24 = vector.shape_cast %23 : vector<16x16x128xf32> to vector<256x128xf32>
    %c1_27 = arith.constant 1 : index
    %c2_28 = arith.constant 2 : index
    %c0_29 = arith.constant 0 : index
    %25 = vector.load %arg7[%c1_27, %c2_28, %c0_29] : memref<18x18x128xf32, #tpu.memory_space<vmem>>, vector<16x16x128xf32>
    %26 = vector.shape_cast %25 : vector<16x16x128xf32> to vector<256x128xf32>
    %c2_30 = arith.constant 2 : index
    %c0_31 = arith.constant 0 : index
    %c0_32 = arith.constant 0 : index
    %27 = vector.load %arg7[%c2_30, %c0_31, %c0_32] : memref<18x18x128xf32, #tpu.memory_space<vmem>>, vector<16x16x128xf32>
    %28 = vector.shape_cast %27 : vector<16x16x128xf32> to vector<256x128xf32>
    %c2_33 = arith.constant 2 : index
    %c1_34 = arith.constant 1 : index
    %c0_35 = arith.constant 0 : index
    %29 = vector.load %arg7[%c2_33, %c1_34, %c0_35] : memref<18x18x128xf32, #tpu.memory_space<vmem>>, vector<16x16x128xf32>
    %30 = vector.shape_cast %29 : vector<16x16x128xf32> to vector<256x128xf32>
    %c2_36 = arith.constant 2 : index
    %c2_37 = arith.constant 2 : index
    %c0_38 = arith.constant 0 : index
    %31 = vector.load %arg7[%c2_36, %c2_37, %c0_38] : memref<18x18x128xf32, #tpu.memory_space<vmem>>, vector<16x16x128xf32>
    %32 = vector.shape_cast %31 : vector<16x16x128xf32> to vector<256x128xf32>
    %33 = tpu.concatenate %16, %18, %20, %22, %24, %26, %28, %30, %32 in 1 : vector<256x128xf32>, vector<256x128xf32>, vector<256x128xf32>, vector<256x128xf32>, vector<256x128xf32>, vector<256x128xf32>, vector<256x128xf32>, vector<256x128xf32>, vector<256x128xf32> -> vector<256x1152xf32>
    %c0_39 = arith.constant 0 : index
    %c0_40 = arith.constant 0 : index
    %34 = vector.load %arg2[%c0_39, %c0_40] : memref<1152x128xf32, #tpu.memory_space<vmem>>, vector<1152x128xf32>
    %cst_41 = arith.constant dense<0.000000e+00> : vector<256x128xf32>
    %35 = tpu.matmul %33, %34, %cst_41 {dimension_numbers = #tpu.dot_dimension_numbers<[1], [0], [0], [1], [0, 0, 1, 1], [], []>} : vector<256x1152xf32>, vector<1152x128xf32>, vector<256x128xf32> -> vector<256x128xf32>
    %c0_42 = arith.constant 0 : index
    %c0_43 = arith.constant 0 : index
    %c0_44 = arith.constant 0 : index
    %36 = vector.load %arg5[%c0_42, %c0_43, %c0_44] : memref<1x256x128xf32, #tpu.memory_space<vmem>>, vector<1x256x128xf32>
    %37 = vector.shape_cast %36 : vector<1x256x128xf32> to vector<256x128xf32>
    %38 = vector.shape_cast %35 : vector<256x128xf32> to vector<1x256x128xf32>
    tpu.vector_store %arg5[%c0_42, %c0_43, %c0_44], %38 {strides = array<i32>} : memref<1x256x128xf32, #tpu.memory_space<vmem>>, vector<1x256x128xf32>,
    %cst_45 = arith.constant dense<0.000000e+00> : vector<128xf32>
    %39 = vector.multi_reduction <add>, %35, %cst_45 [0] : vector<256x128xf32> to vector<128xf32>
    %40 = vector.shape_cast %39 : vector<128xf32> to vector<1x128xf32>
    %c0_46 = arith.constant 0 : index
    %c0_47 = arith.constant 0 : index
    %c0_48 = arith.constant 0 : index
    %41 = vector.load %arg6[%c0_46, %c0_47, %c0_48] : memref<1x2x128xf32, #tpu.memory_space<vmem>>, vector<1x1x128xf32>
    %42 = vector.shape_cast %41 : vector<1x1x128xf32> to vector<1x128xf32>
    %43 = vector.shape_cast %40 : vector<1x128xf32> to vector<1x1x128xf32>
    tpu.vector_store %arg6[%c0_46, %c0_47, %c0_48], %43 {strides = array<i32>} : memref<1x2x128xf32, #tpu.memory_space<vmem>>, vector<1x1x128xf32>,
    %44 = arith.mulf %35, %35 : vector<256x128xf32>
    %cst_49 = arith.constant dense<0.000000e+00> : vector<128xf32>
    %45 = vector.multi_reduction <add>, %44, %cst_49 [0] : vector<256x128xf32> to vector<128xf32>
    %46 = vector.shape_cast %45 : vector<128xf32> to vector<1x128xf32>
    %c0_50 = arith.constant 0 : index
    %c1_51 = arith.constant 1 : index
    %c0_52 = arith.constant 0 : index
    %47 = vector.load %arg6[%c0_50, %c1_51, %c0_52] : memref<1x2x128xf32, #tpu.memory_space<vmem>>, vector<1x1x128xf32>
    %48 = vector.shape_cast %47 : vector<1x1x128xf32> to vector<1x128xf32>
    %49 = vector.shape_cast %46 : vector<1x128xf32> to vector<1x1x128xf32>
    tpu.vector_store %arg6[%c0_50, %c1_51, %c0_52], %49 {strides = array<i32>} : memref<1x2x128xf32, #tpu.memory_space<vmem>>, vector<1x1x128xf32>,
    return
  }
  func.func @transform_0(%arg0: i32) -> (i32, i32, i32, i32) {
    %c0_i32 = arith.constant 0 : i32
    %c0_i32_0 = arith.constant 0 : i32
    %c0_i32_1 = arith.constant 0 : i32
    %c0_i32_2 = arith.constant 0 : i32
    return %arg0, %c0_i32, %c0_i32_0, %c0_i32_1 : i32, i32, i32, i32
  }
  func.func @transform_1(%arg0: i32) -> (i32, i32) {
    %c0_i32 = arith.constant 0 : i32
    %c0_i32_0 = arith.constant 0 : i32
    %c0_i32_1 = arith.constant 0 : i32
    return %c0_i32, %c0_i32_0 : i32, i32
  }
  func.func @transform_2(%arg0: i32) -> (i32, i32) {
    %c0_i32 = arith.constant 0 : i32
    %c0_i32_0 = arith.constant 0 : i32
    %c0_i32_1 = arith.constant 0 : i32
    return %c0_i32, %c0_i32_0 : i32, i32
  }
  func.func @transform_3(%arg0: i32) -> (i32, i32) {
    %c0_i32 = arith.constant 0 : i32
    %c0_i32_0 = arith.constant 0 : i32
    %c0_i32_1 = arith.constant 0 : i32
    return %c0_i32, %c0_i32_0 : i32, i32
  }
  func.func @transform_4(%arg0: i32) -> (i32, i32, i32) {
    %c0_i32 = arith.constant 0 : i32
    %c0_i32_0 = arith.constant 0 : i32
    %c0_i32_1 = arith.constant 0 : i32
    return %arg0, %c0_i32, %c0_i32_0 : i32, i32, i32
  }
  func.func @transform_5(%arg0: i32) -> (i32, i32, i32) {
    %c0_i32 = arith.constant 0 : i32
    %c0_i32_0 = arith.constant 0 : i32
    %c0_i32_1 = arith.constant 0 : i32
    return %arg0, %c0_i32, %c0_i32_0 : i32, i32, i32
  }
}

</mosaic_0001>

<bundles_post_ra>
// kernel: double_conv.5
= control target key start
LH: loop header
LB: loop body
LE: loop exit
PB: predicated region body
PF: predicated region fallthrough
CT: control target
= control target key end

     0   :  { %s896_s0 = inlined_call_operand.vmem [shape: f32[512,128], index: 0, kind: input, shape index: {}]   ;;  %s897_s1 = inlined_call_operand.vmem [shape: f32[1,128], index: 1, kind: input, shape index: {}]   ;;  %s898_s2 = inlined_call_operand.vmem [shape: f32[1,128], index: 2, kind: input, shape index: {}]   ;;  %s899_s3 = inlined_call_operand.vmem [shape: f32[512,128], index: 3, kind: output, shape index: {}]  }
   0x1   :  { %v14_v0 = vld [vmem:[%s896_s0] sm:$0xff]  ;;  %v15_v4 = vld [vmem:[%s896_s0 + $0x8] sm:$0xff]  ;;  %v16_v5 = vld [vmem:[%s896_s0 + $0x10] sm:$0xff] }
   0x2   :  { %v380_v1 = vld [vmem:[%s897_s1] ss:$0 sm:$0xff]  ;;  %v17_v6 = vld [vmem:[%s896_s0 + $0x18] sm:$0xff]  ;;  %v19_v11 = vld [vmem:[%s896_s0 + $0x28] sm:$0xff] }
   0x3   :  { %v385_v2 = vld [vmem:[%s898_s2] ss:$0 sm:$0xff]  ;;  %v85_v3 = vmul.f32 %v380_v1, %v14_v0  ;;  %v86_v7 = vmul.f32 %v380_v1, %v15_v4  ;;  %v87_v8 = vmul.f32 %v380_v1, %v16_v5  ;;  %v88_v9 = vmul.f32 %v380_v1, %v17_v6  ;;  %v20_v12 = vld [vmem:[%s896_s0 + $0x30] sm:$0xff]  ;;  %v21_v17 = vld [vmem:[%s896_s0 + $0x38] sm:$0xff] }
   0x4   :  { %v18_v10 = vld [vmem:[%s896_s0 + $0x20] sm:$0xff]  ;;  %v90_v15 = vmul.f32 %v380_v1, %v19_v11  ;;  %v91_v16 = vmul.f32 %v380_v1, %v20_v12  ;;  %v92_v21 = vmul.f32 %v380_v1, %v21_v17  ;;  %v23_v27 = vld [vmem:[%s896_s0 + $0x48] sm:$0xff]  ;;  %v24_v28 = vld [vmem:[%s896_s0 + $0x50] sm:$0xff] }
   0x5   :  { %v156_v13 = vadd.f32 %v385_v2, %v85_v3  ;;  %v89_v14 = vmul.f32 %v380_v1, %v18_v10  ;;  %v157_v18 = vadd.f32 %v385_v2, %v86_v7  ;;  %v158_v19 = vadd.f32 %v385_v2, %v87_v8  ;;  %v22_v22 = vld [vmem:[%s896_s0 + $0x40] sm:$0xff]  ;;  %v25_v29 = vld [vmem:[%s896_s0 + $0x58] sm:$0xff]  ;;  %v27_v35 = vld [vmem:[%s896_s0 + $0x68] sm:$0xff] }
   0x6   :  { %v159_v20 = vadd.f32 %v385_v2, %v88_v9  ;;  %v161_v25 = vadd.f32 %v385_v2, %v90_v15  ;;  %v162_v26 = vadd.f32 %v385_v2, %v91_v16  ;;  %v163_v33 = vadd.f32 %v385_v2, %v92_v21  ;;  %v26_v34 = vld [vmem:[%s896_s0 + $0x60] sm:$0xff]  ;;  %v28_v36 = vld [vmem:[%s896_s0 + $0x70] sm:$0xff]  ;;  %v29_v41 = vld [vmem:[%s896_s0 + $0x78] sm:$0xff] }
   0x7   :  { %v220_v23 = vmax.f32 %v156_v13, 0.0  ;;  %v160_v24 = vadd.f32 %v385_v2, %v89_v14  ;;  %v221_v30 = vmax.f32 %v157_v18, 0.0  ;;  %v222_v31 = vmax.f32 %v158_v19, 0.0  ;;  %v30_v54 = vld [vmem:[%s896_s0 + $0x80] sm:$0xff]  ;;  %v31_v59 = vld [vmem:[%s896_s0 + $0x88] sm:$0xff]  ;;  %v32_v60 = vld [vmem:[%s896_s0 + $0x90] sm:$0xff] }
   0x8   :  { %v223_v32 = vmax.f32 %v159_v20, 0.0  ;;  %v225_v38 = vmax.f32 %v161_v25, 0.0  ;;  %v226_v39 = vmax.f32 %v162_v26, 0.0  ;;  %v93_v40 = vmul.f32 %v380_v1, %v22_v22  ;;  %v33_v61 = vld [vmem:[%s896_s0 + $0x98] sm:$0xff]  ;;  %v34_v4 = vld [vmem:[%s896_s0 + $0xa0] sm:$0xff]  ;;  %v35_v5 = vld [vmem:[%s896_s0 + $0xa8] sm:$0xff] }
   0x9   :  { %284 = vst [vmem:[%s899_s3] sm:$0xff] %v220_v23  ;;  %v224_v37 = vmax.f32 %v160_v24, 0.0  ;;  %285 = vst [vmem:[%s899_s3 + $0x8] sm:$0xff] %v221_v30  ;;  %v227_v42 = vmax.f32 %v163_v33, 0.0  ;;  %v94_v43 = vmul.f32 %v380_v1, %v23_v27  ;;  %v95_v44 = vmul.f32 %v380_v1, %v24_v28  ;;  %v36_v6 = vld [vmem:[%s896_s0 + $0xb0] sm:$0xff]  ;;  %v37_v11 = vld [vmem:[%s896_s0 + $0xb8] sm:$0xff] }
   0xa   :  { %286 = vst [vmem:[%s899_s3 + $0x10] sm:$0xff] %v222_v31  ;;  %287 = vst [vmem:[%s899_s3 + $0x18] sm:$0xff] %v223_v32  ;;  %v96_v45 = vmul.f32 %v380_v1, %v25_v29  ;;  %v164_v46 = vadd.f32 %v385_v2, %v93_v40  ;;  %v97_v47 = vmul.f32 %v380_v1, %v26_v34  ;;  %v38_v24 = vld [vmem:[%s896_s0 + $0xc0] sm:$0xff]  ;;  %v39_v29 = vld [vmem:[%s896_s0 + $0xc8] sm:$0xff] }
   0xb   :  { %288 = vst [vmem:[%s899_s3 + $0x20] sm:$0xff] %v224_v37  ;;  %289 = vst [vmem:[%s899_s3 + $0x28] sm:$0xff] %v225_v38  ;;  %v98_v48 = vmul.f32 %v380_v1, %v27_v35  ;;  %v99_v49 = vmul.f32 %v380_v1, %v28_v36  ;;  %v165_v50 = vadd.f32 %v385_v2, %v94_v43  ;;  %v40_v30 = vld [vmem:[%s896_s0 + $0xd0] sm:$0xff]  ;;  %v41_v31 = vld [vmem:[%s896_s0 + $0xd8] sm:$0xff] }
   0xc   :  { %290 = vst [vmem:[%s899_s3 + $0x30] sm:$0xff] %v226_v39  ;;  %291 = vst [vmem:[%s899_s3 + $0x38] sm:$0xff] %v227_v42  ;;  %v166_v51 = vadd.f32 %v385_v2, %v95_v44  ;;  %v167_v52 = vadd.f32 %v385_v2, %v96_v45  ;;  %v100_v53 = vmul.f32 %v380_v1, %v29_v41  ;;  %v228_v55 = vmax.f32 %v164_v46, 0.0  ;;  %v42_v36 = vld [vmem:[%s896_s0 + $0xe0] sm:$0xff]  ;;  %v43_v37 = vld [vmem:[%s896_s0 + $0xe8] sm:$0xff] }
   0xd   :  { %v168_v56 = vadd.f32 %v385_v2, %v97_v47  ;;  %v169_v57 = vadd.f32 %v385_v2, %v98_v48  ;;  %v170_v58 = vadd.f32 %v385_v2, %v99_v49  ;;  %v229_v62 = vmax.f32 %v165_v50, 0.0  ;;  %v44_v38 = vld [vmem:[%s896_s0 + $0xf0] sm:$0xff]  ;;  %v45_v43 = vld [vmem:[%s896_s0 + $0xf8] sm:$0xff] }
   0xe   :  { %v230_v63 = vmax.f32 %v166_v51, 0.0  ;;  %v231_v0 = vmax.f32 %v167_v52, 0.0  ;;  %v171_v3 = vadd.f32 %v385_v2, %v100_v53  ;;  %292 = vst [vmem:[%s899_s3 + $0x40] sm:$0xff] %v228_v55  ;;  %v101_v10 = vmul.f32 %v380_v1, %v30_v54 }
   0xf   :  { %v232_v7 = vmax.f32 %v168_v56, 0.0  ;;  %v233_v8 = vmax.f32 %v169_v57, 0.0  ;;  %v234_v9 = vmax.f32 %v170_v58, 0.0  ;;  %293 = vst [vmem:[%s899_s3 + $0x48] sm:$0xff] %v229_v62  ;;  %v102_v13 = vmul.f32 %v380_v1, %v31_v59  ;;  %v46_v56 = vld [vmem:[%s896_s0 + $0x100] sm:$0xff]  ;;  %v48_v62 = vld [vmem:[%s896_s0 + $0x110] sm:$0xff] }
  0x10   :  { %294 = vst [vmem:[%s899_s3 + $0x50] sm:$0xff] %v230_v63  ;;  %295 = vst [vmem:[%s899_s3 + $0x58] sm:$0xff] %v231_v0  ;;  %v235_v12 = vmax.f32 %v171_v3, 0.0  ;;  %v103_v14 = vmul.f32 %v380_v1, %v32_v60  ;;  %v104_v15 = vmul.f32 %v380_v1, %v33_v61  ;;  %v172_v16 = vadd.f32 %v385_v2, %v101_v10  ;;  %v47_v61 = vld [vmem:[%s896_s0 + $0x108] sm:$0xff]  ;;  %v49_v63 = vld [vmem:[%s896_s0 + $0x118] sm:$0xff] }
  0x11   :  { %296 = vst [vmem:[%s899_s3 + $0x60] sm:$0xff] %v232_v7  ;;  %297 = vst [vmem:[%s899_s3 + $0x68] sm:$0xff] %v233_v8  ;;  %v105_v17 = vmul.f32 %v380_v1, %v34_v4  ;;  %v106_v18 = vmul.f32 %v380_v1, %v35_v5  ;;  %v107_v19 = vmul.f32 %v380_v1, %v36_v6  ;;  %v50_v6 = vld [vmem:[%s896_s0 + $0x120] sm:$0xff]  ;;  %v51_v7 = vld [vmem:[%s896_s0 + $0x128] sm:$0xff] }
  0x12   :  { %298 = vst [vmem:[%s899_s3 + $0x70] sm:$0xff] %v234_v9  ;;  %299 = vst [vmem:[%s899_s3 + $0x78] sm:$0xff] %v235_v12  ;;  %v173_v20 = vadd.f32 %v385_v2, %v102_v13  ;;  %v174_v21 = vadd.f32 %v385_v2, %v103_v14  ;;  %v175_v22 = vadd.f32 %v385_v2, %v104_v15  ;;  %v236_v25 = vmax.f32 %v172_v16, 0.0  ;;  %v52_v8 = vld [vmem:[%s896_s0 + $0x130] sm:$0xff]  ;;  %v53_v13 = vld [vmem:[%s896_s0 + $0x138] sm:$0xff] }
  0x13   :  { %v108_v23 = vmul.f32 %v380_v1, %v37_v11  ;;  %v176_v26 = vadd.f32 %v385_v2, %v105_v17  ;;  %v177_v27 = vadd.f32 %v385_v2, %v106_v18  ;;  %v178_v28 = vadd.f32 %v385_v2, %v107_v19 }
  0x14   :  { %v237_v32 = vmax.f32 %v173_v20, 0.0  ;;  %v238_v33 = vmax.f32 %v174_v21, 0.0  ;;  %v239_v34 = vmax.f32 %v175_v22, 0.0  ;;  %300 = vst [vmem:[%s899_s3 + $0x80] sm:$0xff] %v236_v25  ;;  %v109_v42 = vmul.f32 %v380_v1, %v38_v24 }
  0x15   :  { %v179_v35 = vadd.f32 %v385_v2, %v108_v23  ;;  %v240_v39 = vmax.f32 %v176_v26, 0.0  ;;  %v241_v40 = vmax.f32 %v177_v27, 0.0  ;;  %v242_v41 = vmax.f32 %v178_v28, 0.0  ;;  %v54_v26 = vld [vmem:[%s896_s0 + $0x140] sm:$0xff] }
  0x16   :  { %301 = vst [vmem:[%s899_s3 + $0x88] sm:$0xff] %v237_v32  ;;  %302 = vst [vmem:[%s899_s3 + $0x90] sm:$0xff] %v238_v33  ;;  %v110_v45 = vmul.f32 %v380_v1, %v39_v29  ;;  %v111_v46 = vmul.f32 %v380_v1, %v40_v30  ;;  %v112_v47 = vmul.f32 %v380_v1, %v41_v31  ;;  %v55_v31 = vld [vmem:[%s896_s0 + $0x148] sm:$0xff]  ;;  %v56_v32 = vld [vmem:[%s896_s0 + $0x150] sm:$0xff] }
  0x17   :  { %303 = vst [vmem:[%s899_s3 + $0x98] sm:$0xff] %v239_v34  ;;  %v243_v44 = vmax.f32 %v179_v35, 0.0  ;;  %304 = vst [vmem:[%s899_s3 + $0xa0] sm:$0xff] %v240_v39  ;;  %v180_v48 = vadd.f32 %v385_v2, %v109_v42  ;;  %v113_v49 = vmul.f32 %v380_v1, %v42_v36  ;;  %v114_v50 = vmul.f32 %v380_v1, %v43_v37  ;;  %v57_v33 = vld [vmem:[%s896_s0 + $0x158] sm:$0xff]  ;;  %v59_v39 = vld [vmem:[%s896_s0 + $0x168] sm:$0xff] }
  0x18   :  { %305 = vst [vmem:[%s899_s3 + $0xa8] sm:$0xff] %v241_v40  ;;  %306 = vst [vmem:[%s899_s3 + $0xb0] sm:$0xff] %v242_v41  ;;  %v115_v51 = vmul.f32 %v380_v1, %v44_v38  ;;  %v181_v52 = vadd.f32 %v385_v2, %v110_v45  ;;  %v182_v53 = vadd.f32 %v385_v2, %v111_v46  ;;  %v58_v38 = vld [vmem:[%s896_s0 + $0x160] sm:$0xff]  ;;  %v60_v40 = vld [vmem:[%s896_s0 + $0x170] sm:$0xff] }
  0x19   :  { %307 = vst [vmem:[%s899_s3 + $0xb8] sm:$0xff] %v243_v44  ;;  %v183_v54 = vadd.f32 %v385_v2, %v112_v47  ;;  %v116_v55 = vmul.f32 %v380_v1, %v45_v43  ;;  %v244_v57 = vmax.f32 %v180_v48, 0.0  ;;  %v184_v58 = vadd.f32 %v385_v2, %v113_v49  ;;  %v61_v45 = vld [vmem:[%s896_s0 + $0x178] sm:$0xff] }
  0x1a   :  { %v185_v59 = vadd.f32 %v385_v2, %v114_v50  ;;  %v186_v60 = vadd.f32 %v385_v2, %v115_v51  ;;  %v245_v0 = vmax.f32 %v181_v52, 0.0  ;;  %v246_v3 = vmax.f32 %v182_v53, 0.0 }
  0x1b   :  { %v247_v4 = vmax.f32 %v183_v54, 0.0  ;;  %v187_v5 = vadd.f32 %v385_v2, %v116_v55  ;;  %308 = vst [vmem:[%s899_s3 + $0xc0] sm:$0xff] %v244_v57  ;;  %v248_v9 = vmax.f32 %v184_v58, 0.0  ;;  %v117_v12 = vmul.f32 %v380_v1, %v46_v56  ;;  %v62_v58 = vld [vmem:[%s896_s0 + $0x180] sm:$0xff] }
  0x1c   :  { %v249_v10 = vmax.f32 %v185_v59, 0.0  ;;  %v250_v11 = vmax.f32 %v186_v60, 0.0  ;;  %309 = vst [vmem:[%s899_s3 + $0xc8] sm:$0xff] %v245_v0  ;;  %310 = vst [vmem:[%s899_s3 + $0xd0] sm:$0xff] %v246_v3  ;;  %v118_v15 = vmul.f32 %v380_v1, %v47_v61  ;;  %v119_v16 = vmul.f32 %v380_v1, %v48_v62  ;;  %v64_v0 = vld [vmem:[%s896_s0 + $0x190] sm:$0xff]  ;;  %v65_v3 = vld [vmem:[%s896_s0 + $0x198] sm:$0xff] }
  0x1d   :  { %311 = vst [vmem:[%s899_s3 + $0xd8] sm:$0xff] %v247_v4  ;;  %v251_v14 = vmax.f32 %v187_v5, 0.0  ;;  %v120_v17 = vmul.f32 %v380_v1, %v49_v63  ;;  %312 = vst [vmem:[%s899_s3 + $0xe0] sm:$0xff] %v248_v9  ;;  %v188_v18 = vadd.f32 %v385_v2, %v117_v12  ;;  %v121_v19 = vmul.f32 %v380_v1, %v50_v6  ;;  %v63_v63 = vld [vmem:[%s896_s0 + $0x188] sm:$0xff] }
  0x1e   :  { %313 = vst [vmem:[%s899_s3 + $0xe8] sm:$0xff] %v249_v10  ;;  %314 = vst [vmem:[%s899_s3 + $0xf0] sm:$0xff] %v250_v11  ;;  %v122_v20 = vmul.f32 %v380_v1, %v51_v7  ;;  %v123_v21 = vmul.f32 %v380_v1, %v52_v8  ;;  %v189_v22 = vadd.f32 %v385_v2, %v118_v15  ;;  %v66_v8 = vld [vmem:[%s896_s0 + $0x1a0] sm:$0xff]  ;;  %v67_v9 = vld [vmem:[%s896_s0 + $0x1a8] sm:$0xff] }
  0x1f   :  { %315 = vst [vmem:[%s899_s3 + $0xf8] sm:$0xff] %v251_v14  ;;  %v190_v23 = vadd.f32 %v385_v2, %v119_v16  ;;  %v191_v24 = vadd.f32 %v385_v2, %v120_v17  ;;  %v124_v25 = vmul.f32 %v380_v1, %v53_v13  ;;  %v252_v27 = vmax.f32 %v188_v18, 0.0  ;;  %v68_v10 = vld [vmem:[%s896_s0 + $0x1b0] sm:$0xff]  ;;  %v69_v15 = vld [vmem:[%s896_s0 + $0x1b8] sm:$0xff] }
  0x20   :  { %v192_v28 = vadd.f32 %v385_v2, %v121_v19  ;;  %v193_v29 = vadd.f32 %v385_v2, %v122_v20  ;;  %v194_v30 = vadd.f32 %v385_v2, %v123_v21  ;;  %v253_v34 = vmax.f32 %v189_v22, 0.0 }
  0x21   :  { %v254_v35 = vmax.f32 %v190_v23, 0.0  ;;  %v255_v36 = vmax.f32 %v191_v24, 0.0  ;;  %v195_v37 = vadd.f32 %v385_v2, %v124_v25  ;;  %316 = vst [vmem:[%s899_s3 + $0x100] sm:$0xff] %v252_v27  ;;  %v125_v44 = vmul.f32 %v380_v1, %v54_v26 }
  0x22   :  { %v256_v41 = vmax.f32 %v192_v28, 0.0  ;;  %v257_v42 = vmax.f32 %v193_v29, 0.0  ;;  %v258_v43 = vmax.f32 %v194_v30, 0.0  ;;  %317 = vst [vmem:[%s899_s3 + $0x108] sm:$0xff] %v253_v34  ;;  %v126_v47 = vmul.f32 %v380_v1, %v55_v31  ;;  %v70_v28 = vld [vmem:[%s896_s0 + $0x1c0] sm:$0xff]  ;;  %v72_v34 = vld [vmem:[%s896_s0 + $0x1d0] sm:$0xff] }
  0x23   :  { %318 = vst [vmem:[%s899_s3 + $0x110] sm:$0xff] %v254_v35  ;;  %319 = vst [vmem:[%s899_s3 + $0x118] sm:$0xff] %v255_v36  ;;  %v259_v46 = vmax.f32 %v195_v37, 0.0  ;;  %v127_v48 = vmul.f32 %v380_v1, %v56_v32  ;;  %v128_v49 = vmul.f32 %v380_v1, %v57_v33  ;;  %v196_v50 = vadd.f32 %v385_v2, %v125_v44  ;;  %v71_v33 = vld [vmem:[%s896_s0 + $0x1c8] sm:$0xff]  ;;  %v73_v35 = vld [vmem:[%s896_s0 + $0x1d8] sm:$0xff] }
  0x24   :  { %320 = vst [vmem:[%s899_s3 + $0x120] sm:$0xff] %v256_v41  ;;  %321 = vst [vmem:[%s899_s3 + $0x128] sm:$0xff] %v257_v42  ;;  %v129_v51 = vmul.f32 %v380_v1, %v58_v38  ;;  %v130_v52 = vmul.f32 %v380_v1, %v59_v39  ;;  %v131_v53 = vmul.f32 %v380_v1, %v60_v40  ;;  %v74_v40 = vld [vmem:[%s896_s0 + $0x1e0] sm:$0xff]  ;;  %v75_v41 = vld [vmem:[%s896_s0 + $0x1e8] sm:$0xff] }
  0x25   :  { %322 = vst [vmem:[%s899_s3 + $0x130] sm:$0xff] %v258_v43  ;;  %323 = vst [vmem:[%s899_s3 + $0x138] sm:$0xff] %v259_v46  ;;  %v197_v54 = vadd.f32 %v385_v2, %v126_v47  ;;  %v198_v55 = vadd.f32 %v385_v2, %v127_v48  ;;  %v199_v56 = vadd.f32 %v385_v2, %v128_v49  ;;  %v260_v59 = vmax.f32 %v196_v50, 0.0  ;;  %v76_v42 = vld [vmem:[%s896_s0 + $0x1f0] sm:$0xff]  ;;  %v77_v47 = vld [vmem:[%s896_s0 + $0x1f8] sm:$0xff] }
  0x26   :  { %v132_v57 = vmul.f32 %v380_v1, %v61_v45  ;;  %v200_v60 = vadd.f32 %v385_v2, %v129_v51  ;;  %v201_v61 = vadd.f32 %v385_v2, %v130_v52  ;;  %v202_v62 = vadd.f32 %v385_v2, %v131_v53 }
  0x27   :  { %v261_v4 = vmax.f32 %v197_v54, 0.0  ;;  %v262_v5 = vmax.f32 %v198_v55, 0.0  ;;  %v263_v6 = vmax.f32 %v199_v56, 0.0  ;;  %324 = vst [vmem:[%s899_s3 + $0x140] sm:$0xff] %v260_v59  ;;  %v133_v14 = vmul.f32 %v380_v1, %v62_v58 }
  0x28   :  { %v203_v7 = vadd.f32 %v385_v2, %v132_v57  ;;  %v264_v11 = vmax.f32 %v200_v60, 0.0  ;;  %v265_v12 = vmax.f32 %v201_v61, 0.0  ;;  %v266_v13 = vmax.f32 %v202_v62, 0.0 }
  0x29   :  { %325 = vst [vmem:[%s899_s3 + $0x148] sm:$0xff] %v261_v4  ;;  %326 = vst [vmem:[%s899_s3 + $0x150] sm:$0xff] %v262_v5  ;;  %v134_v17 = vmul.f32 %v380_v1, %v63_v63  ;;  %v135_v18 = vmul.f32 %v380_v1, %v64_v0  ;;  %v136_v19 = vmul.f32 %v380_v1, %v65_v3 }
  0x2a   :  { %327 = vst [vmem:[%s899_s3 + $0x158] sm:$0xff] %v263_v6  ;;  %v267_v16 = vmax.f32 %v203_v7, 0.0  ;;  %328 = vst [vmem:[%s899_s3 + $0x160] sm:$0xff] %v264_v11  ;;  %v204_v20 = vadd.f32 %v385_v2, %v133_v14  ;;  %v137_v21 = vmul.f32 %v380_v1, %v66_v8  ;;  %v138_v22 = vmul.f32 %v380_v1, %v67_v9 }
  0x2b   :  { %329 = vst [vmem:[%s899_s3 + $0x168] sm:$0xff] %v265_v12  ;;  %330 = vst [vmem:[%s899_s3 + $0x170] sm:$0xff] %v266_v13  ;;  %v139_v23 = vmul.f32 %v380_v1, %v68_v10  ;;  %v205_v24 = vadd.f32 %v385_v2, %v134_v17  ;;  %v206_v25 = vadd.f32 %v385_v2, %v135_v18 }
  0x2c   :  { %331 = vst [vmem:[%s899_s3 + $0x178] sm:$0xff] %v267_v16  ;;  %v207_v26 = vadd.f32 %v385_v2, %v136_v19  ;;  %v140_v27 = vmul.f32 %v380_v1, %v69_v15  ;;  %v268_v29 = vmax.f32 %v204_v20, 0.0  ;;  %v208_v30 = vadd.f32 %v385_v2, %v137_v21 }
  0x2d   :  { %v209_v31 = vadd.f32 %v385_v2, %v138_v22  ;;  %v210_v32 = vadd.f32 %v385_v2, %v139_v23  ;;  %v269_v36 = vmax.f32 %v205_v24, 0.0  ;;  %v270_v37 = vmax.f32 %v206_v25, 0.0 }
  0x2e   :  { %v271_v38 = vmax.f32 %v207_v26, 0.0  ;;  %v211_v39 = vadd.f32 %v385_v2, %v140_v27  ;;  %332 = vst [vmem:[%s899_s3 + $0x180] sm:$0xff] %v268_v29  ;;  %v272_v43 = vmax.f32 %v208_v30, 0.0  ;;  %v141_v46 = vmul.f32 %v380_v1, %v70_v28 }
  0x2f   :  { %v273_v44 = vmax.f32 %v209_v31, 0.0  ;;  %v274_v45 = vmax.f32 %v210_v32, 0.0  ;;  %333 = vst [vmem:[%s899_s3 + $0x188] sm:$0xff] %v269_v36  ;;  %334 = vst [vmem:[%s899_s3 + $0x190] sm:$0xff] %v270_v37  ;;  %v142_v49 = vmul.f32 %v380_v1, %v71_v33  ;;  %v143_v50 = vmul.f32 %v380_v1, %v72_v34 }
  0x30   :  { %335 = vst [vmem:[%s899_s3 + $0x198] sm:$0xff] %v271_v38  ;;  %v275_v48 = vmax.f32 %v211_v39, 0.0  ;;  %v144_v51 = vmul.f32 %v380_v1, %v73_v35  ;;  %336 = vst [vmem:[%s899_s3 + $0x1a0] sm:$0xff] %v272_v43  ;;  %v212_v52 = vadd.f32 %v385_v2, %v141_v46  ;;  %v145_v53 = vmul.f32 %v380_v1, %v74_v40 }
  0x31   :  { %337 = vst [vmem:[%s899_s3 + $0x1a8] sm:$0xff] %v273_v44  ;;  %338 = vst [vmem:[%s899_s3 + $0x1b0] sm:$0xff] %v274_v45  ;;  %v146_v54 = vmul.f32 %v380_v1, %v75_v41  ;;  %v147_v55 = vmul.f32 %v380_v1, %v76_v42  ;;  %v213_v56 = vadd.f32 %v385_v2, %v142_v49 }
  0x32   :  { %339 = vst [vmem:[%s899_s3 + $0x1b8] sm:$0xff] %v275_v48  ;;  %v214_v57 = vadd.f32 %v385_v2, %v143_v50  ;;  %v215_v58 = vadd.f32 %v385_v2, %v144_v51  ;;  %v148_v59 = vmul.f32 %v380_v1, %v77_v47  ;;  %v276_v60 = vmax.f32 %v212_v52, 0.0 }
  0x33   :  { %v216_v61 = vadd.f32 %v385_v2, %v145_v53  ;;  %v217_v62 = vadd.f32 %v385_v2, %v146_v54  ;;  %v218_v63 = vadd.f32 %v385_v2, %v147_v55  ;;  %v277_v0 = vmax.f32 %v213_v56, 0.0 }
  0x34   :  { %v278_v3 = vmax.f32 %v214_v57, 0.0  ;;  %v279_v4 = vmax.f32 %v215_v58, 0.0  ;;  %v219_v5 = vadd.f32 %v385_v2, %v148_v59  ;;  %340 = vst [vmem:[%s899_s3 + $0x1c0] sm:$0xff] %v276_v60 }
  0x35   :  { %v280_v6 = vmax.f32 %v216_v61, 0.0  ;;  %v281_v7 = vmax.f32 %v217_v62, 0.0  ;;  %v282_v8 = vmax.f32 %v218_v63, 0.0  ;;  %341 = vst [vmem:[%s899_s3 + $0x1c8] sm:$0xff] %v277_v0 }
  0x36   :  { %342 = vst [vmem:[%s899_s3 + $0x1d0] sm:$0xff] %v278_v3  ;;  %343 = vst [vmem:[%s899_s3 + $0x1d8] sm:$0xff] %v279_v4  ;;  %v283_v1 = vmax.f32 %v219_v5, 0.0 }
  0x37   :  { %344 = vst [vmem:[%s899_s3 + $0x1e0] sm:$0xff] %v280_v6  ;;  %345 = vst [vmem:[%s899_s3 + $0x1e8] sm:$0xff] %v281_v7 }
  0x38   :  { %346 = vst [vmem:[%s899_s3 + $0x1f0] sm:$0xff] %v282_v8  ;;  %347 = vst [vmem:[%s899_s3 + $0x1f8] sm:$0xff] %v283_v1 }

// kernel: double_conv.3
= control target key start
LH: loop header
LB: loop body
LE: loop exit
PB: predicated region body
PF: predicated region fallthrough
CT: control target
= control target key end

     0   :  { %s5386_s18 = smov 0   ;;  %s6416_s0 = inlined_call_operand.vmem [shape: f32[2,16,16,4], index: 0, kind: input, shape index: {}]   ;;  %s6417_s1 = inlined_call_operand.vmem [shape: f32[36,128], index: 1, kind: input, shape index: {}]   ;;  %s6418_s2 = inlined_call_operand.vmem [shape: f32[1,4], index: 2, kind: input, shape index: {}]   ;;  %s6419_s3 = inlined_call_operand.vmem [shape: f32[1,4], index: 3, kind: input, shape index: {}]   ;;  %s6420_s4 = inlined_call_operand.vmem [shape: f32[2,256,128], index: 4, kind: output, shape index: {0}]   ;;  %s6421_s5 = inlined_call_operand.vmem [shape: f32[2,2,128], index: 5, kind: output, shape index: {1}]  }
   0x1 LB: > { %s4022_s2 = sadd.s32 4294967295, %s5353_s18   ;;  %p4026_p0 = scmp.ge.s32.totalorder %s5353_s18, 1  ;;  %s5353_s18 = sphi %s5386_s18, %s16_s18  }
   0x2   : > { %p190_p1 = scmp.lt.s32.totalorder %s5353_s18, 3 }
   0x4   : > { %p191_p2 = pnand %p4026_p0, %p190_p1 }
   0x6   : > { %194 = sbr.rel (%p191_p2) target bundleno = 568 (0x238), region = 36 }
   0xd   : > { %v5397_v0 = vld [vmem:[%s6417_s1 + $0x4] sm:$0xf]  ;;  %vm519_vm0 = vcmask 1043456   ;;  %vm268_vm1 = vcmask 31744   ;;  %vm271_vm2 = vcmask 25600   ;;  %v5355_v1 = vmov 0.0  }
   0xe   : > { %4630 = vmatprep.subr.msk.mxu1 %vm519_vm0, %v5397_v0  ;;  %269 = vst.msk [vmem:[#allocation2] sm:$0xff] %vm268_vm1, %v5355_v1  ;;  %270 = vst.msk [vmem:[#allocation2 + $0x8] sm:$0xff] %vm268_vm1, %v5355_v1  ;;  %v5458_v2 = vld [vmem:[%s6417_s1 + $0x10] sm:$0xf]  ;;  %p222_p3 = scmp.lt.s32.totalorder %s4022_s2, 1 }
   0xf   : > { %273 = vst.msk [vmem:[#allocation2 + $0x18] sm:$0xff] %vm268_vm1, %v5355_v1  ;;  %274 = vst.msk [vmem:[#allocation2 + $0x20] sm:$0xff] %vm268_vm1, %v5355_v1  ;;  %v389_v3 = vld [vmem:[%s6417_s1] sm:$0xf]  ;;  %4631 = vmatpush3.msk.msra.mxu1 %vm519_vm0, %v5397_v0  ;;  %4830 = vmatprep.subr.msk.mxu0 %vm519_vm0, %v5458_v2  ;;  %v5472_v4 = vld [vmem:[%s6417_s1 + $0x14] sm:$0xf] }
  0x10   : > { %276 = vst.msk [vmem:[#allocation2 + $0x30] sm:$0xff] %vm268_vm1, %v5355_v1  ;;  %277 = vst.msk [vmem:[#allocation2 + $0x38] sm:$0xff] %vm268_vm1, %v5355_v1  ;;  %4831 = vmatpush3.msk.msra.mxu0 %vm519_vm0, %v5458_v2  ;;  %s6531_s2 = smov (!%p222_p3, %s4022_s2), 1  ;;  %4680 = vmatprep.subr.msk.mxu1 %vm519_vm0, %v389_v3  ;;  %v5497_v8 = vld [vmem:[%s6417_s1 + $0x8] sm:$0xf] }
  0x11   : > { %279 = vst.msk [vmem:[#allocation2 + $0x48] sm:$0xff] %vm268_vm1, %v5355_v1  ;;  %280 = vst.msk [vmem:[#allocation2 + $0x50] sm:$0xff] %vm268_vm1, %v5355_v1  ;;  %4880 = vmatprep.subr.msk.mxu0 %vm519_vm0, %v5472_v4  ;;  %s4331_s26 = sshll.u32 %s6531_s2, 8  ;;  %v5552_v33 = vld [vmem:[%s6417_s1 + $0x18] sm:$0xf]  ;;  %s4031_s3 = sshll.u32 %s6531_s2, 1 }
  0x12   : > { %282 = vst.msk [vmem:[#allocation2 + $0x60] sm:$0xff] %vm268_vm1, %v5355_v1  ;;  %283 = vst.msk [vmem:[#allocation2 + $0x68] sm:$0xff] %vm268_vm1, %v5355_v1  ;;  %s5489_s29 = scalar_lea.vmem %s6416_s0, %s4331_s26  ;;  %v5681_v63 = vld [vmem:[%s6417_s1 + $0x1c] sm:$0xf]  ;;  %s6370_s17 = scalar_lea.vmem %s6420_s4, %s4331_s26 }
  0x13   : > { %285 = vst.msk [vmem:[#allocation2 + $0x78] sm:$0xff] %vm268_vm1, %v5355_v1  ;;  %286 = vst.msk [vmem:[#allocation2 + $0x80] sm:$0xff] %vm268_vm1, %v5355_v1  ;;  %v236_v5 = vld [vmem:[%s5489_s29] sm:$0xff]  ;;  %v237_v6 = vld [vmem:[%s5489_s29 + $0x8] sm:$0xff]  ;;  %s235_s21 = scalar_lea.vmem %s6421_s5, %s4031_s3 }
  0x14   : > { %288 = vst.msk [vmem:[#allocation2 + $0x90] sm:$0xff] %vm268_vm1, %v5355_v1  ;;  %289 = vst.msk [vmem:[#allocation2 + $0x98] sm:$0xff] %vm268_vm1, %v5355_v1  ;;  %v238_v7 = vld [vmem:[%s5489_s29 + $0x10] sm:$0xff]  ;;  %v239_v11 = vld [vmem:[%s5489_s29 + $0x18] sm:$0xff] }
  0x15   : > { %291 = vst.msk [vmem:[#allocation2 + $0xa8] sm:$0xff] %vm268_vm1, %v5355_v1  ;;  %292 = vst.msk [vmem:[#allocation2 + $0xb0] sm:$0xff] %vm268_vm1, %v5355_v1  ;;  %v390_v9 = vld [vmem:[#allocation2 + $0x1] sm:$0xff]  ;;  %v242_v14 = vld [vmem:[%s5489_s29 + $0x30] sm:$0xff] }
  0x16   : > { %294 = vst.msk [vmem:[#allocation2 + $0xc0] sm:$0xff] %vm268_vm1, %v5355_v1  ;;  %295 = vst.msk [vmem:[#allocation2 + $0xc8] sm:$0xff] %vm268_vm1, %v5355_v1  ;;  %4632 = vmatprep.mubr.msk.f32.mxu1 %vm268_vm1, %v390_v9  ;;  %v240_v12 = vld [vmem:[%s5489_s29 + $0x20] sm:$0xff]  ;;  %v241_v13 = vld [vmem:[%s5489_s29 + $0x28] sm:$0xff] }
  0x17   : > { %297 = vst.msk [vmem:[#allocation2 + $0xd8] sm:$0xff] %vm268_vm1, %v5355_v1  ;;  %298 = vst.msk [vmem:[#allocation2 + $0xe0] sm:$0xff] %vm268_vm1, %v5355_v1  ;;  %v243_v15 = vld [vmem:[%s5489_s29 + $0x38] sm:$0xff]  ;;  %v244_v16 = vld [vmem:[%s5489_s29 + $0x40] sm:$0xff] }
  0x18   : > { %300 = vst.msk [vmem:[#allocation2 + $0xf0] sm:$0xff] %vm268_vm1, %v5355_v1  ;;  %301 = vst.msk [vmem:[#allocation2 + $0xf8] sm:$0xff] %vm268_vm1, %v5355_v1  ;;  %v245_v17 = vld [vmem:[%s5489_s29 + $0x48] sm:$0xff]  ;;  %v246_v18 = vld [vmem:[%s5489_s29 + $0x50] sm:$0xff] }
  0x19   : > { %303 = vst.msk [vmem:[#allocation2 + $0x108] sm:$0xff] %vm268_vm1, %v5355_v1  ;;  %304 = vst.msk [vmem:[#allocation2 + $0x110] sm:$0xff] %vm268_vm1, %v5355_v1  ;;  %v247_v19 = vld [vmem:[%s5489_s29 + $0x58] sm:$0xff]  ;;  %v248_v20 = vld [vmem:[%s5489_s29 + $0x60] sm:$0xff] }
  0x1a   : > { %306 = vst.msk [vmem:[#allocation2 + $0x120] sm:$0xff] %vm268_vm1, %v5355_v1  ;;  %307 = vst.msk [vmem:[#allocation2 + $0x128] sm:$0xff] %vm268_vm1, %v5355_v1  ;;  %v249_v21 = vld [vmem:[%s5489_s29 + $0x68] sm:$0xff]  ;;  %v250_v22 = vld [vmem:[%s5489_s29 + $0x70] sm:$0xff] }
  0x1b   : > { %309 = vst.msk [vmem:[#allocation2 + $0x138] sm:$0xff] %vm268_vm1, %v5355_v1  ;;  %310 = vst.msk [vmem:[#allocation2 + $0x140] sm:$0xff] %vm268_vm1, %v5355_v1  ;;  %v251_v23 = vld [vmem:[%s5489_s29 + $0x78] sm:$0xff]  ;;  %v252_v24 = vld [vmem:[%s5489_s29 + $0x80] sm:$0xff] }
  0x1c   : > { %312 = vst.msk [vmem:[#allocation2 + $0x150] sm:$0xff] %vm268_vm1, %v5355_v1  ;;  %313 = vst.msk [vmem:[#allocation2 + $0x158] sm:$0xff] %vm268_vm1, %v5355_v1  ;;  %v253_v25 = vld [vmem:[%s5489_s29 + $0x88] sm:$0xff]  ;;  %v254_v26 = vld [vmem:[%s5489_s29 + $0x90] sm:$0xff] }
  0x1d   : > { %315 = vst.msk [vmem:[#allocation2 + $0x168] sm:$0xff] %vm268_vm1, %v5355_v1  ;;  %316 = vst.msk [vmem:[#allocation2 + $0x170] sm:$0xff] %vm268_vm1, %v5355_v1  ;;  %v255_v27 = vld [vmem:[%s5489_s29 + $0x98] sm:$0xff]  ;;  %v256_v28 = vld [vmem:[%s5489_s29 + $0xa0] sm:$0xff] }
  0x1e   : > { %318 = vst.msk [vmem:[#allocation2 + $0x180] sm:$0xff] %vm268_vm1, %v5355_v1  ;;  %319 = vst.msk [vmem:[#allocation2 + $0x188] sm:$0xff] %vm268_vm1, %v5355_v1  ;;  %v257_v29 = vld [vmem:[%s5489_s29 + $0xa8] sm:$0xff]  ;;  %v258_v38 = vld [vmem:[%s5489_s29 + $0xb0] sm:$0xff] }
  0x1f   : > { %321 = vst.msk [vmem:[#allocation2 + $0x198] sm:$0xff] %vm268_vm1, %v5355_v1  ;;  %322 = vst.msk [vmem:[#allocation2 + $0x1a0] sm:$0xff] %vm268_vm1, %v5355_v1  ;;  %v259_v39 = vld [vmem:[%s5489_s29 + $0xb8] sm:$0xff]  ;;  %v260_v40 = vld [vmem:[%s5489_s29 + $0xc0] sm:$0xff] }
  0x20   : > { %272 = vst.msk [vmem:[#allocation2 + $0x10] sm:$0x3] %vm271_vm2, %v5355_v1  ;;  %275 = vst.msk [vmem:[#allocation2 + $0x28] sm:$0x3] %vm271_vm2, %v5355_v1  ;;  %v261_v42 = vld [vmem:[%s5489_s29 + $0xc8] sm:$0xff]  ;;  %v262_v44 = vld [vmem:[%s5489_s29 + $0xd0] sm:$0xff] }
  0x21   : > { %278 = vst.msk [vmem:[#allocation2 + $0x40] sm:$0x3] %vm271_vm2, %v5355_v1  ;;  %281 = vst.msk [vmem:[#allocation2 + $0x58] sm:$0x3] %vm271_vm2, %v5355_v1  ;;  %v263_v45 = vld [vmem:[%s5489_s29 + $0xd8] sm:$0xff]  ;;  %v264_v46 = vld [vmem:[%s5489_s29 + $0xe0] sm:$0xff] }
  0x22   : > { %284 = vst.msk [vmem:[#allocation2 + $0x70] sm:$0x3] %vm271_vm2, %v5355_v1  ;;  %287 = vst.msk [vmem:[#allocation2 + $0x88] sm:$0x3] %vm271_vm2, %v5355_v1  ;;  %v265_v47 = vld [vmem:[%s5489_s29 + $0xe8] sm:$0xff]  ;;  %v266_v57 = vld [vmem:[%s5489_s29 + $0xf0] sm:$0xff] }
  0x23   : > { %290 = vst.msk [vmem:[#allocation2 + $0xa0] sm:$0x3] %vm271_vm2, %v5355_v1  ;;  %293 = vst.msk [vmem:[#allocation2 + $0xb8] sm:$0x3] %vm271_vm2, %v5355_v1  ;;  %v267_v58 = vld [vmem:[%s5489_s29 + $0xf8] sm:$0xff] }
  0x24   : > { %296 = vst.msk [vmem:[#allocation2 + $0xd0] sm:$0x3] %vm271_vm2, %v5355_v1  ;;  %299 = vst.msk [vmem:[#allocation2 + $0xe8] sm:$0x3] %vm271_vm2, %v5355_v1 }
  0x25   : > { %302 = vst.msk [vmem:[#allocation2 + $0x100] sm:$0x3] %vm271_vm2, %v5355_v1  ;;  %305 = vst.msk [vmem:[#allocation2 + $0x118] sm:$0x3] %vm271_vm2, %v5355_v1 }
  0x26   : > { %308 = vst.msk [vmem:[#allocation2 + $0x130] sm:$0x3] %vm271_vm2, %v5355_v1  ;;  %311 = vst.msk [vmem:[#allocation2 + $0x148] sm:$0x3] %vm271_vm2, %v5355_v1 }
  0x27   : > { %314 = vst.msk [vmem:[#allocation2 + $0x160] sm:$0x3] %vm271_vm2, %v5355_v1  ;;  %317 = vst.msk [vmem:[#allocation2 + $0x178] sm:$0x3] %vm271_vm2, %v5355_v1  ;;  %v391_v10 = vld [vmem:[#allocation2 + $0x9] sm:$0xff] }
  0x28   : > { %320 = vst.msk [vmem:[#allocation2 + $0x190] sm:$0x3] %vm271_vm2, %v5355_v1  ;;  %323 = vst.msk [vmem:[#allocation2 + $0x1a8] sm:$0x3] %vm271_vm2, %v5355_v1  ;;  %4633 = vmatmul.mubr.msk.f32.vlgmr.msra.gmra.mrb[0].mxu1 %vm268_vm1, %v391_v10 }
  0x29   : > { %325 = vst.msk [vmem:[#allocation2 + $0x19] sm:$0xff] %vm268_vm1, %v236_v5  ;;  %326 = vst.msk [vmem:[#allocation2 + $0x21] sm:$0xff] %vm268_vm1, %v237_v6  ;;  %4681 = vmatpush3.msk.msra.mxu1 %vm519_vm0, %v389_v3 }
  0x2a   : > { %327 = vst.msk [vmem:[#allocation2 + $0x31] sm:$0xff] %vm268_vm1, %v238_v7  ;;  %328 = vst.msk [vmem:[#allocation2 + $0x39] sm:$0xff] %vm268_vm1, %v239_v11  ;;  %4730 = vmatprep.subr.msk.mxu1 %vm519_vm0, %v5497_v8 }
  0x2b   : > { %329 = vst.msk [vmem:[#allocation2 + $0x49] sm:$0xff] %vm268_vm1, %v240_v12  ;;  %330 = vst.msk [vmem:[#allocation2 + $0x51] sm:$0xff] %vm268_vm1, %v241_v13 }
  0x2c   : > { %331 = vst.msk [vmem:[#allocation2 + $0x61] sm:$0xff] %vm268_vm1, %v242_v14  ;;  %332 = vst.msk [vmem:[#allocation2 + $0x69] sm:$0xff] %vm268_vm1, %v243_v15 }
  0x2d   : > { %333 = vst.msk [vmem:[#allocation2 + $0x79] sm:$0xff] %vm268_vm1, %v244_v16  ;;  %334 = vst.msk [vmem:[#allocation2 + $0x81] sm:$0xff] %vm268_vm1, %v245_v17 }
  0x2e   : > { %335 = vst.msk [vmem:[#allocation2 + $0x91] sm:$0xff] %vm268_vm1, %v246_v18  ;;  %336 = vst.msk [vmem:[#allocation2 + $0x99] sm:$0xff] %vm268_vm1, %v247_v19 }
  0x2f   : > { %337 = vst.msk [vmem:[#allocation2 + $0xa9] sm:$0xff] %vm268_vm1, %v248_v20  ;;  %338 = vst.msk [vmem:[#allocation2 + $0xb1] sm:$0xff] %vm268_vm1, %v249_v21 }
  0x30   : > { %339 = vst.msk [vmem:[#allocation2 + $0xc1] sm:$0xff] %vm268_vm1, %v250_v22  ;;  %340 = vst.msk [vmem:[#allocation2 + $0xc9] sm:$0xff] %vm268_vm1, %v251_v23  ;;  %v392_v30 = vld [vmem:[#allocation2 + $0x19] sm:$0xff]  ;;  %v393_v31 = vld [vmem:[#allocation2 + $0x21] sm:$0xff] }
  0x31   : > { %341 = vst.msk [vmem:[#allocation2 + $0xd9] sm:$0xff] %vm268_vm1, %v252_v24  ;;  %342 = vst.msk [vmem:[#allocation2 + $0xe1] sm:$0xff] %vm268_vm1, %v253_v25  ;;  %v5542_v32 = vld [vmem:[#allocation2 + $0x31] sm:$0xff]  ;;  %4635 = vmatprep.mubr.msk.f32.mxu1 %vm268_vm1, %v392_v30  ;;  %4832 = vmatprep.mubr.msk.f32.mxu0 %vm268_vm1, %v392_v30  ;;  %v5560_v34 = vld [vmem:[#allocation2 + $0x39] sm:$0xff] }
  0x32   : > { %343 = vst.msk [vmem:[#allocation2 + $0xf1] sm:$0xff] %vm268_vm1, %v254_v26  ;;  %344 = vst.msk [vmem:[#allocation2 + $0xf9] sm:$0xff] %vm268_vm1, %v255_v27  ;;  %4636 = vmatmul.mubr.msk.f32.gmra.mrb[2].mxu1 %vm268_vm1, %v393_v31  ;;  %4833 = vmatmul.mubr.msk.f32.vlgmr.msra.gmra.mrb[0].mxu0 %vm268_vm1, %v393_v31  ;;  %v5564_v35 = vld [vmem:[#allocation2 + $0x49] sm:$0xff]  ;;  %v5576_v36 = vld [vmem:[#allocation2 + $0x51] sm:$0xff] }
  0x33   : > { %345 = vst.msk [vmem:[#allocation2 + $0x109] sm:$0xff] %vm268_vm1, %v256_v28  ;;  %346 = vst.msk [vmem:[#allocation2 + $0x111] sm:$0xff] %vm268_vm1, %v257_v29  ;;  %4881 = vmatpush3.msk.msra.mxu0 %vm519_vm0, %v5472_v4  ;;  %4638 = vmatprep.mubr.msk.f32.mxu1 %vm268_vm1, %v5542_v32  ;;  %v5578_v37 = vld [vmem:[#allocation2 + $0x61] sm:$0xff]  ;;  %v5592_v41 = vld [vmem:[#allocation2 + $0x69] sm:$0xff] }
  0x34   : > { %4835 = vmatprep.mubr.msk.f32.mxu0 %vm268_vm1, %v5542_v32  ;;  %4930 = vmatprep.subr.msk.mxu0 %vm519_vm0, %v5552_v33  ;;  %347 = vst.msk [vmem:[#allocation2 + $0x121] sm:$0xff] %vm268_vm1, %v258_v38  ;;  %348 = vst.msk [vmem:[#allocation2 + $0x129] sm:$0xff] %vm268_vm1, %v259_v39  ;;  %v5597_v43 = vld [vmem:[#allocation2 + $0x79] sm:$0xff]  ;;  %v5615_v48 = vld [vmem:[#allocation2 + $0x81] sm:$0xff] }
  0x35   : > { %349 = vst.msk [vmem:[#allocation2 + $0x139] sm:$0xff] %vm268_vm1, %v260_v40  ;;  %350 = vst.msk [vmem:[#allocation2 + $0x141] sm:$0xff] %vm268_vm1, %v261_v42  ;;  %v5618_v49 = vld [vmem:[#allocation2 + $0x91] sm:$0xff]  ;;  %v5628_v50 = vld [vmem:[#allocation2 + $0x99] sm:$0xff] }
  0x36   : > { %4639 = vmatmul.mubr.msk.f32.gmra.mrb[4].mxu1 %vm268_vm1, %v5560_v34  ;;  %4836 = vmatmul.mubr.msk.f32.gmra.mrb[2].mxu0 %vm268_vm1, %v5560_v34  ;;  %351 = vst.msk [vmem:[#allocation2 + $0x151] sm:$0xff] %vm268_vm1, %v262_v44  ;;  %352 = vst.msk [vmem:[#allocation2 + $0x159] sm:$0xff] %vm268_vm1, %v263_v45  ;;  %v5630_v51 = vld [vmem:[#allocation2 + $0xa9] sm:$0xff]  ;;  %v5640_v52 = vld [vmem:[#allocation2 + $0xb1] sm:$0xff] }
  0x37   : > { %4641 = vmatprep.mubr.msk.f32.mxu1 %vm268_vm1, %v5564_v35  ;;  %4838 = vmatprep.mubr.msk.f32.mxu0 %vm268_vm1, %v5564_v35  ;;  %353 = vst.msk [vmem:[#allocation2 + $0x169] sm:$0xff] %vm268_vm1, %v264_v46  ;;  %354 = vst.msk [vmem:[#allocation2 + $0x171] sm:$0xff] %vm268_vm1, %v265_v47  ;;  %v5642_v53 = vld [vmem:[#allocation2 + $0xc1] sm:$0xff]  ;;  %v5652_v54 = vld [vmem:[#allocation2 + $0xc9] sm:$0xff] }
  0x38   : > { %6468 = vst [vmem:[#allocation3_spill] sm:$0xff] %v5652_v54  ;;  %v5654_v55 = vld [vmem:[#allocation2 + $0x1a] sm:$0xff]  ;;  %355 = vst.msk [vmem:[#allocation2 + $0x181] sm:$0xff] %vm268_vm1, %v266_v57  ;;  %v5672_v60 = vld [vmem:[#allocation2 + $0x22] sm:$0xff] }
  0x39   : > { %v5656_v56 = vld [vmem:[#allocation2 + $0xd9] sm:$0xff]  ;;  %356 = vst.msk [vmem:[#allocation2 + $0x189] sm:$0xff] %vm268_vm1, %v267_v58  ;;  %v5670_v59 = vld [vmem:[#allocation2 + $0xe1] sm:$0xff]  ;;  %v5674_v61 = vld [vmem:[#allocation2 + $0xf1] sm:$0xff] }
  0x3a   : > { %4642 = vmatmul.mubr.msk.f32.gmra.mrb[6].mxu1 %vm268_vm1, %v5576_v36  ;;  %4839 = vmatmul.mubr.msk.f32.gmra.mrb[4].mxu0 %vm268_vm1, %v5576_v36  ;;  %6469 = vst [vmem:[#allocation4_spill] sm:$0xff] %v5656_v56  ;;  %6470 = vst [vmem:[#allocation5_spill] sm:$0xff] %v5670_v59  ;;  %v5676_v62 = vld [vmem:[#allocation2 + $0x32] sm:$0xff]  ;;  %v5693_v1 = vld [vmem:[#allocation2 + $0x3a] sm:$0xff] }
  0x3b   : > { %4644 = vmatprep.mubr.msk.f32.mxu1 %vm268_vm1, %v5578_v37  ;;  %4841 = vmatprep.mubr.msk.f32.mxu0 %vm268_vm1, %v5578_v37  ;;  %6471 = vst [vmem:[#allocation6_spill] sm:$0xff] %v5674_v61  ;;  %v5691_v0 = vld [vmem:[#allocation2 + $0xf9] sm:$0xff]  ;;  %v5697_v3 = vld [vmem:[#allocation2 + $0x109] sm:$0xff]  ;;  %v5711_v5 = vld [vmem:[#allocation2 + $0x111] sm:$0xff] }
  0x3c   : > { %6472 = vst [vmem:[#allocation7_spill] sm:$0xff] %v5691_v0  ;;  %6473 = vst [vmem:[#allocation8_spill] sm:$0xff] %v5697_v3  ;;  %v5699_v4 = vld [vmem:[#allocation2 + $0x4a] sm:$0xff]  ;;  %v5713_v6 = vld [vmem:[#allocation2 + $0x52] sm:$0xff] }
  0x3d   : > { %6474 = vst [vmem:[#allocation9_spill] sm:$0xff] %v5711_v5  ;;  %v5715_v7 = vld [vmem:[#allocation2 + $0x121] sm:$0xff]  ;;  %v5727_v10 = vld [vmem:[#allocation2 + $0x129] sm:$0xff]  ;;  %v5731_v12 = vld [vmem:[#allocation2 + $0x139] sm:$0xff] }
  0x3e   : > { %4645 = vmatmul.mubr.msk.f32.gmra.mrb[8].mxu1 %vm268_vm1, %v5592_v41  ;;  %4842 = vmatmul.mubr.msk.f32.gmra.mrb[6].mxu0 %vm268_vm1, %v5592_v41  ;;  %6475 = vst [vmem:[#allocation10_spill] sm:$0xff] %v5715_v7  ;;  %v5717_v9 = vld [vmem:[#allocation2 + $0x62] sm:$0xff]  ;;  %6476 = vst [vmem:[#allocation11_spill] sm:$0xff] %v5727_v10  ;;  %v5729_v11 = vld [vmem:[#allocation2 + $0x6a] sm:$0xff] }
  0x3f   : > { %4647 = vmatprep.mubr.msk.f32.mxu1 %vm268_vm1, %v5597_v43  ;;  %4844 = vmatprep.mubr.msk.f32.mxu0 %vm268_vm1, %v5597_v43  ;;  %6477 = vst [vmem:[#allocation12_spill] sm:$0xff] %v5731_v12  ;;  %v5733_v13 = vld [vmem:[#allocation2 + $0x7a] sm:$0xff]  ;;  %v5745_v15 = vld [vmem:[#allocation2 + $0x82] sm:$0xff]  ;;  %v5747_v16 = vld [vmem:[#allocation2 + $0x151] sm:$0xff] }
  0x40   : > { %v5743_v14 = vld [vmem:[#allocation2 + $0x141] sm:$0xff]  ;;  %6479 = vst [vmem:[#allocation14_spill] sm:$0xff] %v5747_v16  ;;  %v5749_v17 = vld [vmem:[#allocation2 + $0x92] sm:$0xff]  ;;  %v5763_v20 = vld [vmem:[#allocation2 + $0x169] sm:$0xff] }
  0x41   : > { %6478 = vst [vmem:[#allocation13_spill] sm:$0xff] %v5743_v14  ;;  %v5759_v18 = vld [vmem:[#allocation2 + $0x159] sm:$0xff]  ;;  %6481 = vst [vmem:[#allocation16_spill] sm:$0xff] %v5763_v20  ;;  %v5765_v21 = vld [vmem:[#allocation2 + $0xaa] sm:$0xff] }
  0x42   : > { %4648 = vmatmul.mubr.msk.f32.gmra.mrb[10].mxu1 %vm268_vm1, %v5615_v48  ;;  %4845 = vmatmul.mubr.msk.f32.gmra.mrb[8].mxu0 %vm268_vm1, %v5615_v48  ;;  %6480 = vst [vmem:[#allocation15_spill] sm:$0xff] %v5759_v18  ;;  %v5761_v19 = vld [vmem:[#allocation2 + $0x9a] sm:$0xff]  ;;  %v5775_v22 = vld [vmem:[#allocation2 + $0x171] sm:$0xff]  ;;  %v5779_v25 = vld [vmem:[#allocation2 + $0xc2] sm:$0xff] }
  0x43   : > { %4650 = vmatprep.mubr.msk.f32.mxu1 %vm268_vm1, %v5618_v49  ;;  %4847 = vmatprep.mubr.msk.f32.mxu0 %vm268_vm1, %v5618_v49  ;;  %6482 = vst [vmem:[#allocation17_spill] sm:$0xff] %v5775_v22  ;;  %v5777_v23 = vld [vmem:[#allocation2 + $0xb2] sm:$0xff]  ;;  %v357_v24 = vld [vmem:[#allocation2] sm:$0xff]  ;;  %v358_v26 = vld [vmem:[#allocation2 + $0x8] sm:$0xff] }
  0x44   : > { %v5788_v27 = vld [vmem:[#allocation2 + $0xca] sm:$0xff]  ;;  %v5790_v28 = vld [vmem:[#allocation2 + $0x18] sm:$0xff]  ;;  %v5806_v31 = vld [vmem:[#allocation2 + $0x20] sm:$0xff] }
  0x45   : > { %6483 = vst [vmem:[#allocation18_spill] sm:$0xff] %v5790_v28  ;;  %v5792_v29 = vld [vmem:[#allocation2 + $0xda] sm:$0xff]  ;;  %v5800_v30 = vld [vmem:[%s6417_s1 + $0xc] sm:$0xf]  ;;  %6484 = vst [vmem:[#allocation19_spill] sm:$0xff] %v5806_v31 }
  0x46   : > { %4651 = vmatmul.mubr.msk.f32.gmra.mrb[12].mxu1 %vm268_vm1, %v5628_v50  ;;  %4848 = vmatmul.mubr.msk.f32.gmra.mrb[10].mxu0 %vm268_vm1, %v5628_v50  ;;  %v5812_v38 = vld [vmem:[#allocation2 + $0x30] sm:$0xff]  ;;  %v5828_v40 = vld [vmem:[#allocation2 + $0xfa] sm:$0xff]  ;;  %v5830_v42 = vld [vmem:[#allocation2 + $0x48] sm:$0xff] }
  0x47   : > { %4653 = vmatprep.mubr.msk.f32.mxu1 %vm268_vm1, %v5630_v51  ;;  %4850 = vmatprep.mubr.msk.f32.mxu0 %vm268_vm1, %v5630_v51  ;;  %6485 = vst [vmem:[#allocation20_spill] sm:$0xff] %v5812_v38  ;;  %v5814_v39 = vld [vmem:[#allocation2 + $0xf2] sm:$0xff]  ;;  %6487 = vst [vmem:[#allocation22_spill] sm:$0xff] %v5830_v42  ;;  %v5832_v44 = vld [vmem:[#allocation2 + $0x10a] sm:$0xff] }
  0x48   : > { %v5842_v45 = vld [vmem:[#allocation2 + $0x50] sm:$0xff]  ;;  %v5846_v47 = vld [vmem:[#allocation2 + $0x60] sm:$0xff]  ;;  %v5858_v58 = vld [vmem:[#allocation2 + $0x68] sm:$0xff] }
  0x49   : > { %6488 = vst [vmem:[#allocation23_spill] sm:$0xff] %v5842_v45  ;;  %v5844_v46 = vld [vmem:[#allocation2 + $0x112] sm:$0xff]  ;;  %6489 = vst [vmem:[#allocation24_spill] sm:$0xff] %v5846_v47  ;;  %v5848_v57 = vld [vmem:[#allocation2 + $0x122] sm:$0xff] }
  0x4a   : > { %4654 = vmatmul.mubr.msk.f32.gmra.mrb[14].mxu1 %vm268_vm1, %v5640_v52  ;;  %4851 = vmatmul.mubr.msk.f32.gmra.mrb[12].mxu0 %vm268_vm1, %v5640_v52  ;;  %6490 = vst [vmem:[#allocation25_spill] sm:$0xff] %v5858_v58 }
  0x4b   : > { %4656 = vmatprep.mubr.msk.f32.mxu1 %vm268_vm1, %v5642_v53  ;;  %4853 = vmatprep.mubr.msk.f32.mxu0 %vm268_vm1, %v5642_v53 }
  0x4e   : > { %4657 = vmatmul.mubr.msk.f32.gmra.mrb[16].mxu1 %vm268_vm1, %v5652_v54  ;;  %4854 = vmatmul.mubr.msk.f32.gmra.mrb[14].mxu0 %vm268_vm1, %v5652_v54  ;;  %v5936_v54 = vld [vmem:[#allocation2 + $0xe0] sm:$0xff] }
  0x4f   : > { %4659 = vmatprep.mubr.msk.f32.mxu1 %vm268_vm1, %v5656_v56  ;;  %4882 = vmatprep.mubr.msk.f32.mxu0 %vm268_vm1, %v5654_v55  ;;  %v5924_v56 = vld [vmem:[#allocation2 + $0x18a] sm:$0xff] }
  0x50   : > { %6498 = vst [vmem:[#allocation33_spill] sm:$0xff] %v5924_v56 }
  0x52   : > { %4660 = vmatmul.mubr.msk.f32.gmra.mrb[18].mxu1 %vm268_vm1, %v5670_v59  ;;  %4883 = vmatmul.mubr.msk.f32.vlgmr.msra.gmra.mrb[0].mxu0 %vm268_vm1, %v5672_v60  ;;  %v5912_v59 = vld [vmem:[#allocation2 + $0x182] sm:$0xff] }
  0x53   : > { %4931 = vmatpush3.msk.msra.mxu0 %vm519_vm0, %v5552_v33  ;;  %4662 = vmatprep.mubr.msk.f32.mxu1 %vm268_vm1, %v5674_v61  ;;  %v5808_v33 = vld [vmem:[#allocation2 + $0xe2] sm:$0xff]  ;;  %6497 = vst [vmem:[#allocation32_spill] sm:$0xff] %v5912_v59 }
  0x54   : > { %4885 = vmatprep.mubr.msk.f32.mxu0 %vm268_vm1, %v5676_v62  ;;  %4980 = vmatprep.subr.msk.mxu0 %vm519_vm0, %v5681_v63  ;;  %v5910_v61 = vld [vmem:[#allocation2 + $0xc0] sm:$0xff] }
  0x56   : > { %4663 = vmatmul.mubr.msk.f32.gmra.mrb[20].mxu1 %vm268_vm1, %v5691_v0  ;;  %4886 = vmatmul.mubr.msk.f32.gmra.mrb[2].mxu0 %vm268_vm1, %v5693_v1  ;;  %v5908_v0 = vld [vmem:[#allocation2 + $0x172] sm:$0xff] }
  0x57   : > { %4665 = vmatprep.mubr.msk.f32.mxu1 %vm268_vm1, %v5697_v3  ;;  %4888 = vmatprep.mubr.msk.f32.mxu0 %vm268_vm1, %v5699_v4  ;;  %v5906_v3 = vld [vmem:[#allocation2 + $0xb0] sm:$0xff]  ;;  %6496 = vst [vmem:[#allocation31_spill] sm:$0xff] %v5908_v0 }
  0x58   : > { %6495 = vst [vmem:[#allocation30_spill] sm:$0xff] %v5906_v3 }
  0x5a   : > { %4666 = vmatmul.mubr.msk.f32.gmra.mrb[22].mxu1 %vm268_vm1, %v5711_v5  ;;  %4889 = vmatmul.mubr.msk.f32.gmra.mrb[4].mxu0 %vm268_vm1, %v5713_v6  ;;  %v5896_v5 = vld [vmem:[#allocation2 + $0x16a] sm:$0xff] }
  0x5b   : > { %4668 = vmatprep.mubr.msk.f32.mxu1 %vm268_vm1, %v5715_v7  ;;  %4891 = vmatprep.mubr.msk.f32.mxu0 %vm268_vm1, %v5717_v9  ;;  %v5894_v7 = vld [vmem:[#allocation2 + $0xa8] sm:$0xff] }
  0x5e   : > { %4669 = vmatmul.mubr.msk.f32.gmra.mrb[24].mxu1 %vm268_vm1, %v5727_v10  ;;  %4892 = vmatmul.mubr.msk.f32.gmra.mrb[6].mxu0 %vm268_vm1, %v5729_v11  ;;  %v5892_v10 = vld [vmem:[#allocation2 + $0x15a] sm:$0xff] }
  0x5f   : > { %4671 = vmatprep.mubr.msk.f32.mxu1 %vm268_vm1, %v5731_v12  ;;  %4894 = vmatprep.mubr.msk.f32.mxu0 %vm268_vm1, %v5733_v13  ;;  %v5890_v12 = vld [vmem:[#allocation2 + $0x98] sm:$0xff] }
  0x60   : > { %6494 = vst [vmem:[#allocation29_spill] sm:$0xff] %v5890_v12 }
  0x62   : > { %4672 = vmatmul.mubr.msk.f32.gmra.mrb[26].mxu1 %vm268_vm1, %v5743_v14  ;;  %4895 = vmatmul.mubr.msk.f32.gmra.mrb[8].mxu0 %vm268_vm1, %v5745_v15  ;;  %v5880_v14 = vld [vmem:[#allocation2 + $0x152] sm:$0xff] }
  0x63   : > { %4674 = vmatprep.mubr.msk.f32.mxu1 %vm268_vm1, %v5747_v16  ;;  %4897 = vmatprep.mubr.msk.f32.mxu0 %vm268_vm1, %v5749_v17  ;;  %v5878_v16 = vld [vmem:[#allocation2 + $0x90] sm:$0xff] }
  0x64   : > { %6493 = vst [vmem:[#allocation28_spill] sm:$0xff] %v5878_v16 }
  0x66   : > { %4675 = vmatmul.mubr.msk.f32.gmra.mrb[28].mxu1 %vm268_vm1, %v5759_v18  ;;  %4898 = vmatmul.mubr.msk.f32.gmra.mrb[10].mxu0 %vm268_vm1, %v5761_v19  ;;  %v5876_v18 = vld [vmem:[#allocation2 + $0x142] sm:$0xff] }
  0x67   : > { %4677 = vmatprep.mubr.msk.f32.mxu1 %vm268_vm1, %v5763_v20  ;;  %4900 = vmatprep.mubr.msk.f32.mxu0 %vm268_vm1, %v5765_v21  ;;  %v5874_v20 = vld [vmem:[#allocation2 + $0x80] sm:$0xff] }
  0x68   : > { %6492 = vst [vmem:[#allocation27_spill] sm:$0xff] %v5874_v20 }
  0x6a   : > { %4678 = vmatmul.mubr.msk.f32.gmra.mrb[30].mxu1 %vm268_vm1, %v5775_v22  ;;  %4901 = vmatmul.mubr.msk.f32.gmra.mrb[12].mxu0 %vm268_vm1, %v5777_v23  ;;  %v5864_v22 = vld [vmem:[#allocation2 + $0x13a] sm:$0xff] }
  0x6b   : > { %4682 = vmatprep.mubr.msk.f32.mxu1 %vm268_vm1, %v357_v24  ;;  %4903 = vmatprep.mubr.msk.f32.mxu0 %vm268_vm1, %v5779_v25  ;;  %v5860_v24 = vld [vmem:[#allocation2 + $0x12a] sm:$0xff] }
  0x6e   : > { %4683 = vmatmul.mubr.msk.f32.vlgmr.msra.gmra.mrb[0].mxu1 %vm268_vm1, %v358_v26  ;;  %4904 = vmatmul.mubr.msk.f32.gmra.mrb[14].mxu0 %vm268_vm1, %v5788_v27  ;;  %v5862_v26 = vld [vmem:[#allocation2 + $0x78] sm:$0xff] }
  0x6f   : > { %4685 = vmatprep.mubr.msk.f32.mxu1 %vm268_vm1, %v5790_v28  ;;  %4906 = vmatprep.mubr.msk.f32.mxu0 %vm268_vm1, %v5792_v29  ;;  %6491 = vst [vmem:[#allocation26_spill] sm:$0xff] %v5862_v26  ;;  %v5926_v28 = vld [vmem:[#allocation2 + $0xd8] sm:$0xff] }
  0x70   : > { %4731 = vmatpush3.msk.msra.mxu1 %vm519_vm0, %v5497_v8  ;;  %v5826_v8 = vld [vmem:[#allocation2 + $0x38] sm:$0xff] }
  0x71   : > { %4780 = vmatprep.subr.msk.mxu1 %vm519_vm0, %v5800_v30  ;;  %6486 = vst [vmem:[#allocation21_spill] sm:$0xff] %v5826_v8 }
  0x72   : > { %4686 = vmatmul.mubr.msk.f32.gmra.mrb[2].mxu1 %vm268_vm1, %v5806_v31  ;;  %4907 = vmatmul.mubr.msk.f32.gmra.mrb[16].mxu0 %vm268_vm1, %v5808_v33  ;;  %v5922_v31 = vld [vmem:[#allocation2 + $0xc8] sm:$0xff] }
  0x73   : > { %4688 = vmatprep.mubr.msk.f32.mxu1 %vm268_vm1, %v5812_v38  ;;  %4909 = vmatprep.mubr.msk.f32.mxu0 %vm268_vm1, %v5814_v39 }
  0x76   : > { %4689 = vmatmul.mubr.msk.f32.gmra.mrb[4].mxu1 %vm268_vm1, %v5826_v8  ;;  %4910 = vmatmul.mubr.msk.f32.gmra.mrb[18].mxu0 %vm268_vm1, %v5828_v40 }
  0x77   : > { %4691 = vmatprep.mubr.msk.f32.mxu1 %vm268_vm1, %v5830_v42  ;;  %4912 = vmatprep.mubr.msk.f32.mxu0 %vm268_vm1, %v5832_v44 }
  0x7a   : > { %4692 = vmatmul.mubr.msk.f32.gmra.mrb[6].mxu1 %vm268_vm1, %v5842_v45  ;;  %4913 = vmatmul.mubr.msk.f32.gmra.mrb[20].mxu0 %vm268_vm1, %v5844_v46 }
  0x7b   : > { %4694 = vmatprep.mubr.msk.f32.mxu1 %vm268_vm1, %v5846_v47  ;;  %4915 = vmatprep.mubr.msk.f32.mxu0 %vm268_vm1, %v5848_v57 }
  0x7e   : > { %4695 = vmatmul.mubr.msk.f32.gmra.mrb[8].mxu1 %vm268_vm1, %v5858_v58  ;;  %4916 = vmatmul.mubr.msk.f32.gmra.mrb[22].mxu0 %vm268_vm1, %v5860_v24 }
  0x7f   : > { %4697 = vmatprep.mubr.msk.f32.mxu1 %vm268_vm1, %v5862_v26  ;;  %4918 = vmatprep.mubr.msk.f32.mxu0 %vm268_vm1, %v5864_v22 }
  0x82   : > { %4698 = vmatmul.mubr.msk.f32.gmra.mrb[10].mxu1 %vm268_vm1, %v5874_v20  ;;  %4919 = vmatmul.mubr.msk.f32.gmra.mrb[24].mxu0 %vm268_vm1, %v5876_v18 }
  0x83   : > { %4700 = vmatprep.mubr.msk.f32.mxu1 %vm268_vm1, %v5878_v16  ;;  %4921 = vmatprep.mubr.msk.f32.mxu0 %vm268_vm1, %v5880_v14 }
  0x86   : > { %4701 = vmatmul.mubr.msk.f32.gmra.mrb[12].mxu1 %vm268_vm1, %v5890_v12  ;;  %4922 = vmatmul.mubr.msk.f32.gmra.mrb[26].mxu0 %vm268_vm1, %v5892_v10 }
  0x87   : > { %4703 = vmatprep.mubr.msk.f32.mxu1 %vm268_vm1, %v5894_v7  ;;  %4924 = vmatprep.mubr.msk.f32.mxu0 %vm268_vm1, %v5896_v5 }
  0x8a   : > { %4704 = vmatmul.mubr.msk.f32.gmra.mrb[14].mxu1 %vm268_vm1, %v5906_v3  ;;  %4925 = vmatmul.mubr.msk.f32.gmra.mrb[28].mxu0 %vm268_vm1, %v5908_v0  ;;  %v5943_v0 = vld [vmem:[%s6417_s1 + $0x20] sm:$0xf] }
  0x8b   : > { %4706 = vmatprep.mubr.msk.f32.mxu1 %vm268_vm1, %v5910_v61  ;;  %4927 = vmatprep.mubr.msk.f32.mxu0 %vm268_vm1, %v5912_v59  ;;  %v5938_v59 = vld [vmem:[#allocation2 + $0xf0] sm:$0xff] }
  0x8e   : > { %4707 = vmatmul.mubr.msk.f32.gmra.mrb[16].mxu1 %vm268_vm1, %v5922_v31  ;;  %4928 = vmatmul.mubr.msk.f32.gmra.mrb[30].mxu0 %vm268_vm1, %v5924_v56  ;;  %v5953_v56 = vld [vmem:[#allocation2 + $0xf8] sm:$0xff] }
  0x8f   : > { %4709 = vmatprep.mubr.msk.f32.mxu1 %vm268_vm1, %v5926_v28  ;;  %4932 = vmatprep.mubr.msk.f32.mxu0 %vm268_vm1, %v5812_v38  ;;  %v5957_v38 = vld [vmem:[#allocation2 + $0x108] sm:$0xff] }
  0x92   : > { %4710 = vmatmul.mubr.msk.f32.gmra.mrb[18].mxu1 %vm268_vm1, %v5936_v54  ;;  %4933 = vmatmul.mubr.msk.f32.vlgmr.msra.gmra.mrb[0].mxu0 %vm268_vm1, %v5826_v8  ;;  %v5983_v8 = vld [vmem:[#allocation2 + $0x138] sm:$0xff] }
  0x93   : > { %4981 = vmatpush3.msk.msra.mxu0 %vm519_vm0, %v5681_v63  ;;  %4712 = vmatprep.mubr.msk.f32.mxu1 %vm268_vm1, %v5938_v59  ;;  %v5969_v63 = vld [vmem:[#allocation2 + $0x110] sm:$0xff] }
  0x94   : > { %4935 = vmatprep.mubr.msk.f32.mxu0 %vm268_vm1, %v5830_v42  ;;  %5030 = vmatprep.subr.msk.mxu0 %vm519_vm0, %v5943_v0  ;;  %v5971_v42 = vld [vmem:[#allocation2 + $0x120] sm:$0xff] }
  0x96   : > { %4713 = vmatmul.mubr.msk.f32.gmra.mrb[20].mxu1 %vm268_vm1, %v5953_v56  ;;  %4936 = vmatmul.mubr.msk.f32.gmra.mrb[2].mxu0 %vm268_vm1, %v5842_v45  ;;  %v5981_v45 = vld [vmem:[#allocation2 + $0x128] sm:$0xff] }
  0x97   : > { %4715 = vmatprep.mubr.msk.f32.mxu1 %vm268_vm1, %v5957_v38  ;;  %4938 = vmatprep.mubr.msk.f32.mxu0 %vm268_vm1, %v5846_v47  ;;  %v5995_v47 = vld [vmem:[#allocation2 + $0x150] sm:$0xff] }
  0x9a   : > { %4716 = vmatmul.mubr.msk.f32.gmra.mrb[22].mxu1 %vm268_vm1, %v5969_v63  ;;  %4939 = vmatmul.mubr.msk.f32.gmra.mrb[4].mxu0 %vm268_vm1, %v5858_v58  ;;  %v5993_v58 = vld [vmem:[#allocation2 + $0x140] sm:$0xff] }
  0x9b   : > { %4718 = vmatprep.mubr.msk.f32.mxu1 %vm268_vm1, %v5971_v42  ;;  %4941 = vmatprep.mubr.msk.f32.mxu0 %vm268_vm1, %v5862_v26  ;;  %v6007_v26 = vld [vmem:[#allocation2 + $0x168] sm:$0xff] }
  0x9e   : > { %4719 = vmatmul.mubr.msk.f32.gmra.mrb[24].mxu1 %vm268_vm1, %v5981_v45  ;;  %4942 = vmatmul.mubr.msk.f32.gmra.mrb[6].mxu0 %vm268_vm1, %v5874_v20  ;;  %v6005_v20 = vld [vmem:[#allocation2 + $0x158] sm:$0xff] }
  0x9f   : > { %4721 = vmatprep.mubr.msk.f32.mxu1 %vm268_vm1, %v5983_v8  ;;  %4944 = vmatprep.mubr.msk.f32.mxu0 %vm268_vm1, %v5878_v16  ;;  %v1072_v16 = vld [vmem:[#allocation2 + $0x2] sm:$0xff] }
  0xa2   : > { %4722 = vmatmul.mubr.msk.f32.gmra.mrb[26].mxu1 %vm268_vm1, %v5993_v58  ;;  %4945 = vmatmul.mubr.msk.f32.gmra.mrb[8].mxu0 %vm268_vm1, %v5890_v12  ;;  %v6017_v12 = vld [vmem:[#allocation2 + $0x170] sm:$0xff] }
  0xa3   : > { %4724 = vmatprep.mubr.msk.f32.mxu1 %vm268_vm1, %v5995_v47  ;;  %4947 = vmatprep.mubr.msk.f32.mxu0 %vm268_vm1, %v5894_v7 }
  0xa6   : > { %4725 = vmatmul.mubr.msk.f32.gmra.mrb[28].mxu1 %vm268_vm1, %v6005_v20  ;;  %4948 = vmatmul.mubr.msk.f32.gmra.mrb[10].mxu0 %vm268_vm1, %v5906_v3  ;;  %v1073_v3 = vld [vmem:[#allocation2 + $0xa] sm:$0xff] }
  0xa7   : > { %4727 = vmatprep.mubr.msk.f32.mxu1 %vm268_vm1, %v6007_v26  ;;  %4950 = vmatprep.mubr.msk.f32.mxu0 %vm268_vm1, %v5910_v61 }
  0xaa   : > { %4728 = vmatmul.mubr.msk.f32.gmra.mrb[30].mxu1 %vm268_vm1, %v6017_v12  ;;  %4951 = vmatmul.mubr.msk.f32.gmra.mrb[12].mxu0 %vm268_vm1, %v5922_v31 }
  0xab   : > { %4732 = vmatprep.mubr.msk.f32.mxu1 %vm268_vm1, %v1072_v16  ;;  %4953 = vmatprep.mubr.msk.f32.mxu0 %vm268_vm1, %v5926_v28  ;;  %v2660_v16 = vld [vmem:[#allocation2 + $0x1a0] sm:$0xff] }
  0xae   : > { %4733 = vmatmul.mubr.msk.f32.vlgmr.msra.gmra.mrb[0].mxu1 %vm268_vm1, %v1073_v3  ;;  %4954 = vmatmul.mubr.msk.f32.gmra.mrb[14].mxu0 %vm268_vm1, %v5936_v54  ;;  %v2659_v3 = vld [vmem:[#allocation2 + $0x198] sm:$0xff] }
  0xaf   : > { %4735 = vmatprep.mubr.msk.f32.mxu1 %vm268_vm1, %v5654_v55  ;;  %4956 = vmatprep.mubr.msk.f32.mxu0 %vm268_vm1, %v5938_v59  ;;  %v6077_v55 = vld [vmem:[#allocation2 + $0x180] sm:$0xff] }
  0xb0   : > { %4781 = vmatpush3.msk.msra.mxu1 %vm519_vm0, %v5800_v30  ;;  %v6513_v30 = vld [vmem:[#allocation24_spill] sm:$0xff] }
  0xb1   : > { %5080 = vmatprep.subr.msk.mxu1 %vm519_vm0, %v5458_v2 }
  0xb2   : > { %4736 = vmatmul.mubr.msk.f32.gmra.mrb[2].mxu1 %vm268_vm1, %v5672_v60  ;;  %4957 = vmatmul.mubr.msk.f32.gmra.mrb[16].mxu0 %vm268_vm1, %v5953_v56  ;;  %v6087_v60 = vld [vmem:[#allocation2 + $0x188] sm:$0xff] }
  0xb3   : > { %4738 = vmatprep.mubr.msk.f32.mxu1 %vm268_vm1, %v5676_v62  ;;  %4959 = vmatprep.mubr.msk.f32.mxu0 %vm268_vm1, %v5957_v38 }
  0xb6   : > { %4739 = vmatmul.mubr.msk.f32.gmra.mrb[4].mxu1 %vm268_vm1, %v5693_v1  ;;  %4960 = vmatmul.mubr.msk.f32.gmra.mrb[18].mxu0 %vm268_vm1, %v5969_v63 }
  0xb7   : > { %4741 = vmatprep.mubr.msk.f32.mxu1 %vm268_vm1, %v5699_v4  ;;  %4962 = vmatprep.mubr.msk.f32.mxu0 %vm268_vm1, %v5971_v42 }
  0xba   : > { %4742 = vmatmul.mubr.msk.f32.gmra.mrb[6].mxu1 %vm268_vm1, %v5713_v6  ;;  %4963 = vmatmul.mubr.msk.f32.gmra.mrb[20].mxu0 %vm268_vm1, %v5981_v45 }
  0xbb   : > { %4744 = vmatprep.mubr.msk.f32.mxu1 %vm268_vm1, %v5717_v9  ;;  %4965 = vmatprep.mubr.msk.f32.mxu0 %vm268_vm1, %v5983_v8 }
  0xbe   : > { %4745 = vmatmul.mubr.msk.f32.gmra.mrb[8].mxu1 %vm268_vm1, %v5729_v11  ;;  %4966 = vmatmul.mubr.msk.f32.gmra.mrb[22].mxu0 %vm268_vm1, %v5993_v58 }
  0xbf   : > { %4747 = vmatprep.mubr.msk.f32.mxu1 %vm268_vm1, %v5733_v13  ;;  %4968 = vmatprep.mubr.msk.f32.mxu0 %vm268_vm1, %v5995_v47 }
  0xc2   : > { %4748 = vmatmul.mubr.msk.f32.gmra.mrb[10].mxu1 %vm268_vm1, %v5745_v15  ;;  %4969 = vmatmul.mubr.msk.f32.gmra.mrb[24].mxu0 %vm268_vm1, %v6005_v20 }
  0xc3   : > { %4750 = vmatprep.mubr.msk.f32.mxu1 %vm268_vm1, %v5749_v17  ;;  %4971 = vmatprep.mubr.msk.f32.mxu0 %vm268_vm1, %v6007_v26 }
  0xc6   : > { %4751 = vmatmul.mubr.msk.f32.gmra.mrb[12].mxu1 %vm268_vm1, %v5761_v19  ;;  %4972 = vmatmul.mubr.msk.f32.gmra.mrb[26].mxu0 %vm268_vm1, %v6017_v12 }
  0xc7   : > { %4753 = vmatprep.mubr.msk.f32.mxu1 %vm268_vm1, %v5765_v21  ;;  %4974 = vmatprep.mubr.msk.f32.mxu0 %vm268_vm1, %v6077_v55 }
  0xca   : > { %4754 = vmatmul.mubr.msk.f32.gmra.mrb[14].mxu1 %vm268_vm1, %v5777_v23  ;;  %4975 = vmatmul.mubr.msk.f32.gmra.mrb[28].mxu0 %vm268_vm1, %v6087_v60 }
  0xcb   : > { %4756 = vmatprep.mubr.msk.f32.mxu1 %vm268_vm1, %v5779_v25  ;;  %4977 = vmatprep.mubr.msk.f32.mxu0 %vm268_vm1, %v2659_v3  ;;  %v6515_v3 = vld [vmem:[#allocation25_spill] sm:$0xff] }
  0xce   : > { %4757 = vmatmul.mubr.msk.f32.gmra.mrb[16].mxu1 %vm268_vm1, %v5788_v27  ;;  %4978 = vmatmul.mubr.msk.f32.gmra.mrb[30].mxu0 %vm268_vm1, %v2660_v16  ;;  %v6516_v16 = vld [vmem:[#allocation11_spill] sm:$0xff] }
  0xcf   : > { %4759 = vmatprep.mubr.msk.f32.mxu1 %vm268_vm1, %v5792_v29  ;;  %4982 = vmatprep.mubr.msk.f32.mxu0 %vm268_vm1, %v5542_v32  ;;  %v6499_v32 = vld [vmem:[#allocation31_spill] sm:$0xff] }
  0xd2   : > { %4760 = vmatmul.mubr.msk.f32.gmra.mrb[18].mxu1 %vm268_vm1, %v5808_v33  ;;  %4983 = vmatmul.mubr.msk.f32.vlgmr.msra.gmra.mrb[0].mxu0 %vm268_vm1, %v5560_v34  ;;  %v6500_v34 = vld [vmem:[#allocation3_spill] sm:$0xff] }
  0xd3   : > { %5031 = vmatpush3.msk.msra.mxu0 %vm519_vm0, %v5943_v0  ;;  %4762 = vmatprep.mubr.msk.f32.mxu1 %vm268_vm1, %v5814_v39  ;;  %v6512_v0 = vld [vmem:[#allocation9_spill] sm:$0xff] }
  0xd4   : > { %4985 = vmatprep.mubr.msk.f32.mxu0 %vm268_vm1, %v5564_v35  ;;  %v6501_v35 = vld [vmem:[#allocation18_spill] sm:$0xff] }
  0xd6   : > { %4763 = vmatmul.mubr.msk.f32.gmra.mrb[20].mxu1 %vm268_vm1, %v5828_v40  ;;  %4986 = vmatmul.mubr.msk.f32.gmra.mrb[2].mxu0 %vm268_vm1, %v5576_v36  ;;  %v6502_v36 = vld [vmem:[#allocation4_spill] sm:$0xff] }
  0xd7   : > { %4765 = vmatprep.mubr.msk.f32.mxu1 %vm268_vm1, %v5832_v44  ;;  %4988 = vmatprep.mubr.msk.f32.mxu0 %vm268_vm1, %v5578_v37  ;;  %v6503_v37 = vld [vmem:[#allocation19_spill] sm:$0xff] }
  0xda   : > { %4766 = vmatmul.mubr.msk.f32.gmra.mrb[22].mxu1 %vm268_vm1, %v5844_v46  ;;  %4989 = vmatmul.mubr.msk.f32.gmra.mrb[4].mxu0 %vm268_vm1, %v5592_v41  ;;  %v6504_v41 = vld [vmem:[#allocation5_spill] sm:$0xff] }
  0xdb   : > { %4768 = vmatprep.mubr.msk.f32.mxu1 %vm268_vm1, %v5848_v57  ;;  %4991 = vmatprep.mubr.msk.f32.mxu0 %vm268_vm1, %v5597_v43  ;;  %v6505_v43 = vld [vmem:[#allocation20_spill] sm:$0xff] }
  0xde   : > { %4769 = vmatmul.mubr.msk.f32.gmra.mrb[24].mxu1 %vm268_vm1, %v5860_v24  ;;  %4992 = vmatmul.mubr.msk.f32.gmra.mrb[6].mxu0 %vm268_vm1, %v5615_v48  ;;  %v6506_v48 = vld [vmem:[#allocation6_spill] sm:$0xff] }
  0xdf   : > { %4771 = vmatprep.mubr.msk.f32.mxu1 %vm268_vm1, %v5864_v22  ;;  %4994 = vmatprep.mubr.msk.f32.mxu0 %vm268_vm1, %v5618_v49  ;;  %v6507_v49 = vld [vmem:[#allocation21_spill] sm:$0xff] }
  0xe2   : > { %4772 = vmatmul.mubr.msk.f32.gmra.mrb[26].mxu1 %vm268_vm1, %v5876_v18  ;;  %4995 = vmatmul.mubr.msk.f32.gmra.mrb[8].mxu0 %vm268_vm1, %v5628_v50  ;;  %v6508_v50 = vld [vmem:[#allocation7_spill] sm:$0xff] }
  0xe3   : > { %4774 = vmatprep.mubr.msk.f32.mxu1 %vm268_vm1, %v5880_v14  ;;  %4997 = vmatprep.mubr.msk.f32.mxu0 %vm268_vm1, %v5630_v51  ;;  %v6509_v51 = vld [vmem:[#allocation22_spill] sm:$0xff] }
  0xe6   : > { %4775 = vmatmul.mubr.msk.f32.gmra.mrb[28].mxu1 %vm268_vm1, %v5892_v10  ;;  %4998 = vmatmul.mubr.msk.f32.gmra.mrb[10].mxu0 %vm268_vm1, %v5640_v52  ;;  %v6510_v52 = vld [vmem:[#allocation8_spill] sm:$0xff] }
  0xe7   : > { %4777 = vmatprep.mubr.msk.f32.mxu1 %vm268_vm1, %v5896_v5  ;;  %5000 = vmatprep.mubr.msk.f32.mxu0 %vm268_vm1, %v5642_v53  ;;  %v6511_v53 = vld [vmem:[#allocation23_spill] sm:$0xff] }
  0xea   : > { %4778 = vmatmul.mubr.msk.f32.gmra.mrb[30].mxu1 %vm268_vm1, %v6499_v32  ;;  %5001 = vmatmul.mubr.msk.f32.gmra.mrb[12].mxu0 %vm268_vm1, %v6500_v34  ;;  %v6517_v34 = vld [vmem:[#allocation26_spill] sm:$0xff] }
  0xeb   : > { %4782 = vmatprep.mubr.msk.f32.mxu1 %vm268_vm1, %v6501_v35  ;;  %5003 = vmatprep.mubr.msk.f32.mxu0 %vm268_vm1, %v6502_v36  ;;  %v6518_v35 = vld [vmem:[#allocation12_spill] sm:$0xff] }
  0xee   : > { %4783 = vmatmul.mubr.msk.f32.vlgmr.msra.gmra.mrb[0].mxu1 %vm268_vm1, %v6503_v37  ;;  %5004 = vmatmul.mubr.msk.f32.gmra.mrb[14].mxu0 %vm268_vm1, %v6504_v41  ;;  %v6519_v37 = vld [vmem:[#allocation27_spill] sm:$0xff] }
  0xef   : > { %4785 = vmatprep.mubr.msk.f32.mxu1 %vm268_vm1, %v6505_v43  ;;  %5006 = vmatprep.mubr.msk.f32.mxu0 %vm268_vm1, %v6506_v48  ;;  %v6520_v43 = vld [vmem:[#allocation13_spill] sm:$0xff] }
  0xf0   : > { %5081 = vmatpush3.msk.msra.mxu1 %vm519_vm0, %v5458_v2  ;;  %v6514_v2 = vld [vmem:[#allocation10_spill] sm:$0xff] }
  0xf2   : > { %4786 = vmatmul.mubr.msk.f32.gmra.mrb[2].mxu1 %vm268_vm1, %v6507_v49  ;;  %5007 = vmatmul.mubr.msk.f32.gmra.mrb[16].mxu0 %vm268_vm1, %v6508_v50  ;;  %v6521_v49 = vld [vmem:[#allocation28_spill] sm:$0xff] }
  0xf3   : > { %4788 = vmatprep.mubr.msk.f32.mxu1 %vm268_vm1, %v6509_v51  ;;  %5009 = vmatprep.mubr.msk.f32.mxu0 %vm268_vm1, %v6510_v52  ;;  %v6522_v51 = vld [vmem:[#allocation14_spill] sm:$0xff] }
  0xf6   : > { %4789 = vmatmul.mubr.msk.f32.gmra.mrb[4].mxu1 %vm268_vm1, %v6511_v53  ;;  %5010 = vmatmul.mubr.msk.f32.gmra.mrb[18].mxu0 %vm268_vm1, %v6512_v0  ;;  %v6523_v53 = vld [vmem:[#allocation29_spill] sm:$0xff] }
  0xf7   : > { %4791 = vmatprep.mubr.msk.f32.mxu1 %vm268_vm1, %v6513_v30  ;;  %5012 = vmatprep.mubr.msk.f32.mxu0 %vm268_vm1, %v6514_v2  ;;  %v6524_v30 = vld [vmem:[#allocation15_spill] sm:$0xff] }
  0xfa   : > { %4792 = vmatmul.mubr.msk.f32.gmra.mrb[6].mxu1 %vm268_vm1, %v6515_v3  ;;  %5013 = vmatmul.mubr.msk.f32.gmra.mrb[20].mxu0 %vm268_vm1, %v6516_v16  ;;  %v6525_v3 = vld [vmem:[#allocation16_spill] sm:$0xff] }
  0xfb   : > { %4794 = vmatprep.mubr.msk.f32.mxu1 %vm268_vm1, %v6517_v34  ;;  %5015 = vmatprep.mubr.msk.f32.mxu0 %vm268_vm1, %v6518_v35  ;;  %v6211_v34 = vld [vmem:[#allocation2 + $0x181] sm:$0xff] }
  0xfe   : > { %4795 = vmatmul.mubr.msk.f32.gmra.mrb[8].mxu1 %vm268_vm1, %v6519_v37  ;;  %5016 = vmatmul.mubr.msk.f32.gmra.mrb[22].mxu0 %vm268_vm1, %v6520_v43  ;;  %v6526_v37 = vld [vmem:[#allocation30_spill] sm:$0xff] }
  0xff   : > { %4797 = vmatprep.mubr.msk.f32.mxu1 %vm268_vm1, %v6521_v49  ;;  %5018 = vmatprep.mubr.msk.f32.mxu0 %vm268_vm1, %v6522_v51  ;;  %v6527_v49 = vld [vmem:[#allocation17_spill] sm:$0xff] }
 0x102   : > { %4798 = vmatmul.mubr.msk.f32.gmra.mrb[10].mxu1 %vm268_vm1, %v6523_v53  ;;  %5019 = vmatmul.mubr.msk.f32.gmra.mrb[24].mxu0 %vm268_vm1, %v6524_v30  ;;  %v6221_v53 = vld [vmem:[#allocation2 + $0x189] sm:$0xff] }
 0x103   : > { %4800 = vmatprep.mubr.msk.f32.mxu1 %vm268_vm1, %v5894_v7  ;;  %5021 = vmatprep.mubr.msk.f32.mxu0 %vm268_vm1, %v6525_v3  ;;  %v3048_v7 = vld [vmem:[#allocation2 + $0x199] sm:$0xff] }
 0x106   : > { %4801 = vmatmul.mubr.msk.f32.gmra.mrb[12].mxu1 %vm268_vm1, %v6526_v37  ;;  %5022 = vmatmul.mubr.msk.f32.gmra.mrb[26].mxu0 %vm268_vm1, %v6527_v49  ;;  %v3049_v37 = vld [vmem:[#allocation2 + $0x1a1] sm:$0xff] }
 0x107   : > { %4803 = vmatprep.mubr.msk.f32.mxu1 %vm268_vm1, %v5910_v61  ;;  %5024 = vmatprep.mubr.msk.f32.mxu0 %vm268_vm1, %v6211_v34  ;;  %v3438_v61 = vld [vmem:[#allocation2 + $0x1a2] sm:$0xff] }
 0x10a   : > { %4804 = vmatmul.mubr.msk.f32.gmra.mrb[14].mxu1 %vm268_vm1, %v5922_v31  ;;  %5025 = vmatmul.mubr.msk.f32.gmra.mrb[28].mxu0 %vm268_vm1, %v6221_v53 }
 0x10b   : > { %4806 = vmatprep.mubr.msk.f32.mxu1 %vm268_vm1, %v5926_v28  ;;  %5027 = vmatprep.mubr.msk.f32.mxu0 %vm268_vm1, %v3048_v7 }
 0x10e   : > { %4807 = vmatmul.mubr.msk.f32.gmra.mrb[16].mxu1 %vm268_vm1, %v5936_v54  ;;  %5028 = vmatmul.mubr.msk.f32.gmra.mrb[30].mxu0 %vm268_vm1, %v3049_v37  ;;  %v6528_v54 = vld [vmem:[#allocation32_spill] sm:$0xff] }
 0x10f   : > { %4809 = vmatprep.mubr.msk.f32.mxu1 %vm268_vm1, %v5938_v59  ;;  %5032 = vmatprep.mubr.msk.f32.mxu0 %vm268_vm1, %v5676_v62  ;;  %v6529_v59 = vld [vmem:[#allocation33_spill] sm:$0xff] }
 0x112   : > { %4810 = vmatmul.mubr.msk.f32.gmra.mrb[18].mxu1 %vm268_vm1, %v5953_v56  ;;  %5033 = vmatmul.mubr.msk.f32.vlgmr.msra.gmra.mrb[0].mxu0 %vm268_vm1, %v5693_v1  ;;  %v3437_v56 = vld [vmem:[#allocation2 + $0x19a] sm:$0xff] }
 0x113   : > { %4812 = vmatprep.mubr.msk.f32.mxu1 %vm268_vm1, %v5957_v38  ;;  %5035 = vmatprep.mubr.msk.f32.mxu0 %vm268_vm1, %v5699_v4 }
 0x116   : > { %4813 = vmatmul.mubr.msk.f32.gmra.mrb[20].mxu1 %vm268_vm1, %v5969_v63  ;;  %5036 = vmatmul.mubr.msk.f32.gmra.mrb[2].mxu0 %vm268_vm1, %v5713_v6 }
 0x117   : > { %4815 = vmatprep.mubr.msk.f32.mxu1 %vm268_vm1, %v5971_v42  ;;  %5038 = vmatprep.mubr.msk.f32.mxu0 %vm268_vm1, %v5717_v9 }
 0x11a   : > { %4816 = vmatmul.mubr.msk.f32.gmra.mrb[22].mxu1 %vm268_vm1, %v5981_v45  ;;  %5039 = vmatmul.mubr.msk.f32.gmra.mrb[4].mxu0 %vm268_vm1, %v5729_v11 }
 0x11b   : > { %4818 = vmatprep.mubr.msk.f32.mxu1 %vm268_vm1, %v5983_v8  ;;  %5041 = vmatprep.mubr.msk.f32.mxu0 %vm268_vm1, %v5733_v13 }
 0x11e   : > { %4819 = vmatmul.mubr.msk.f32.gmra.mrb[24].mxu1 %vm268_vm1, %v5993_v58  ;;  %5042 = vmatmul.mubr.msk.f32.gmra.mrb[6].mxu0 %vm268_vm1, %v5745_v15 }
 0x11f   : > { %4821 = vmatprep.mubr.msk.f32.mxu1 %vm268_vm1, %v5995_v47  ;;  %5044 = vmatprep.mubr.msk.f32.mxu0 %vm268_vm1, %v5749_v17 }
 0x122   : > { %4822 = vmatmul.mubr.msk.f32.gmra.mrb[26].mxu1 %vm268_vm1, %v6005_v20  ;;  %5045 = vmatmul.mubr.msk.f32.gmra.mrb[8].mxu0 %vm268_vm1, %v5761_v19 }
 0x123   : > { %4824 = vmatprep.mubr.msk.f32.mxu1 %vm268_vm1, %v6007_v26  ;;  %5047 = vmatprep.mubr.msk.f32.mxu0 %vm268_vm1, %v5765_v21 }
 0x126   : > { %4825 = vmatmul.mubr.msk.f32.gmra.mrb[28].mxu1 %vm268_vm1, %v6017_v12  ;;  %5048 = vmatmul.mubr.msk.f32.gmra.mrb[10].mxu0 %vm268_vm1, %v5777_v23 }
 0x127   : > { %4827 = vmatprep.mubr.msk.f32.mxu1 %vm268_vm1, %v6077_v55  ;;  %5050 = vmatprep.mubr.msk.f32.mxu0 %vm268_vm1, %v5779_v25 }
 0x12a   : > { %4828 = vmatmul.mubr.msk.f32.gmra.mrb[30].mxu1 %vm268_vm1, %v6087_v60  ;;  %5051 = vmatmul.mubr.msk.f32.gmra.mrb[12].mxu0 %vm268_vm1, %v5788_v27 }
 0x12b   : > { %4856 = vmatprep.mubr.msk.f32.mxu1 %vm268_vm1, %v6502_v36  ;;  %5053 = vmatprep.mubr.msk.f32.mxu0 %vm268_vm1, %v5792_v29 }
 0x12e   : > { %4857 = vmatmul.mubr.msk.f32.vlgmr.msra.gmra.mrb[16].mxu1 %vm268_vm1, %v6504_v41  ;;  %5054 = vmatmul.mubr.msk.f32.gmra.mrb[14].mxu0 %vm268_vm1, %v5808_v33 }
 0x12f   : > { %4859 = vmatprep.mubr.msk.f32.mxu1 %vm268_vm1, %v6506_v48  ;;  %5056 = vmatprep.mubr.msk.f32.mxu0 %vm268_vm1, %v5814_v39 }
 0x132   : > { %4860 = vmatmul.mubr.msk.f32.gmra.mrb[18].mxu1 %vm268_vm1, %v6508_v50  ;;  %5057 = vmatmul.mubr.msk.f32.gmra.mrb[16].mxu0 %vm268_vm1, %v5828_v40 }
 0x133   : > { %4862 = vmatprep.mubr.msk.f32.mxu1 %vm268_vm1, %v6510_v52  ;;  %5059 = vmatprep.mubr.msk.f32.mxu0 %vm268_vm1, %v5832_v44 }
 0x136   : > { %4863 = vmatmul.mubr.msk.f32.gmra.mrb[20].mxu1 %vm268_vm1, %v6512_v0  ;;  %5060 = vmatmul.mubr.msk.f32.gmra.mrb[18].mxu0 %vm268_vm1, %v5844_v46 }
 0x137   : > { %4865 = vmatprep.mubr.msk.f32.mxu1 %vm268_vm1, %v6514_v2  ;;  %5062 = vmatprep.mubr.msk.f32.mxu0 %vm268_vm1, %v5848_v57 }
 0x13a   : > { %4866 = vmatmul.mubr.msk.f32.gmra.mrb[22].mxu1 %vm268_vm1, %v6516_v16  ;;  %5063 = vmatmul.mubr.msk.f32.gmra.mrb[20].mxu0 %vm268_vm1, %v5860_v24 }
 0x13b   : > { %4868 = vmatprep.mubr.msk.f32.mxu1 %vm268_vm1, %v6518_v35  ;;  %5065 = vmatprep.mubr.msk.f32.mxu0 %vm268_vm1, %v5864_v22 }
 0x13e   : > { %4869 = vmatmul.mubr.msk.f32.gmra.mrb[24].mxu1 %vm268_vm1, %v6520_v43  ;;  %5066 = vmatmul.mubr.msk.f32.gmra.mrb[22].mxu0 %vm268_vm1, %v5876_v18 }
 0x13f   : > { %4871 = vmatprep.mubr.msk.f32.mxu1 %vm268_vm1, %v6522_v51  ;;  %5068 = vmatprep.mubr.msk.f32.mxu0 %vm268_vm1, %v5880_v14 }
 0x142   : > { %4872 = vmatmul.mubr.msk.f32.gmra.mrb[26].mxu1 %vm268_vm1, %v6524_v30  ;;  %5069 = vmatmul.mubr.msk.f32.gmra.mrb[24].mxu0 %vm268_vm1, %v5892_v10 }
 0x143   : > { %4874 = vmatprep.mubr.msk.f32.mxu1 %vm268_vm1, %v6525_v3  ;;  %5071 = vmatprep.mubr.msk.f32.mxu0 %vm268_vm1, %v5896_v5 }
 0x146   : > { %4875 = vmatmul.mubr.msk.f32.gmra.mrb[28].mxu1 %vm268_vm1, %v6527_v49  ;;  %5072 = vmatmul.mubr.msk.f32.gmra.mrb[26].mxu0 %vm268_vm1, %v6499_v32 }
 0x147   : > { %4877 = vmatprep.mubr.msk.f32.mxu1 %vm268_vm1, %v6211_v34  ;;  %5074 = vmatprep.mubr.msk.f32.mxu0 %vm268_vm1, %v6528_v54 }
 0x14a   : > { %4878 = vmatmul.mubr.msk.f32.gmra.mrb[30].mxu1 %vm268_vm1, %v6221_v53  ;;  %5075 = vmatmul.mubr.msk.f32.gmra.mrb[28].mxu0 %vm268_vm1, %v6529_v59 }
 0x14b   : > { %5077 = vmatprep.mubr.msk.f32.mxu0 %vm268_vm1, %v3437_v56 }
 0x14e   : > { %5078 = vmatmul.mubr.msk.f32.gmra.mrb[30].mxu0 %vm268_vm1, %v3438_v61 }
 0x1c1   : > { %v4784_v62 = vpop.f32.mrb[0].mxu1 }
 0x1c2   : > { %v1659_v1 = vpop.f32.mrb[1].mxu1 }
 0x1c5   : > { %v4787_v4 = vpop.f32.mrb[2].mxu1 }
 0x1c6   : > { %v1669_v5 = vpop.f32.mrb[3].mxu1 }
 0x1c9   : > { %v4790_v6 = vpop.f32.mrb[4].mxu1 }
 0x1ca   : > { %v1679_v9 = vpop.f32.mrb[5].mxu1 }
 0x1cd   : > { %v4793_v10 = vpop.f32.mrb[6].mxu1 }
 0x1ce   : > { %v1689_v11 = vpop.f32.mrb[7].mxu1 }
 0x1d1   : > { %v4796_v12 = vpop.f32.mrb[8].mxu1 }
 0x1d2   : > { %v1699_v13 = vpop.f32.mrb[9].mxu1 }
 0x1d5   : > { %v4799_v14 = vpop.f32.mrb[10].mxu1 }
 0x1d6   : > { %v6355_v15 = vpop.f32.mrb[11].mxu1 }
 0x1d9   : > { %v6357_v17 = vpop.f32.mrb[12].mxu1 }
 0x1da   : > { %v6359_v18 = vpop.f32.mrb[13].mxu1 }
 0x1dd   : > { %v6361_v19 = vpop.f32.mrb[14].mxu1 }
 0x1de   : > { %v6363_v20 = vpop.f32.mrb[15].mxu1 }
 0x1e5   : > { %v5034_v21 = vpop.f32.mrb[0].mxu0 }
 0x1e6   : > { %v5082_v22 = vadd.f32 %v5034_v21, %v4784_v62  ;;  %v3605_v23 = vpop.f32.mrb[1].mxu0 }
 0x1e7   : > { %v5083_v25 = vadd.f32 %v3605_v23, %v1659_v1 }
 0x1e8   : > { %3797 = vst [vmem:[%s6370_s17 + $0x8] sm:$0xff] %v5082_v22  ;;  %v3867_v27 = vmul.f32 %v5082_v22, %v5082_v22 }
 0x1e9   : > { %3796 = vst [vmem:[%s6370_s17] sm:$0xff] %v5083_v25  ;;  %v3828_v28 = vadd.f32 %v5083_v25, %v5082_v22  ;;  %v3866_v29 = vmul.f32 %v5083_v25, %v5083_v25  ;;  %v5037_v31 = vpop.f32.mrb[2].mxu0 }
 0x1ea   : > { %v5084_v33 = vadd.f32 %v5037_v31, %v4787_v4  ;;  %v3615_v38 = vpop.f32.mrb[3].mxu0 }
 0x1eb   : > { %v3898_v39 = vadd.f32 %v3867_v27, %v3866_v29  ;;  %v5085_v8 = vadd.f32 %v3615_v38, %v1669_v5 }
 0x1ec   : > { %3799 = vst [vmem:[%s6370_s17 + $0x18] sm:$0xff] %v5084_v33  ;;  %v3869_v47 = vmul.f32 %v5084_v33, %v5084_v33 }
 0x1ed   : > { %3798 = vst [vmem:[%s6370_s17 + $0x10] sm:$0xff] %v5085_v8  ;;  %v3829_v40 = vadd.f32 %v5085_v8, %v3828_v28  ;;  %v3868_v42 = vmul.f32 %v5085_v8, %v5085_v8  ;;  %v5040_v44 = vpop.f32.mrb[4].mxu0 }
 0x1ee   : > { %v5086_v45 = vadd.f32 %v5040_v44, %v4790_v6  ;;  %v3625_v46 = vpop.f32.mrb[5].mxu0 }
 0x1ef   : > { %v3899_v57 = vadd.f32 %v3898_v39, %v3868_v42  ;;  %v5087_v58 = vadd.f32 %v3625_v46, %v1679_v9  ;;  %v3830_v24 = vadd.f32 %v5084_v33, %v3829_v40 }
 0x1f0   : > { %3801 = vst [vmem:[%s6370_s17 + $0x28] sm:$0xff] %v5086_v45  ;;  %v3871_v41 = vmul.f32 %v5086_v45, %v5086_v45 }
 0x1f1   : > { %3800 = vst [vmem:[%s6370_s17 + $0x20] sm:$0xff] %v5087_v58  ;;  %v3831_v26 = vadd.f32 %v5087_v58, %v3830_v24  ;;  %v3870_v63 = vmul.f32 %v5087_v58, %v5087_v58  ;;  %v3900_v55 = vadd.f32 %v3899_v57, %v3869_v47  ;;  %v5043_v60 = vpop.f32.mrb[6].mxu0 }
 0x1f2   : > { %v5088_v32 = vadd.f32 %v5043_v60, %v4793_v10  ;;  %v3635_v36 = vpop.f32.mrb[7].mxu0 }
 0x1f3   : > { %v3901_v48 = vadd.f32 %v3900_v55, %v3870_v63  ;;  %v5089_v50 = vadd.f32 %v3635_v36, %v1689_v11  ;;  %v3832_v52 = vadd.f32 %v5086_v45, %v3831_v26 }
 0x1f4   : > { %3803 = vst [vmem:[%s6370_s17 + $0x38] sm:$0xff] %v5088_v32  ;;  %v3873_v30 = vmul.f32 %v5088_v32, %v5088_v32 }
 0x1f5   : > { %3802 = vst [vmem:[%s6370_s17 + $0x30] sm:$0xff] %v5089_v50  ;;  %v3833_v0 = vadd.f32 %v5089_v50, %v3832_v52  ;;  %v3872_v2 = vmul.f32 %v5089_v50, %v5089_v50  ;;  %v3902_v16 = vadd.f32 %v3901_v48, %v3871_v41  ;;  %v5046_v35 = vpop.f32.mrb[8].mxu0 }
 0x1f6   : > { %v5090_v43 = vadd.f32 %v5046_v35, %v4796_v12  ;;  %v3645_v51 = vpop.f32.mrb[9].mxu0 }
 0x1f7   : > { %v3903_v3 = vadd.f32 %v3902_v16, %v3872_v2  ;;  %v5091_v34 = vadd.f32 %v3645_v51, %v1699_v13  ;;  %v3834_v49 = vadd.f32 %v5088_v32, %v3833_v0 }
 0x1f8   : > { %3805 = vst [vmem:[%s6370_s17 + $0x48] sm:$0xff] %v5090_v43  ;;  %v3875_v61 = vmul.f32 %v5090_v43, %v5090_v43 }
 0x1f9   : > { %3804 = vst [vmem:[%s6370_s17 + $0x40] sm:$0xff] %v5091_v34  ;;  %v3835_v53 = vadd.f32 %v5091_v34, %v3834_v49  ;;  %v3874_v7 = vmul.f32 %v5091_v34, %v5091_v34  ;;  %v3904_v37 = vadd.f32 %v3903_v3, %v3873_v30  ;;  %v5049_v54 = vpop.f32.mrb[10].mxu0 }
 0x1fa   : > { %v5092_v56 = vadd.f32 %v5049_v54, %v4799_v14  ;;  %v3655_v59 = vpop.f32.mrb[11].mxu0 }
 0x1fb   : > { %v3905_v62 = vadd.f32 %v3904_v37, %v3874_v7  ;;  %v5093_v1 = vadd.f32 %v3655_v59, %v6355_v15  ;;  %v3836_v4 = vadd.f32 %v5090_v43, %v3835_v53 }
 0x1fc   : > { %3807 = vst [vmem:[%s6370_s17 + $0x58] sm:$0xff] %v5092_v56  ;;  %v3877_v13 = vmul.f32 %v5092_v56, %v5092_v56 }
 0x1fd   : > { %3806 = vst [vmem:[%s6370_s17 + $0x50] sm:$0xff] %v5093_v1  ;;  %v3837_v5 = vadd.f32 %v5093_v1, %v3836_v4  ;;  %v3876_v6 = vmul.f32 %v5093_v1, %v5093_v1  ;;  %v3906_v9 = vadd.f32 %v3905_v62, %v3875_v61  ;;  %v5052_v10 = vpop.f32.mrb[12].mxu0 }
 0x1fe   : > { %v5094_v11 = vadd.f32 %v5052_v10, %v6357_v17  ;;  %v3665_v12 = vpop.f32.mrb[13].mxu0 }
 0x1ff   : > { %v3907_v21 = vadd.f32 %v3906_v9, %v3876_v6  ;;  %v5095_v14 = vadd.f32 %v3665_v12, %v6359_v18  ;;  %v3838_v22 = vadd.f32 %v5092_v56, %v3837_v5 }
 0x200   : > { %3809 = vst [vmem:[%s6370_s17 + $0x68] sm:$0xff] %v5094_v11  ;;  %v3879_v17 = vmul.f32 %v5094_v11, %v5094_v11 }
 0x201   : > { %3808 = vst [vmem:[%s6370_s17 + $0x60] sm:$0xff] %v5095_v14  ;;  %v3839_v15 = vadd.f32 %v5095_v14, %v3838_v22  ;;  %v3878_v23 = vmul.f32 %v5095_v14, %v5095_v14  ;;  %v3908_v25 = vadd.f32 %v3907_v21, %v3877_v13  ;;  %v4858_v27 = vpop.f32.mrb[16].mxu1  ;;  %v5055_v28 = vpop.f32.mrb[14].mxu0 }
 0x202   : > { %v5096_v29 = vadd.f32 %v5055_v28, %v6361_v19  ;;  %v2128_v31 = vpop.f32.mrb[17].mxu1  ;;  %v3675_v33 = vpop.f32.mrb[15].mxu0 }
 0x203   : > { %v3909_v38 = vadd.f32 %v3908_v25, %v3878_v23  ;;  %v5097_v39 = vadd.f32 %v3675_v33, %v6363_v20  ;;  %v3840_v18 = vadd.f32 %v5094_v11, %v3839_v15 }
 0x204   : > { %3811 = vst [vmem:[%s6370_s17 + $0x78] sm:$0xff] %v5096_v29  ;;  %v3881_v19 = vmul.f32 %v5096_v29, %v5096_v29 }
 0x205   : > { %3810 = vst [vmem:[%s6370_s17 + $0x70] sm:$0xff] %v5097_v39  ;;  %v3841_v8 = vadd.f32 %v5097_v39, %v3840_v18  ;;  %v3880_v40 = vmul.f32 %v5097_v39, %v5097_v39  ;;  %v3910_v42 = vadd.f32 %v3909_v38, %v3879_v17  ;;  %v4861_v44 = vpop.f32.mrb[18].mxu1  ;;  %v5058_v45 = vpop.f32.mrb[16].mxu0 }
 0x206   : > { %v5098_v46 = vadd.f32 %v5058_v45, %v4858_v27  ;;  %v2138_v47 = vpop.f32.mrb[19].mxu1  ;;  %v3685_v57 = vpop.f32.mrb[17].mxu0 }
 0x207   : > { %v3911_v58 = vadd.f32 %v3910_v42, %v3880_v40  ;;  %v5099_v24 = vadd.f32 %v3685_v57, %v2128_v31  ;;  %v3842_v26 = vadd.f32 %v5096_v29, %v3841_v8 }
 0x208   : > { %3813 = vst [vmem:[%s6370_s17 + $0x88] sm:$0xff] %v5098_v46  ;;  %v3883_v50 = vmul.f32 %v5098_v46, %v5098_v46 }
 0x209   : > { %3812 = vst [vmem:[%s6370_s17 + $0x80] sm:$0xff] %v5099_v24  ;;  %v3843_v20 = vadd.f32 %v5099_v24, %v3842_v26  ;;  %v3882_v63 = vmul.f32 %v5099_v24, %v5099_v24  ;;  %v3912_v55 = vadd.f32 %v3911_v58, %v3881_v19  ;;  %v4864_v60 = vpop.f32.mrb[20].mxu1  ;;  %v5061_v32 = vpop.f32.mrb[18].mxu0 }
 0x20a   : > { %v5100_v36 = vadd.f32 %v5061_v32, %v4861_v44  ;;  %v2148_v41 = vpop.f32.mrb[21].mxu1  ;;  %v3695_v48 = vpop.f32.mrb[19].mxu0 }
 0x20b   : > { %v3913_v52 = vadd.f32 %v3912_v55, %v3882_v63  ;;  %v5101_v0 = vadd.f32 %v3695_v48, %v2138_v47  ;;  %v3844_v2 = vadd.f32 %v5098_v46, %v3843_v20 }
 0x20c   : > { %3815 = vst [vmem:[%s6370_s17 + $0x98] sm:$0xff] %v5100_v36  ;;  %v3885_v53 = vmul.f32 %v5100_v36, %v5100_v36 }
 0x20d   : > { %3814 = vst [vmem:[%s6370_s17 + $0x90] sm:$0xff] %v5101_v0  ;;  %v3845_v16 = vadd.f32 %v5101_v0, %v3844_v2  ;;  %v3884_v35 = vmul.f32 %v5101_v0, %v5101_v0  ;;  %v3914_v43 = vadd.f32 %v3913_v52, %v3883_v50  ;;  %v4867_v51 = vpop.f32.mrb[22].mxu1  ;;  %v5064_v30 = vpop.f32.mrb[20].mxu0 }
 0x20e   : > { %v5102_v3 = vadd.f32 %v5064_v30, %v4864_v60  ;;  %v2158_v34 = vpop.f32.mrb[23].mxu1  ;;  %v3705_v49 = vpop.f32.mrb[21].mxu0 }
 0x20f   : > { %v3915_v7 = vadd.f32 %v3914_v43, %v3884_v35  ;;  %v5103_v37 = vadd.f32 %v3705_v49, %v2148_v41  ;;  %v3846_v54 = vadd.f32 %v5100_v36, %v3845_v16 }
 0x210   : > { %3817 = vst [vmem:[%s6370_s17 + $0xa8] sm:$0xff] %v5102_v3  ;;  %v3887_v9 = vmul.f32 %v5102_v3, %v5102_v3 }
 0x211   : > { %3816 = vst [vmem:[%s6370_s17 + $0xa0] sm:$0xff] %v5103_v37  ;;  %v3847_v56 = vadd.f32 %v5103_v37, %v3846_v54  ;;  %v3886_v59 = vmul.f32 %v5103_v37, %v5103_v37  ;;  %v3916_v61 = vadd.f32 %v3915_v7, %v3885_v53  ;;  %v4870_v62 = vpop.f32.mrb[24].mxu1  ;;  %v5067_v1 = vpop.f32.mrb[22].mxu0 }
 0x212   : > { %v5104_v4 = vadd.f32 %v5067_v1, %v4867_v51  ;;  %v2168_v5 = vpop.f32.mrb[25].mxu1  ;;  %v3715_v6 = vpop.f32.mrb[23].mxu0 }
 0x213   : > { %v3917_v10 = vadd.f32 %v3916_v61, %v3886_v59  ;;  %v5105_v11 = vadd.f32 %v3715_v6, %v2158_v34  ;;  %v3848_v12 = vadd.f32 %v5102_v3, %v3847_v56 }
 0x214   : > { %3819 = vst [vmem:[%s6370_s17 + $0xb8] sm:$0xff] %v5104_v4  ;;  %v3889_v28 = vmul.f32 %v5104_v4, %v5104_v4 }
 0x215   : > { %3818 = vst [vmem:[%s6370_s17 + $0xb0] sm:$0xff] %v5105_v11  ;;  %v3849_v13 = vadd.f32 %v5105_v11, %v3848_v12  ;;  %v3888_v21 = vmul.f32 %v5105_v11, %v5105_v11  ;;  %v3918_v14 = vadd.f32 %v3917_v10, %v3887_v9  ;;  %v4873_v22 = vpop.f32.mrb[26].mxu1  ;;  %v5070_v15 = vpop.f32.mrb[24].mxu0 }
 0x216   : > { %v5106_v23 = vadd.f32 %v5070_v15, %v4870_v62  ;;  %v2178_v25 = vpop.f32.mrb[27].mxu1  ;;  %v3725_v27 = vpop.f32.mrb[25].mxu0 }
 0x217   : > { %v3919_v29 = vadd.f32 %v3918_v14, %v3888_v21  ;;  %v5107_v31 = vadd.f32 %v3725_v27, %v2168_v5  ;;  %v3850_v33 = vadd.f32 %v5104_v4, %v3849_v13 }
 0x218   : > { %3821 = vst [vmem:[%s6370_s17 + $0xc8] sm:$0xff] %v5106_v23  ;;  %v3891_v45 = vmul.f32 %v5106_v23, %v5106_v23 }
 0x219   : > { %3820 = vst [vmem:[%s6370_s17 + $0xc0] sm:$0xff] %v5107_v31  ;;  %v3851_v17 = vadd.f32 %v5107_v31, %v3850_v33  ;;  %v3890_v38 = vmul.f32 %v5107_v31, %v5107_v31  ;;  %v3920_v39 = vadd.f32 %v3919_v29, %v3889_v28  ;;  %v4876_v18 = vpop.f32.mrb[28].mxu1  ;;  %v5073_v8 = vpop.f32.mrb[26].mxu0 }
 0x21a   : > { %v5108_v40 = vadd.f32 %v5073_v8, %v4873_v22  ;;  %v2188_v42 = vpop.f32.mrb[29].mxu1  ;;  %v3735_v44 = vpop.f32.mrb[27].mxu0 }
 0x21b   : > { %v3921_v46 = vadd.f32 %v3920_v39, %v3890_v38  ;;  %v5109_v47 = vadd.f32 %v3735_v44, %v2178_v25  ;;  %v3852_v57 = vadd.f32 %v5106_v23, %v3851_v17 }
 0x21c   : > { %3823 = vst [vmem:[%s6370_s17 + $0xd8] sm:$0xff] %v5108_v40  ;;  %v3893_v32 = vmul.f32 %v5108_v40, %v5108_v40 }
 0x21d   : > { %3822 = vst [vmem:[%s6370_s17 + $0xd0] sm:$0xff] %v5109_v47  ;;  %v3853_v19 = vadd.f32 %v5109_v47, %v3852_v57  ;;  %v3892_v58 = vmul.f32 %v5109_v47, %v5109_v47  ;;  %v3922_v24 = vadd.f32 %v3921_v46, %v3891_v45  ;;  %v4879_v26 = vpop.f32.mrb[30].mxu1  ;;  %v5076_v20 = vpop.f32.mrb[28].mxu0 }
 0x21e   : > { %v5110_v63 = vadd.f32 %v5076_v20, %v4876_v18  ;;  %v2198_v55 = vpop.f32.mrb[31].mxu1  ;;  %v3745_v60 = vpop.f32.mrb[29].mxu0 }
 0x21f   : > { %v3923_v36 = vadd.f32 %v3922_v24, %v3892_v58  ;;  %v5111_v41 = vadd.f32 %v3745_v60, %v2188_v42  ;;  %v3854_v48 = vadd.f32 %v5108_v40, %v3853_v19 }
 0x220   : > { %3825 = vst [vmem:[%s6370_s17 + $0xe8] sm:$0xff] %v5110_v63  ;;  %v3895_v43 = vmul.f32 %v5110_v63, %v5110_v63 }
 0x221   : > { %3824 = vst [vmem:[%s6370_s17 + $0xe0] sm:$0xff] %v5111_v41  ;;  %v3855_v50 = vadd.f32 %v5111_v41, %v3854_v48  ;;  %v3894_v52 = vmul.f32 %v5111_v41, %v5111_v41  ;;  %v3924_v0 = vadd.f32 %v3923_v36, %v3893_v32  ;;  %v5079_v2 = vpop.f32.mrb[30].mxu0 }
 0x222   : > { %v5112_v16 = vadd.f32 %v5079_v2, %v4879_v26  ;;  %v3755_v35 = vpop.f32.mrb[31].mxu0 }
 0x223   : > { %v3925_v51 = vadd.f32 %v3924_v0, %v3894_v52  ;;  %v5113_v30 = vadd.f32 %v3755_v35, %v2198_v55  ;;  %v3856_v3 = vadd.f32 %v5110_v63, %v3855_v50 }
 0x224   : > { %3827 = vst [vmem:[%s6370_s17 + $0xf8] sm:$0xff] %v5112_v16  ;;  %v3897_v7 = vmul.f32 %v5112_v16, %v5112_v16 }
 0x225   : > { %3826 = vst [vmem:[%s6370_s17 + $0xf0] sm:$0xff] %v5113_v30  ;;  %v3857_v34 = vadd.f32 %v5113_v30, %v3856_v3  ;;  %v3896_v49 = vmul.f32 %v5113_v30, %v5113_v30  ;;  %v3926_v53 = vadd.f32 %v3925_v51, %v3895_v43 }
 0x227   : > { %v3858_v37 = vadd.f32 %v5112_v16, %v3857_v34  ;;  %v3927_v54 = vadd.f32 %v3926_v53, %v3896_v49 }
 0x229   : > { %v3859_v56 = vrot.slane %v3858_v37, 4  ;;  %v3928_v59 = vadd.f32 %v3927_v54, %v3897_v7 }
 0x22b   : > { %v3860_v61 = vadd.f32 %v3859_v56, %v3858_v37  ;;  %v3929_v62 = vrot.slane %v3928_v59, 4 }
 0x22d   : > { %v3861_v1 = vrot.slane %v3860_v61, 2  ;;  %v3930_v4 = vadd.f32 %v3929_v62, %v3928_v59 }
 0x22f   : > { %v3862_v5 = vadd.f32 %v3861_v1, %v3860_v61  ;;  %v3931_v6 = vrot.slane %v3930_v4, 2 }
 0x231   : > { %v3863_v9 = vrot.slane %v3862_v5, 1  ;;  %v3932_v10 = vadd.f32 %v3931_v6, %v3930_v4 }
 0x233   : > { %v3864_v11 = vadd.f32 %v3863_v9, %v3862_v5  ;;  %v3933_v12 = vrot.slane %v3932_v10, 1 }
 0x235   : > { %3865 = vst [vmem:[%s235_s21] sm:$0x1] %v3864_v11  ;;  %v3934_v13 = vadd.f32 %v3933_v12, %v3932_v10 }
 0x237   : > { %3935 = vst [vmem:[%s235_s21 + $0x1] sm:$0x1] %v3934_v13 }
 0x238 PF: > { %s16_s18 = sadd.s32 1, %s5353_s18  }
 0x239   : > { %p13_p4 = scmp.ge.s32.totalorder %s16_s18, 4  }
 0x23b   :  { %15 = sbr.rel (!%p13_p4) target bundleno = 1 (0x1), region = 80 }

// kernel: double_conv.4
= control target key start
LH: loop header
LB: loop body
LE: loop exit
PB: predicated region body
PF: predicated region fallthrough
CT: control target
= control target key end

     0   :  { %s2858_s18 = smov 0   ;;  %s4564_s0 = inlined_call_operand.vmem [shape: f32[2,16,16,128], index: 0, kind: input, shape index: {}]   ;;  %s4565_s1 = inlined_call_operand.vmem [shape: f32[1152,128], index: 1, kind: input, shape index: {}]   ;;  %s4566_s2 = inlined_call_operand.vmem [shape: f32[1,128], index: 2, kind: input, shape index: {}]   ;;  %s4567_s3 = inlined_call_operand.vmem [shape: f32[1,128], index: 3, kind: input, shape index: {}]   ;;  %s4568_s4 = inlined_call_operand.vmem [shape: f32[2,256,128], index: 4, kind: output, shape index: {0}]   ;;  %s4569_s5 = inlined_call_operand.vmem [shape: f32[2,2,128], index: 5, kind: output, shape index: {1}]  }
   0x1 LB: > { %s2249_s19 = sadd.s32 4294967295, %s2824_s18   ;;  %p2253_p0 = scmp.ge.s32.totalorder %s2824_s18, 1  ;;  %s2824_s18 = sphi %s2858_s18, %s16_s18  }
   0x2   : > { %p190_p1 = scmp.lt.s32.totalorder %s2824_s18, 3 }
   0x4   : > { %p191_p2 = pnand %p2253_p0, %p190_p1 }
   0x6   : > { %194 = sbr.rel (%p191_p2) target bundleno = 645 (0x285), region = 36 }
   0xd   : > { %v2869_v0 = vld [vmem:[%s4565_s1] sm:$0xff]  ;;  %v2874_v1 = vld [vmem:[%s4565_s1 + $0x8] sm:$0xff]  ;;  %v4582_v3 = vmov 0.0|0.0   ;;  %v2893_v6 = vld [vmem:[%s4565_s1 + $0x10] sm:$0xff]  ;;  %v2827_v8 = vmov 0.0   ;;  %p222_p3 = scmp.lt.s32.totalorder %s2249_s19, 1 }
   0xe   : > { %v2879_v2 = vld [vmem:[%s4565_s1 + $0x100] sm:$0xff]  ;;  %2393 = vmatprep.subr.bf16.mxu1 %v4582_v3  ;;  %2441 = vmatprep.subr.bf16.mxu0 %v4582_v3  ;;  %v2394_v4 = vpack.c.bf16 %v2874_v1, %v2869_v0  ;;  %v2888_v5 = vld [vmem:[%s4565_s1 + $0x108] sm:$0xff]  ;;  %v2898_v7 = vld [vmem:[%s4565_s1 + $0x18] sm:$0xff]  ;;  %378 = vst [vmem:[#allocation2] sm:$0xff] %v2827_v8 }
   0xf   : > { %379 = vst [vmem:[#allocation2 + $0x8] sm:$0xff] %v2827_v8  ;;  %380 = vst [vmem:[#allocation2 + $0x10] sm:$0x3] %v2827_v8  ;;  %v2442_v9 = vpack.c.bf16 %v2888_v5, %v2879_v2  ;;  %v788_v10 = vld [vmem:[%s4565_s1 + $0x110] sm:$0xff]  ;;  %v789_v11 = vld [vmem:[%s4565_s1 + $0x118] sm:$0xff]  ;;  %v2397_v12 = vpack.c.bf16 %v2898_v7, %v2893_v6  ;;  %s4669_s19 = smov (!%p222_p3, %s2249_s19), 1 }
  0x10   : > { %381 = vst [vmem:[#allocation2 + $0x18] sm:$0xff] %v2827_v8  ;;  %382 = vst [vmem:[#allocation2 + $0x20] sm:$0xff] %v2827_v8  ;;  %2395 = vmatpush1.bf16.msra.mxu1 %v2394_v4  ;;  %v2445_v13 = vpack.c.bf16 %v789_v11, %v788_v10  ;;  %v758_v14 = vld [vmem:[%s4565_s1 + $0x20] sm:$0xff]  ;;  %v759_v15 = vld [vmem:[%s4565_s1 + $0x28] sm:$0xff]  ;;  %s2263_s12 = sshll.u32 %s4669_s19, 8 }
  0x11   : > { %383 = vst [vmem:[#allocation2 + $0x28] sm:$0x3] %v2827_v8  ;;  %384 = vst [vmem:[#allocation2 + $0x30] sm:$0xff] %v2827_v8  ;;  %2443 = vmatpush1.bf16.msra.mxu0 %v2442_v9  ;;  %2396 = vmatprep.subr.bf16.mxu1 %v4582_v3  ;;  %v790_v16 = vld [vmem:[%s4565_s1 + $0x120] sm:$0xff]  ;;  %v791_v17 = vld [vmem:[%s4565_s1 + $0x128] sm:$0xff]  ;;  %v2400_v18 = vpack.c.bf16 %v759_v15, %v758_v14  ;;  %s3032_s25 = scalar_lea.vmem %s4564_s0, %s2263_s12  ;;  %s4322_s9 = scalar_lea.vmem %s4568_s4, %s2263_s12 }
  0x12   : > { %385 = vst [vmem:[#allocation2 + $0x38] sm:$0xff] %v2827_v8  ;;  %386 = vst [vmem:[#allocation2 + $0x40] sm:$0x3] %v2827_v8  ;;  %2444 = vmatprep.subr.bf16.mxu0 %v4582_v3  ;;  %v2448_v19 = vpack.c.bf16 %v791_v17, %v790_v16  ;;  %v760_v20 = vld [vmem:[%s4565_s1 + $0x30] sm:$0xff]  ;;  %v761_v21 = vld [vmem:[%s4565_s1 + $0x38] sm:$0xff]  ;;  %s2258_s12 = sshll.u32 %s4669_s19, 1 }
  0x13   : > { %387 = vst [vmem:[#allocation2 + $0x48] sm:$0xff] %v2827_v8  ;;  %388 = vst [vmem:[#allocation2 + $0x50] sm:$0xff] %v2827_v8  ;;  %v792_v22 = vld [vmem:[%s4565_s1 + $0x130] sm:$0xff]  ;;  %v793_v23 = vld [vmem:[%s4565_s1 + $0x138] sm:$0xff]  ;;  %v2403_v24 = vpack.c.bf16 %v761_v21, %v760_v20  ;;  %s235_s13 = scalar_lea.vmem %s4569_s5, %s2258_s12 }
  0x14   : > { %389 = vst [vmem:[#allocation2 + $0x58] sm:$0x3] %v2827_v8  ;;  %390 = vst [vmem:[#allocation2 + $0x60] sm:$0xff] %v2827_v8  ;;  %2398 = vmatpush1.bf16.msra.mxu1 %v2397_v12  ;;  %v2451_v25 = vpack.c.bf16 %v793_v23, %v792_v22  ;;  %v762_v26 = vld [vmem:[%s4565_s1 + $0x40] sm:$0xff]  ;;  %v763_v27 = vld [vmem:[%s4565_s1 + $0x48] sm:$0xff] }
  0x15   : > { %391 = vst [vmem:[#allocation2 + $0x68] sm:$0xff] %v2827_v8  ;;  %392 = vst [vmem:[#allocation2 + $0x70] sm:$0x3] %v2827_v8  ;;  %2446 = vmatpush1.bf16.msra.mxu0 %v2445_v13  ;;  %2399 = vmatprep.subr.bf16.mxu1 %v4582_v3  ;;  %v794_v28 = vld [vmem:[%s4565_s1 + $0x140] sm:$0xff]  ;;  %v795_v29 = vld [vmem:[%s4565_s1 + $0x148] sm:$0xff]  ;;  %v2406_v30 = vpack.c.bf16 %v763_v27, %v762_v26 }
  0x16   : > { %393 = vst [vmem:[#allocation2 + $0x78] sm:$0xff] %v2827_v8  ;;  %394 = vst [vmem:[#allocation2 + $0x80] sm:$0xff] %v2827_v8  ;;  %2447 = vmatprep.subr.bf16.mxu0 %v4582_v3  ;;  %v2454_v31 = vpack.c.bf16 %v795_v29, %v794_v28  ;;  %v764_v32 = vld [vmem:[%s4565_s1 + $0x50] sm:$0xff]  ;;  %v765_v33 = vld [vmem:[%s4565_s1 + $0x58] sm:$0xff] }
  0x17   : > { %395 = vst [vmem:[#allocation2 + $0x88] sm:$0x3] %v2827_v8  ;;  %396 = vst [vmem:[#allocation2 + $0x90] sm:$0xff] %v2827_v8  ;;  %v796_v34 = vld [vmem:[%s4565_s1 + $0x150] sm:$0xff]  ;;  %v797_v35 = vld [vmem:[%s4565_s1 + $0x158] sm:$0xff]  ;;  %v2409_v36 = vpack.c.bf16 %v765_v33, %v764_v32 }
  0x18   : > { %397 = vst [vmem:[#allocation2 + $0x98] sm:$0xff] %v2827_v8  ;;  %398 = vst [vmem:[#allocation2 + $0xa0] sm:$0x3] %v2827_v8  ;;  %2401 = vmatpush1.bf16.msra.mxu1 %v2400_v18  ;;  %v2457_v37 = vpack.c.bf16 %v797_v35, %v796_v34  ;;  %v766_v38 = vld [vmem:[%s4565_s1 + $0x60] sm:$0xff]  ;;  %v767_v39 = vld [vmem:[%s4565_s1 + $0x68] sm:$0xff] }
  0x19   : > { %399 = vst [vmem:[#allocation2 + $0xa8] sm:$0xff] %v2827_v8  ;;  %400 = vst [vmem:[#allocation2 + $0xb0] sm:$0xff] %v2827_v8  ;;  %2449 = vmatpush1.bf16.msra.mxu0 %v2448_v19  ;;  %2402 = vmatprep.subr.bf16.mxu1 %v4582_v3  ;;  %v798_v40 = vld [vmem:[%s4565_s1 + $0x160] sm:$0xff]  ;;  %v799_v41 = vld [vmem:[%s4565_s1 + $0x168] sm:$0xff]  ;;  %v2412_v46 = vpack.c.bf16 %v767_v39, %v766_v38 }
  0x1a   : > { %401 = vst [vmem:[#allocation2 + $0xb8] sm:$0x3] %v2827_v8  ;;  %402 = vst [vmem:[#allocation2 + $0xc0] sm:$0xff] %v2827_v8  ;;  %2450 = vmatprep.subr.bf16.mxu0 %v4582_v3  ;;  %v497_v42 = vld [vmem:[#allocation2 + $0x1] sm:$0xff]  ;;  %v3052_v44 = vld [vmem:[%s4566_s2] ss:$0 sm:$0xff]  ;;  %v2460_v50 = vpack.c.bf16 %v799_v41, %v798_v40 }
  0x1b   : > { %403 = vst [vmem:[#allocation2 + $0xc8] sm:$0xff] %v2827_v8  ;;  %404 = vst [vmem:[#allocation2 + $0xd0] sm:$0x3] %v2827_v8  ;;  %v236_v43 = vld [vmem:[%s3032_s25] sm:$0xff]  ;;  %962 = vmatprep.mubr.f32.mxu1 %v497_v42  ;;  %v768_v47 = vld [vmem:[%s4565_s1 + $0x70] sm:$0xff] }
  0x1c   : > { %405 = vst [vmem:[#allocation2 + $0xd8] sm:$0xff] %v2827_v8  ;;  %406 = vst [vmem:[#allocation2 + $0xe0] sm:$0xff] %v2827_v8  ;;  %2404 = vmatpush1.bf16.msra.mxu1 %v2403_v24  ;;  %v3057_v45 = vld [vmem:[%s4567_s3] ss:$0 sm:$0xff]  ;;  %v769_v48 = vld [vmem:[%s4565_s1 + $0x78] sm:$0xff]  ;;  %v275_v49 = vmul.f32 %v3052_v44, %v236_v43 }
  0x1d   : > { %407 = vst [vmem:[#allocation2 + $0xe8] sm:$0x3] %v2827_v8  ;;  %408 = vst [vmem:[#allocation2 + $0xf0] sm:$0xff] %v2827_v8  ;;  %2452 = vmatpush1.bf16.msra.mxu0 %v2451_v25  ;;  %2405 = vmatprep.subr.bf16.mxu1 %v4582_v3  ;;  %v237_v51 = vld [vmem:[%s3032_s25 + $0x8] sm:$0xff]  ;;  %v238_v52 = vld [vmem:[%s3032_s25 + $0x10] sm:$0xff]  ;;  %v2415_v59 = vpack.c.bf16 %v769_v48, %v768_v47 }
  0x1e   : > { %409 = vst [vmem:[#allocation2 + $0xf8] sm:$0xff] %v2827_v8  ;;  %410 = vst [vmem:[#allocation2 + $0x100] sm:$0x3] %v2827_v8  ;;  %2453 = vmatprep.subr.bf16.mxu0 %v4582_v3  ;;  %v800_v53 = vld [vmem:[%s4565_s1 + $0x170] sm:$0xff]  ;;  %v801_v54 = vld [vmem:[%s4565_s1 + $0x178] sm:$0xff]  ;;  %v3077_v55 = vadd.f32 %v3057_v45, %v275_v49  ;;  %v276_v56 = vmul.f32 %v3052_v44, %v237_v51  ;;  %v277_v57 = vmul.f32 %v3052_v44, %v238_v52 }
  0x1f   : > { %411 = vst [vmem:[#allocation2 + $0x108] sm:$0xff] %v2827_v8  ;;  %412 = vst [vmem:[#allocation2 + $0x110] sm:$0xff] %v2827_v8  ;;  %v239_v58 = vld [vmem:[%s3032_s25 + $0x18] sm:$0xff]  ;;  %v3085_v60 = vld [vmem:[%s4565_s1 + $0x80] sm:$0xff]  ;;  %v2463_v9 = vpack.c.bf16 %v801_v54, %v800_v53 }
  0x20   : > { %413 = vst [vmem:[#allocation2 + $0x118] sm:$0x3] %v2827_v8  ;;  %414 = vst [vmem:[#allocation2 + $0x120] sm:$0xff] %v2827_v8  ;;  %2407 = vmatpush1.bf16.msra.mxu1 %v2406_v30  ;;  %v3090_v61 = vld [vmem:[%s4565_s1 + $0x88] sm:$0xff]  ;;  %v278_v62 = vmul.f32 %v3052_v44, %v239_v58  ;;  %v240_v63 = vld [vmem:[%s3032_s25 + $0x20] sm:$0xff]  ;;  %v346_v1 = vmax.f32 %v3077_v55, 0.0  ;;  %v3101_v2 = vadd.f32 %v3057_v45, %v276_v56 }
  0x21   : > { %415 = vst [vmem:[#allocation2 + $0x128] sm:$0xff] %v2827_v8  ;;  %416 = vst [vmem:[#allocation2 + $0x130] sm:$0x3] %v2827_v8  ;;  %2455 = vmatpush1.bf16.msra.mxu0 %v2454_v31  ;;  %2408 = vmatprep.subr.bf16.mxu1 %v4582_v3  ;;  %v3097_v0 = vld [vmem:[%s4565_s1 + $0x180] sm:$0xff]  ;;  %v3104_v4 = vadd.f32 %v3057_v45, %v277_v57  ;;  %v279_v5 = vmul.f32 %v3052_v44, %v240_v63  ;;  %v241_v6 = vld [vmem:[%s3032_s25 + $0x28] sm:$0xff] }
  0x22   : > { %417 = vst [vmem:[#allocation2 + $0x138] sm:$0xff] %v2827_v8  ;;  %418 = vst [vmem:[#allocation2 + $0x140] sm:$0xff] %v2827_v8  ;;  %2456 = vmatprep.subr.bf16.mxu0 %v4582_v3  ;;  %v242_v7 = vld [vmem:[%s3032_s25 + $0x30] sm:$0xff]  ;;  %v803_v10 = vld [vmem:[%s4565_s1 + $0x188] sm:$0xff]  ;;  %v3114_v11 = vadd.f32 %v3057_v45, %v278_v62  ;;  %v280_v12 = vmul.f32 %v3052_v44, %v241_v6  ;;  %v347_v15 = vmax.f32 %v3101_v2, 0.0 }
  0x23   : > { %419 = vst [vmem:[#allocation2 + $0x148] sm:$0x3] %v2827_v8  ;;  %420 = vst [vmem:[#allocation2 + $0x150] sm:$0xff] %v2827_v8  ;;  %v243_v13 = vld [vmem:[%s3032_s25 + $0x38] sm:$0xff]  ;;  %v244_v14 = vld [vmem:[%s3032_s25 + $0x40] sm:$0xff]  ;;  %v348_v16 = vmax.f32 %v3104_v4, 0.0  ;;  %v3125_v17 = vadd.f32 %v3057_v45, %v279_v5  ;;  %v281_v18 = vmul.f32 %v3052_v44, %v242_v7  ;;  %v2418_v20 = vpack.c.bf16 %v3090_v61, %v3085_v60 }
  0x24   : > { %421 = vst [vmem:[#allocation2 + $0x158] sm:$0xff] %v2827_v8  ;;  %422 = vst [vmem:[#allocation2 + $0x160] sm:$0x3] %v2827_v8  ;;  %2410 = vmatpush1.bf16.msra.mxu1 %v2409_v36  ;;  %v245_v19 = vld [vmem:[%s3032_s25 + $0x48] sm:$0xff]  ;;  %v349_v21 = vmax.f32 %v3114_v11, 0.0  ;;  %v3133_v22 = vadd.f32 %v3057_v45, %v280_v12  ;;  %v282_v23 = vmul.f32 %v3052_v44, %v243_v13  ;;  %v246_v24 = vld [vmem:[%s3032_s25 + $0x50] sm:$0xff] }
  0x25   : > { %423 = vst [vmem:[#allocation2 + $0x168] sm:$0xff] %v2827_v8  ;;  %424 = vst [vmem:[#allocation2 + $0x170] sm:$0xff] %v2827_v8  ;;  %2458 = vmatpush1.bf16.msra.mxu0 %v2457_v37  ;;  %2411 = vmatprep.subr.bf16.mxu1 %v4582_v3  ;;  %v2466_v25 = vpack.c.bf16 %v803_v10, %v3097_v0  ;;  %v3141_v26 = vld [vmem:[%s4565_s1 + $0x90] sm:$0xff]  ;;  %v350_v27 = vmax.f32 %v3125_v17, 0.0  ;;  %v3149_v28 = vadd.f32 %v3057_v45, %v281_v18  ;;  %v247_v30 = vld [vmem:[%s3032_s25 + $0x58] sm:$0xff] }
  0x26   : > { %425 = vst [vmem:[#allocation2 + $0x178] sm:$0x3] %v2827_v8  ;;  %426 = vst [vmem:[#allocation2 + $0x180] sm:$0xff] %v2827_v8  ;;  %2459 = vmatprep.subr.bf16.mxu0 %v4582_v3  ;;  %v283_v29 = vmul.f32 %v3052_v44, %v244_v14  ;;  %v248_v31 = vld [vmem:[%s3032_s25 + $0x60] sm:$0xff]  ;;  %v773_v32 = vld [vmem:[%s4565_s1 + $0x98] sm:$0xff]  ;;  %v351_v35 = vmax.f32 %v3133_v22, 0.0  ;;  %v3168_v36 = vadd.f32 %v3057_v45, %v282_v23 }
  0x27   : > { %427 = vst [vmem:[#allocation2 + $0x188] sm:$0xff] %v2827_v8  ;;  %428 = vst [vmem:[#allocation2 + $0x190] sm:$0x3] %v2827_v8  ;;  %v804_v33 = vld [vmem:[%s4565_s1 + $0x190] sm:$0xff]  ;;  %v805_v34 = vld [vmem:[%s4565_s1 + $0x198] sm:$0xff]  ;;  %v284_v37 = vmul.f32 %v3052_v44, %v245_v19  ;;  %v285_v38 = vmul.f32 %v3052_v44, %v246_v24  ;;  %v352_v39 = vmax.f32 %v3149_v28, 0.0  ;;  %v286_v41 = vmul.f32 %v3052_v44, %v247_v30 }
  0x28   : > { %429 = vst [vmem:[#allocation2 + $0x198] sm:$0xff] %v2827_v8  ;;  %430 = vst [vmem:[#allocation2 + $0x1a0] sm:$0xff] %v2827_v8  ;;  %2413 = vmatpush1.bf16.msra.mxu1 %v2412_v46  ;;  %v3177_v40 = vadd.f32 %v3057_v45, %v283_v29  ;;  %v249_v42 = vld [vmem:[%s3032_s25 + $0x68] sm:$0xff]  ;;  %v3184_v43 = vld [vmem:[%s4565_s1 + $0xa0] sm:$0xff]  ;;  %v353_v46 = vmax.f32 %v3168_v36, 0.0  ;;  %v287_v49 = vmul.f32 %v3052_v44, %v248_v31 }
  0x29   : > { %431 = vst [vmem:[#allocation2 + $0x1a8] sm:$0x3] %v2827_v8  ;;  %2461 = vmatpush1.bf16.msra.mxu0 %v2460_v50  ;;  %2414 = vmatprep.subr.bf16.mxu1 %v4582_v3  ;;  %433 = vst [vmem:[#allocation2 + $0x19] sm:$0xff] %v346_v1  ;;  %v3190_v47 = vadd.f32 %v3057_v45, %v284_v37  ;;  %v324_v48 = vadd.f32 %v3057_v45, %v285_v38  ;;  %v250_v50 = vld [vmem:[%s3032_s25 + $0x70] sm:$0xff]  ;;  %v775_v53 = vld [vmem:[%s4565_s1 + $0xa8] sm:$0xff] }
  0x2a   : > { %2462 = vmatprep.subr.bf16.mxu0 %v4582_v3  ;;  %434 = vst [vmem:[#allocation2 + $0x21] sm:$0xff] %v347_v15  ;;  %435 = vst [vmem:[#allocation2 + $0x31] sm:$0xff] %v348_v16  ;;  %v2421_v51 = vpack.c.bf16 %v773_v32, %v3141_v26  ;;  %v2469_v52 = vpack.c.bf16 %v805_v34, %v804_v33  ;;  %v354_v54 = vmax.f32 %v3177_v40, 0.0  ;;  %v251_v57 = vld [vmem:[%s3032_s25 + $0x78] sm:$0xff]  ;;  %v252_v58 = vld [vmem:[%s3032_s25 + $0x80] sm:$0xff] }
  0x2b   : > { %436 = vst [vmem:[#allocation2 + $0x39] sm:$0xff] %v349_v21  ;;  %437 = vst [vmem:[#allocation2 + $0x49] sm:$0xff] %v350_v27  ;;  %v325_v56 = vadd.f32 %v3057_v45, %v286_v41  ;;  %v807_v60 = vld [vmem:[%s4565_s1 + $0x1a8] sm:$0xff]  ;;  %v355_v62 = vmax.f32 %v3190_v47, 0.0  ;;  %v3217_v63 = vmax.f32 %v324_v48, 0.0  ;;  %v3220_v0 = vadd.f32 %v3057_v45, %v287_v49  ;;  %v254_v10 = vld [vmem:[%s3032_s25 + $0x90] sm:$0xff] }
  0x2c   : > { %2416 = vmatpush1.bf16.msra.mxu1 %v2415_v59  ;;  %438 = vst [vmem:[#allocation2 + $0x51] sm:$0xff] %v351_v35  ;;  %439 = vst [vmem:[#allocation2 + $0x61] sm:$0xff] %v352_v39  ;;  %v806_v59 = vld [vmem:[%s4565_s1 + $0x1a0] sm:$0xff]  ;;  %v288_v5 = vmul.f32 %v3052_v44, %v249_v42  ;;  %v289_v7 = vmul.f32 %v3052_v44, %v250_v50  ;;  %v290_v14 = vmul.f32 %v3052_v44, %v251_v57  ;;  %v777_v26 = vld [vmem:[%s4565_s1 + $0xb8] sm:$0xff] }
  0x2d   : > { %2464 = vmatpush1.bf16.msra.mxu0 %v2463_v9  ;;  %2417 = vmatprep.subr.bf16.mxu1 %v4582_v3  ;;  %440 = vst [vmem:[#allocation2 + $0x69] sm:$0xff] %v353_v46  ;;  %441 = vst [vmem:[#allocation2 + $0x79] sm:$0xff] %v354_v54  ;;  %v3227_v6 = vmax.f32 %v325_v56, 0.0  ;;  %v253_v9 = vld [vmem:[%s3032_s25 + $0x88] sm:$0xff]  ;;  %v358_v12 = vmax.f32 %v3220_v0, 0.0  ;;  %v291_v18 = vmul.f32 %v3052_v44, %v252_v58  ;;  %v808_v33 = vld [vmem:[%s4565_s1 + $0x1b0] sm:$0xff] }
  0x2e   : > { %2465 = vmatprep.subr.bf16.mxu0 %v4582_v3  ;;  %442 = vst [vmem:[#allocation2 + $0x81] sm:$0xff] %v355_v62  ;;  %443 = vst [vmem:[#allocation2 + $0x91] sm:$0xff] %v3217_v63  ;;  %v3237_v13 = vadd.f32 %v3057_v45, %v288_v5  ;;  %v2424_v19 = vpack.c.bf16 %v775_v53, %v3184_v43  ;;  %v3244_v23 = vadd.f32 %v3057_v45, %v289_v7  ;;  %v809_v34 = vld [vmem:[%s4565_s1 + $0x1b8] sm:$0xff]  ;;  %v810_v57 = vld [vmem:[%s4565_s1 + $0x1c0] sm:$0xff] }
  0x2f   : > { %444 = vst [vmem:[#allocation2 + $0x99] sm:$0xff] %v3227_v6  ;;  %v292_v24 = vmul.f32 %v3052_v44, %v253_v9  ;;  %445 = vst [vmem:[#allocation2 + $0xa9] sm:$0xff] %v358_v12  ;;  %v3258_v30 = vadd.f32 %v3057_v45, %v290_v14  ;;  %v3261_v31 = vadd.f32 %v3057_v45, %v291_v18  ;;  %v255_v56 = vld [vmem:[%s3032_s25 + $0x98] sm:$0xff]  ;;  %v811_v58 = vld [vmem:[%s4565_s1 + $0x1c8] sm:$0xff] }
  0x30   : > { %2419 = vmatpush1.bf16.msra.mxu1 %v2418_v20  ;;  %v3212_v61 = vld [vmem:[#allocation2 + $0x18] sm:$0xff]  ;;  %v2472_v20 = vpack.c.bf16 %v807_v60, %v806_v59  ;;  %v4579_v29 = vmax.f32 %v3237_v13, 0.0  ;;  %v293_v32 = vmul.f32 %v3052_v44, %v254_v10  ;;  %v4578_v37 = vmax.f32 %v3244_v23, 0.0  ;;  %v256_v7 = vld [vmem:[%s3032_s25 + $0xa0] sm:$0xff]  ;;  %v780_v10 = vld [vmem:[%s4565_s1 + $0xd0] sm:$0xff] }
  0x31   : > { %2467 = vmatpush1.bf16.msra.mxu0 %v2466_v25  ;;  %2420 = vmatprep.subr.bf16.mxu1 %v4582_v3  ;;  %v776_v25 = vld [vmem:[%s4565_s1 + $0xb0] sm:$0xff]  ;;  %v3273_v38 = vadd.f32 %v3057_v45, %v292_v24  ;;  %v4577_v41 = vmax.f32 %v3258_v30, 0.0  ;;  %v4576_v42 = vmax.f32 %v3261_v31, 0.0  ;;  %v2475_v50 = vpack.c.bf16 %v809_v34, %v808_v33  ;;  %v781_v14 = vld [vmem:[%s4565_s1 + $0xd8] sm:$0xff]  ;;  %v862_v11 = vld [vmem:[%s4565_s1 + $0x360] sm:$0xff] }
  0x32   : > { %2468 = vmatprep.subr.bf16.mxu0 %v4582_v3  ;;  %1187 = vmatprep.mubr.f32.mxu0 %v3212_v61  ;;  %446 = vst [vmem:[#allocation2 + $0xb1] sm:$0xff] %v4579_v29  ;;  %v3280_v43 = vadd.f32 %v3057_v45, %v293_v32  ;;  %v2427_v48 = vpack.c.bf16 %v777_v26, %v776_v25  ;;  %447 = vst [vmem:[#allocation2 + $0xc1] sm:$0xff] %v4578_v37  ;;  %v257_v26 = vld [vmem:[%s3032_s25 + $0xa8] sm:$0xff]  ;;  %v825_v55 = vld [vmem:[%s4565_s1 + $0x238] sm:$0xff] }
  0x33   : > { %v4575_v49 = vmax.f32 %v3273_v38, 0.0  ;;  %448 = vst [vmem:[#allocation2 + $0xc9] sm:$0xff] %v4577_v41  ;;  %449 = vst [vmem:[#allocation2 + $0xd9] sm:$0xff] %v4576_v42  ;;  %v294_v59 = vmul.f32 %v3052_v44, %v255_v56  ;;  %v2478_v9 = vpack.c.bf16 %v811_v58, %v810_v57  ;;  %v295_v18 = vmul.f32 %v3052_v44, %v256_v7  ;;  %v815_v56 = vld [vmem:[%s4565_s1 + $0x1e8] sm:$0xff]  ;;  %v258_v58 = vld [vmem:[%s3032_s25 + $0xb0] sm:$0xff] }
  0x34   : > { %2422 = vmatpush1.bf16.msra.mxu1 %v2421_v51  ;;  %v778_v51 = vld [vmem:[%s4565_s1 + $0xc0] sm:$0xff]  ;;  %v4574_v53 = vmax.f32 %v3280_v43, 0.0  ;;  %v2433_v32 = vpack.c.bf16 %v781_v14, %v780_v10  ;;  %v296_v33 = vmul.f32 %v3052_v44, %v257_v26  ;;  %v297_v7 = vmul.f32 %v3052_v44, %v258_v58  ;;  %v784_v10 = vld [vmem:[%s4565_s1 + $0xf0] sm:$0xff]  ;;  %v785_v14 = vld [vmem:[%s4565_s1 + $0xf8] sm:$0xff] }
  0x35   : > { %2470 = vmatpush1.bf16.msra.mxu0 %v2469_v52  ;;  %2423 = vmatprep.subr.bf16.mxu1 %v4582_v3  ;;  %v779_v52 = vld [vmem:[%s4565_s1 + $0xc8] sm:$0xff]  ;;  %450 = vst [vmem:[#allocation2 + $0xe1] sm:$0xff] %v4575_v49  ;;  %v3311_v5 = vadd.f32 %v3057_v45, %v294_v59  ;;  %v3331_v25 = vadd.f32 %v3057_v45, %v295_v18  ;;  %v259_v18 = vld [vmem:[%s3032_s25 + $0xb8] sm:$0xff]  ;;  %v860_v4 = vld [vmem:[%s4565_s1 + $0x350] sm:$0xff] }
  0x36   : > { %2471 = vmatprep.subr.bf16.mxu0 %v4582_v3  ;;  %451 = vst [vmem:[#allocation2 + $0xf1] sm:$0xff] %v4574_v53  ;;  %v2430_v60 = vpack.c.bf16 %v779_v52, %v778_v51  ;;  %v814_v52 = vld [vmem:[%s4565_s1 + $0x1e0] sm:$0xff]  ;;  %v3353_v57 = vadd.f32 %v3057_v45, %v296_v33  ;;  %v3378_v26 = vadd.f32 %v3057_v45, %v297_v7  ;;  %v530_v49 = vld [vmem:[#allocation2 + $0xa] sm:$0xff]  ;;  %v849_v0 = vld [vmem:[%s4565_s1 + $0x2f8] sm:$0xff] }
  0x37   : > { %v4573_v24 = vmax.f32 %v3311_v5, 0.0  ;;  %v4572_v51 = vmax.f32 %v3331_v25, 0.0  ;;  %v260_v33 = vld [vmem:[%s3032_s25 + $0xc0] sm:$0xff] }
  0x38   : > { %2425 = vmatpush1.bf16.msra.mxu1 %v2424_v19  ;;  %v812_v19 = vld [vmem:[%s4565_s1 + $0x1d0] sm:$0xff] }
  0x39   : > { %2473 = vmatpush1.bf16.msra.mxu0 %v2472_v20  ;;  %2426 = vmatprep.subr.bf16.mxu1 %v4582_v3  ;;  %v813_v20 = vld [vmem:[%s4565_s1 + $0x1d8] sm:$0xff]  ;;  %452 = vst [vmem:[#allocation2 + $0xf9] sm:$0xff] %v4573_v24  ;;  %453 = vst [vmem:[#allocation2 + $0x109] sm:$0xff] %v4572_v51  ;;  %v498_v24 = vld [vmem:[#allocation2 + $0x9] sm:$0xff] }
  0x3a   : > { %2474 = vmatprep.subr.bf16.mxu0 %v4582_v3  ;;  %v2481_v34 = vpack.c.bf16 %v813_v20, %v812_v19  ;;  %v816_v19 = vld [vmem:[%s4565_s1 + $0x1f0] sm:$0xff]  ;;  %v817_v20 = vld [vmem:[%s4565_s1 + $0x1f8] sm:$0xff] }
  0x3b   : > { %v2487_v58 = vpack.c.bf16 %v817_v20, %v816_v19  ;;  %v850_v19 = vld [vmem:[%s4565_s1 + $0x300] sm:$0xff]  ;;  %v851_v20 = vld [vmem:[%s4565_s1 + $0x308] sm:$0xff] }
  0x3c   : > { %2428 = vmatpush1.bf16.msra.mxu1 %v2427_v48  ;;  %v782_v48 = vld [vmem:[%s4565_s1 + $0xe0] sm:$0xff] }
  0x3d   : > { %2476 = vmatpush1.bf16.msra.mxu0 %v2475_v50  ;;  %2429 = vmatprep.subr.bf16.mxu1 %v4582_v3  ;;  %v783_v50 = vld [vmem:[%s4565_s1 + $0xe8] sm:$0xff] }
  0x3e   : > { %2477 = vmatprep.subr.bf16.mxu0 %v4582_v3  ;;  %v2436_v59 = vpack.c.bf16 %v783_v50, %v782_v48  ;;  %v2439_v48 = vpack.c.bf16 %v785_v14, %v784_v10  ;;  %v4571_v50 = vmax.f32 %v3378_v26, 0.0 }
  0x40   : > { %2431 = vmatpush1.bf16.msra.mxu1 %v2430_v60  ;;  %v4570_v60 = vmax.f32 %v3353_v57, 0.0  ;;  %455 = vst [vmem:[#allocation2 + $0x121] sm:$0xff] %v4571_v50  ;;  %v529_v50 = vld [vmem:[#allocation2 + $0x2] sm:$0xff] }
  0x41   : > { %2479 = vmatpush1.bf16.msra.mxu0 %v2478_v9  ;;  %2432 = vmatprep.subr.bf16.mxu1 %v4582_v3  ;;  %v2484_v9 = vpack.c.bf16 %v815_v56, %v814_v52  ;;  %v261_v56 = vld [vmem:[%s3032_s25 + $0xc8] sm:$0xff] }
  0x42   : > { %2480 = vmatprep.subr.bf16.mxu0 %v4582_v3  ;;  %454 = vst [vmem:[#allocation2 + $0x111] sm:$0xff] %v4570_v60  ;;  %v300_v60 = vmul.f32 %v3052_v44, %v261_v56 }
  0x44   : > { %2434 = vmatpush1.bf16.msra.mxu1 %v2433_v32  ;;  %v298_v32 = vmul.f32 %v3052_v44, %v259_v18  ;;  %v262_v18 = vld [vmem:[%s3032_s25 + $0xd0] sm:$0xff] }
  0x45   : > { %2482 = vmatpush1.bf16.msra.mxu0 %v2481_v34  ;;  %2435 = vmatprep.subr.bf16.mxu1 %v4582_v3  ;;  %v299_v34 = vmul.f32 %v3052_v44, %v260_v33  ;;  %v301_v14 = vmul.f32 %v3052_v44, %v262_v18  ;;  %v339_v33 = vadd.f32 %v3057_v45, %v300_v60  ;;  %v264_v18 = vld [vmem:[%s3032_s25 + $0xe0] sm:$0xff] }
  0x46   : > { %2483 = vmatprep.subr.bf16.mxu0 %v4582_v3  ;;  %v337_v52 = vadd.f32 %v3057_v45, %v298_v32  ;;  %v303_v60 = vmul.f32 %v3052_v44, %v264_v18  ;;  %v853_v18 = vld [vmem:[%s4565_s1 + $0x318] sm:$0xff] }
  0x47   : > { %v338_v7 = vadd.f32 %v3057_v45, %v299_v34  ;;  %v263_v34 = vld [vmem:[%s3032_s25 + $0xd8] sm:$0xff] }
  0x48   : > { %2437 = vmatpush1.bf16.msra.mxu1 %v2436_v59  ;;  %v818_v59 = vld [vmem:[%s4565_s1 + $0x200] sm:$0xff]  ;;  %v3399_v10 = vmax.f32 %v337_v52, 0.0  ;;  %v340_v52 = vadd.f32 %v3057_v45, %v301_v14  ;;  %v302_v56 = vmul.f32 %v3052_v44, %v263_v34  ;;  %v852_v34 = vld [vmem:[%s4565_s1 + $0x310] sm:$0xff]  ;;  %v342_v53 = vadd.f32 %v3057_v45, %v303_v60 }
  0x49   : > { %2485 = vmatpush1.bf16.msra.mxu0 %v2484_v9  ;;  %2438 = vmatprep.subr.bf16.mxu1 %v4582_v3  ;;  %v819_v9 = vld [vmem:[%s4565_s1 + $0x208] sm:$0xff]  ;;  %v3408_v32 = vmax.f32 %v338_v7, 0.0  ;;  %v3418_v7 = vmax.f32 %v339_v33, 0.0  ;;  %v822_v60 = vld [vmem:[%s4565_s1 + $0x220] sm:$0xff] }
  0x4a   : > { %2486 = vmatprep.subr.bf16.mxu0 %v4582_v3  ;;  %456 = vst [vmem:[#allocation2 + $0x129] sm:$0xff] %v3399_v10  ;;  %v2490_v51 = vpack.c.bf16 %v819_v9, %v818_v59  ;;  %v821_v59 = vld [vmem:[%s4565_s1 + $0x218] sm:$0xff]  ;;  %v3430_v9 = vpack.c.bf16 %v851_v20, %v850_v19  ;;  %v3432_v14 = vmax.f32 %v340_v52, 0.0  ;;  %v341_v33 = vadd.f32 %v3057_v45, %v302_v56  ;;  %v265_v19 = vld [vmem:[%s3032_s25 + $0xe8] sm:$0xff]  ;;  %v266_v56 = vld [vmem:[%s3032_s25 + $0xf0] sm:$0xff] }
  0x4b   : > { %457 = vst [vmem:[#allocation2 + $0x139] sm:$0xff] %v3408_v32  ;;  %458 = vst [vmem:[#allocation2 + $0x141] sm:$0xff] %v3418_v7  ;;  %v304_v52 = vmul.f32 %v3052_v44, %v265_v19  ;;  %v3454_v41 = vmax.f32 %v342_v53, 0.0  ;;  %v267_v53 = vld [vmem:[%s3032_s25 + $0xf8] sm:$0xff]  ;;  %v855_v19 = vld [vmem:[%s4565_s1 + $0x328] sm:$0xff] }
  0x4c   : > { %2440 = vmatpush1.bf16.msra.mxu1 %v2439_v48  ;;  %v3422_v48 = vld [vmem:[#allocation2 + $0x20] sm:$0xff]  ;;  %459 = vst [vmem:[#allocation2 + $0x151] sm:$0xff] %v3432_v14  ;;  %v3446_v20 = vmax.f32 %v341_v33, 0.0  ;;  %v3464_v33 = vpack.c.bf16 %v853_v18, %v852_v34  ;;  %v306_v18 = vmul.f32 %v3052_v44, %v267_v53  ;;  %v827_v53 = vld [vmem:[%s4565_s1 + $0x248] sm:$0xff] }
  0x4d   : > { %2488 = vmatpush1.bf16.msra.mxu0 %v2487_v58  ;;  %2617 = vmatprep.subr.bf16.mxu1 %v4582_v3  ;;  %v820_v58 = vld [vmem:[%s4565_s1 + $0x210] sm:$0xff]  ;;  %461 = vst [vmem:[#allocation2 + $0x169] sm:$0xff] %v3454_v41 }
  0x4e   : > { %2489 = vmatprep.subr.bf16.mxu0 %v4582_v3  ;;  %v2493_v42 = vpack.c.bf16 %v821_v59, %v820_v58  ;;  %460 = vst [vmem:[#allocation2 + $0x159] sm:$0xff] %v3446_v20  ;;  %v343_v58 = vadd.f32 %v3057_v45, %v304_v52  ;;  %v854_v59 = vld [vmem:[%s4565_s1 + $0x320] sm:$0xff]  ;;  %v3489_v29 = vadd.f32 %v3057_v45, %v306_v18 }
  0x4f   : > { %963 = vmatmul.mubr.f32.vlgmr.msra.gmra.mrb[0].mxu1 %v2827_v8  ;;  %v531_v52 = vld [vmem:[#allocation2 + $0x1a] sm:$0xff] }
  0x50   : > { %1188 = vmatmul.mubr.f32.vlgmr.msra.gmra.mrb[0].mxu0 %v529_v50  ;;  %967 = vmatprep.mubr.f32.mxu1 %v498_v24  ;;  %v305_v24 = vmul.f32 %v3052_v44, %v266_v56  ;;  %v3457_v50 = vld [vmem:[#allocation2 + $0x30] sm:$0xff]  ;;  %4615 = vst [vmem:[#allocation5_spill] sm:$0xff] %v3489_v29 }
  0x51   : > { %2491 = vmatpush1.bf16.msra.mxu0 %v2490_v51  ;;  %1192 = vmatprep.mubr.f32.mxu0 %v3422_v48  ;;  %v823_v51 = vld [vmem:[%s4565_s1 + $0x228] sm:$0xff]  ;;  %v824_v44 = vld [vmem:[%s4565_s1 + $0x230] sm:$0xff] }
  0x52   : > { %2492 = vmatprep.subr.bf16.mxu0 %v4582_v3  ;;  %2633 = vmatpush1.bf16.msra.mxu1 %v3430_v9  ;;  %v3479_v34 = vadd.f32 %v3057_v45, %v305_v24  ;;  %v2496_v56 = vpack.c.bf16 %v823_v51, %v822_v60  ;;  %v564_v24 = vld [vmem:[#allocation2 + $0x38] sm:$0xff]  ;;  %v856_v45 = vld [vmem:[%s4565_s1 + $0x330] sm:$0xff]  ;;  %v2499_v60 = vpack.c.bf16 %v825_v55, %v824_v44  ;;  %v565_v51 = vld [vmem:[#allocation2 + $0x48] sm:$0xff] }
  0x53   : > { %968 = vmatmul.mubr.f32.gmra.mrb[2].mxu1 %v2827_v8  ;;  %2618 = vmatprep.subr.bf16.mxu1 %v4582_v3  ;;  %v3484_v8 = vmax.f32 %v343_v58, 0.0  ;;  %v826_v58 = vld [vmem:[%s4565_s1 + $0x240] sm:$0xff] }
  0x54   : > { %4613 = vst [vmem:[#allocation3_spill] sm:$0xff] %v3479_v34  ;;  %1193 = vmatmul.mubr.f32.gmra.mrb[2].mxu0 %v530_v49  ;;  %972 = vmatprep.mubr.f32.mxu1 %v346_v1  ;;  %v4581_v37 = vmax.f32 %v3479_v34, 0.0  ;;  %v3499_v1 = vpack.c.bf16 %v855_v19, %v854_v59  ;;  %v4580_v49 = vmax.f32 %v3489_v29, 0.0  ;;  %v859_v59 = vld [vmem:[%s4565_s1 + $0x348] sm:$0xff]  ;;  %v533_v19 = vld [vmem:[#allocation2 + $0x32] sm:$0xff]  ;;  %v2502_v18 = vpack.c.bf16 %v827_v53, %v826_v58  ;;  %v534_v55 = vld [vmem:[#allocation2 + $0x3a] sm:$0xff] }
  0x55   : > { %4614 = vst [vmem:[#allocation4_spill] sm:$0xff] %v3484_v8  ;;  %1197 = vmatprep.mubr.f32.mxu0 %v3457_v50  ;;  %2494 = vmatpush1.bf16.msra.mxu0 %v2493_v42  ;;  %462 = vst [vmem:[#allocation2 + $0x171] sm:$0xff] %v3484_v8  ;;  %v857_v42 = vld [vmem:[%s4565_s1 + $0x338] sm:$0xff]  ;;  %v3576_v58 = vld [vmem:[#allocation2 + $0x4a] sm:$0xff] }
  0x56   : > { %2495 = vmatprep.subr.bf16.mxu0 %v4582_v3  ;;  %2634 = vmatpush1.bf16.msra.mxu1 %v3464_v33  ;;  %463 = vst [vmem:[#allocation2 + $0x181] sm:$0xff] %v4581_v37  ;;  %464 = vst [vmem:[#allocation2 + $0x189] sm:$0xff] %v4580_v49  ;;  %v3525_v2 = vpack.c.bf16 %v857_v42, %v856_v45  ;;  %v567_v42 = vld [vmem:[#allocation2 + $0x60] sm:$0xff]  ;;  %v3801_v49 = vld [vmem:[#allocation2 + $0xd8] sm:$0xff]  ;;  %v4617_v37 = vmax.f32 %v3244_v23, 0.0  ;;  %v4618_v23 = vmax.f32 %v3258_v30, 0.0 }
  0x57   : > { %973 = vmatmul.mubr.f32.gmra.mrb[4].mxu1 %v3212_v61  ;;  %2619 = vmatprep.subr.bf16.mxu1 %v4582_v3  ;;  %v532_v61 = vld [vmem:[#allocation2 + $0x22] sm:$0xff]  ;;  %v4620_v30 = vmax.f32 %v3273_v38, 0.0  ;;  %v4624_v38 = vmax.f32 %v3311_v5, 0.0  ;;  %v4628_v5 = vmax.f32 %v3353_v57, 0.0  ;;  %v3883_v34 = vld [vmem:[#allocation2 + $0x138] sm:$0xff]  ;;  %v3898_v57 = vld [vmem:[#allocation2 + $0x12a] sm:$0xff] }
  0x58   : > { %1198 = vmatmul.mubr.f32.gmra.mrb[4].mxu0 %v531_v52  ;;  %977 = vmatprep.mubr.f32.mxu1 %v347_v15  ;;  %v858_v15 = vld [vmem:[%s4565_s1 + $0x340] sm:$0xff]  ;;  %v566_v52 = vld [vmem:[#allocation2 + $0x50] sm:$0xff]  ;;  %v3874_v29 = vld [vmem:[#allocation2 + $0x128] sm:$0xff]  ;;  %4632 = vst [vmem:[#allocation12_spill] sm:$0xff] %v3898_v57 }
  0x59   : > { %1202 = vmatprep.mubr.f32.mxu0 %v564_v24  ;;  %2497 = vmatpush1.bf16.msra.mxu0 %v2496_v56  ;;  %v829_v56 = vld [vmem:[%s4565_s1 + $0x258] sm:$0xff]  ;;  %v3545_v44 = vpack.c.bf16 %v859_v59, %v858_v15  ;;  %v832_v15 = vld [vmem:[%s4565_s1 + $0x270] sm:$0xff] }
  0x5a   : > { %2498 = vmatprep.subr.bf16.mxu0 %v4582_v3  ;;  %2635 = vmatpush1.bf16.msra.mxu1 %v3499_v1  ;;  %v833_v59 = vld [vmem:[%s4565_s1 + $0x278] sm:$0xff] }
  0x5b   : > { %978 = vmatmul.mubr.f32.gmra.mrb[6].mxu1 %v3422_v48  ;;  %2620 = vmatprep.subr.bf16.mxu1 %v4582_v3  ;;  %v828_v48 = vld [vmem:[%s4565_s1 + $0x250] sm:$0xff] }
  0x5c   : > { %1203 = vmatmul.mubr.f32.gmra.mrb[6].mxu0 %v532_v61  ;;  %982 = vmatprep.mubr.f32.mxu1 %v348_v16  ;;  %v861_v16 = vld [vmem:[%s4565_s1 + $0x358] sm:$0xff]  ;;  %v2505_v45 = vpack.c.bf16 %v829_v56, %v828_v48  ;;  %v831_v61 = vld [vmem:[%s4565_s1 + $0x268] sm:$0xff]  ;;  %v834_v56 = vld [vmem:[%s4565_s1 + $0x280] sm:$0xff] }
  0x5d   : > { %1207 = vmatprep.mubr.f32.mxu0 %v565_v51  ;;  %2500 = vmatpush1.bf16.msra.mxu0 %v2499_v60  ;;  %v3565_v60 = vpack.c.bf16 %v861_v16, %v860_v4  ;;  %v569_v48 = vld [vmem:[#allocation2 + $0x78] sm:$0xff]  ;;  %v835_v4 = vld [vmem:[%s4565_s1 + $0x288] sm:$0xff] }
  0x5e   : > { %2501 = vmatprep.subr.bf16.mxu0 %v4582_v3  ;;  %2636 = vmatpush1.bf16.msra.mxu1 %v3525_v2  ;;  %v867_v16 = vld [vmem:[%s4565_s1 + $0x388] sm:$0xff] }
  0x5f   : > { %983 = vmatmul.mubr.f32.gmra.mrb[8].mxu1 %v3457_v50  ;;  %2621 = vmatprep.subr.bf16.mxu1 %v4582_v3  ;;  %v830_v50 = vld [vmem:[%s4565_s1 + $0x260] sm:$0xff] }
  0x60   : > { %1208 = vmatmul.mubr.f32.gmra.mrb[8].mxu0 %v533_v19  ;;  %987 = vmatprep.mubr.f32.mxu1 %v349_v21  ;;  %v863_v21 = vld [vmem:[%s4565_s1 + $0x368] sm:$0xff]  ;;  %v2508_v53 = vpack.c.bf16 %v831_v61, %v830_v50  ;;  %v865_v19 = vld [vmem:[%s4565_s1 + $0x378] sm:$0xff]  ;;  %v836_v50 = vld [vmem:[%s4565_s1 + $0x290] sm:$0xff] }
  0x61   : > { %1212 = vmatprep.mubr.f32.mxu0 %v566_v52  ;;  %2503 = vmatpush1.bf16.msra.mxu0 %v2502_v18  ;;  %v3586_v17 = vpack.c.bf16 %v863_v21, %v862_v11  ;;  %v3598_v18 = vld [vmem:[#allocation2 + $0x52] sm:$0xff]  ;;  %v3642_v21 = vld [vmem:[#allocation2 + $0x6a] sm:$0xff] }
  0x62   : > { %2504 = vmatprep.subr.bf16.mxu0 %v4582_v3  ;;  %2637 = vmatpush1.bf16.msra.mxu1 %v3545_v44  ;;  %v837_v61 = vld [vmem:[%s4565_s1 + $0x298] sm:$0xff] }
  0x63   : > { %988 = vmatmul.mubr.f32.gmra.mrb[10].mxu1 %v564_v24  ;;  %2622 = vmatprep.subr.bf16.mxu1 %v4582_v3  ;;  %v568_v24 = vld [vmem:[#allocation2 + $0x68] sm:$0xff]  ;;  %v869_v11 = vld [vmem:[%s4565_s1 + $0x398] sm:$0xff] }
  0x64   : > { %1213 = vmatmul.mubr.f32.gmra.mrb[10].mxu0 %v534_v55  ;;  %992 = vmatprep.mubr.f32.mxu1 %v350_v27  ;;  %v864_v27 = vld [vmem:[%s4565_s1 + $0x370] sm:$0xff]  ;;  %v3620_v55 = vld [vmem:[#allocation2 + $0x62] sm:$0xff] }
  0x65   : > { %1217 = vmatprep.mubr.f32.mxu0 %v567_v42  ;;  %2506 = vmatpush1.bf16.msra.mxu0 %v2505_v45  ;;  %v3608_v22 = vpack.c.bf16 %v865_v19, %v864_v27  ;;  %v570_v45 = vld [vmem:[#allocation2 + $0x80] sm:$0xff]  ;;  %v871_v27 = vld [vmem:[%s4565_s1 + $0x3a8] sm:$0xff] }
  0x66   : > { %2507 = vmatprep.subr.bf16.mxu0 %v4582_v3  ;;  %2638 = vmatpush1.bf16.msra.mxu1 %v3565_v60  ;;  %v3667_v19 = vld [vmem:[#allocation2 + $0x7a] sm:$0xff] }
  0x67   : > { %993 = vmatmul.mubr.f32.gmra.mrb[12].mxu1 %v565_v51  ;;  %2623 = vmatprep.subr.bf16.mxu1 %v4582_v3  ;;  %v2511_v51 = vpack.c.bf16 %v833_v59, %v832_v15  ;;  %v838_v15 = vld [vmem:[%s4565_s1 + $0x2a0] sm:$0xff]  ;;  %v839_v59 = vld [vmem:[%s4565_s1 + $0x2a8] sm:$0xff] }
  0x68   : > { %1218 = vmatmul.mubr.f32.gmra.mrb[12].mxu0 %v3576_v58  ;;  %997 = vmatprep.mubr.f32.mxu1 %v351_v35  ;;  %v866_v35 = vld [vmem:[%s4565_s1 + $0x380] sm:$0xff] }
  0x69   : > { %1222 = vmatprep.mubr.f32.mxu0 %v568_v24  ;;  %2509 = vmatpush1.bf16.msra.mxu0 %v2508_v53  ;;  %v3630_v28 = vpack.c.bf16 %v867_v16, %v866_v35  ;;  %v3644_v53 = vld [vmem:[#allocation2 + $0x90] sm:$0xff]  ;;  %v873_v35 = vld [vmem:[%s4565_s1 + $0x3b8] sm:$0xff]  ;;  %v3692_v16 = vld [vmem:[#allocation2 + $0x82] sm:$0xff] }
  0x6a   : > { %2510 = vmatprep.subr.bf16.mxu0 %v4582_v3  ;;  %2639 = vmatpush1.bf16.msra.mxu1 %v3586_v17 }
  0x6b   : > { %998 = vmatmul.mubr.f32.gmra.mrb[14].mxu1 %v566_v52  ;;  %2624 = vmatprep.subr.bf16.mxu1 %v4582_v3  ;;  %v2514_v52 = vpack.c.bf16 %v835_v4, %v834_v56  ;;  %v840_v56 = vld [vmem:[%s4565_s1 + $0x2b0] sm:$0xff]  ;;  %v841_v4 = vld [vmem:[%s4565_s1 + $0x2b8] sm:$0xff] }
  0x6c   : > { %1223 = vmatmul.mubr.f32.gmra.mrb[14].mxu0 %v3598_v18  ;;  %1002 = vmatprep.mubr.f32.mxu1 %v352_v39  ;;  %v868_v39 = vld [vmem:[%s4565_s1 + $0x390] sm:$0xff] }
  0x6d   : > { %1227 = vmatprep.mubr.f32.mxu0 %v569_v48  ;;  %2512 = vmatpush1.bf16.msra.mxu0 %v2511_v51  ;;  %v3654_v36 = vpack.c.bf16 %v869_v11, %v868_v39  ;;  %v3669_v51 = vld [vmem:[#allocation2 + $0x98] sm:$0xff]  ;;  %v875_v39 = vld [vmem:[%s4565_s1 + $0x3c8] sm:$0xff] }
  0x6e   : > { %2513 = vmatprep.subr.bf16.mxu0 %v4582_v3  ;;  %2640 = vmatpush1.bf16.msra.mxu1 %v3608_v22  ;;  %v3716_v11 = vld [vmem:[#allocation2 + $0x92] sm:$0xff] }
  0x6f   : > { %1003 = vmatmul.mubr.f32.gmra.mrb[16].mxu1 %v567_v42  ;;  %2625 = vmatprep.subr.bf16.mxu1 %v4582_v3  ;;  %v2517_v42 = vpack.c.bf16 %v837_v61, %v836_v50  ;;  %v842_v50 = vld [vmem:[%s4565_s1 + $0x2c0] sm:$0xff]  ;;  %v843_v61 = vld [vmem:[%s4565_s1 + $0x2c8] sm:$0xff] }
  0x70   : > { %1228 = vmatmul.mubr.f32.gmra.mrb[16].mxu0 %v3620_v55  ;;  %1007 = vmatprep.mubr.f32.mxu1 %v353_v46  ;;  %v870_v46 = vld [vmem:[%s4565_s1 + $0x3a0] sm:$0xff] }
  0x71   : > { %1232 = vmatprep.mubr.f32.mxu0 %v570_v45  ;;  %2515 = vmatpush1.bf16.msra.mxu0 %v2514_v52  ;;  %v3679_v40 = vpack.c.bf16 %v871_v27, %v870_v46  ;;  %v3694_v52 = vld [vmem:[#allocation2 + $0xa8] sm:$0xff]  ;;  %v876_v27 = vld [vmem:[%s4565_s1 + $0x3d0] sm:$0xff] }
  0x72   : > { %2516 = vmatprep.subr.bf16.mxu0 %v4582_v3  ;;  %2641 = vmatpush1.bf16.msra.mxu1 %v3630_v28 }
  0x73   : > { %1008 = vmatmul.mubr.f32.gmra.mrb[18].mxu1 %v568_v24  ;;  %2626 = vmatprep.subr.bf16.mxu1 %v4582_v3  ;;  %v2520_v24 = vpack.c.bf16 %v839_v59, %v838_v15  ;;  %v844_v15 = vld [vmem:[%s4565_s1 + $0x2d0] sm:$0xff]  ;;  %v845_v59 = vld [vmem:[%s4565_s1 + $0x2d8] sm:$0xff] }
  0x74   : > { %1233 = vmatmul.mubr.f32.gmra.mrb[18].mxu0 %v3642_v21  ;;  %1012 = vmatprep.mubr.f32.mxu1 %v354_v54  ;;  %v872_v54 = vld [vmem:[%s4565_s1 + $0x3b0] sm:$0xff] }
  0x75   : > { %1237 = vmatprep.mubr.f32.mxu0 %v3644_v53  ;;  %2518 = vmatpush1.bf16.msra.mxu0 %v2517_v42  ;;  %v3704_v47 = vpack.c.bf16 %v873_v35, %v872_v54  ;;  %v3718_v42 = vld [vmem:[#allocation2 + $0xb0] sm:$0xff]  ;;  %v3743_v54 = vld [vmem:[#allocation2 + $0xc0] sm:$0xff] }
  0x76   : > { %2519 = vmatprep.subr.bf16.mxu0 %v4582_v3  ;;  %2642 = vmatpush1.bf16.msra.mxu1 %v3654_v36  ;;  %v846_v35 = vld [vmem:[%s4565_s1 + $0x2e0] sm:$0xff] }
  0x77   : > { %1013 = vmatmul.mubr.f32.gmra.mrb[20].mxu1 %v569_v48  ;;  %2627 = vmatprep.subr.bf16.mxu1 %v4582_v3  ;;  %v2523_v48 = vpack.c.bf16 %v841_v4, %v840_v56  ;;  %v3741_v56 = vld [vmem:[#allocation2 + $0x9a] sm:$0xff]  ;;  %v2529_v4 = vpack.c.bf16 %v845_v59, %v844_v15  ;;  %v3769_v15 = vld [vmem:[#allocation2 + $0xc8] sm:$0xff]  ;;  %v848_v59 = vld [vmem:[%s4565_s1 + $0x2f0] sm:$0xff] }
  0x78   : > { %1238 = vmatmul.mubr.f32.gmra.mrb[20].mxu0 %v3667_v19  ;;  %1017 = vmatprep.mubr.f32.mxu1 %v355_v62  ;;  %v874_v62 = vld [vmem:[%s4565_s1 + $0x3c0] sm:$0xff] }
  0x79   : > { %1242 = vmatprep.mubr.f32.mxu0 %v3669_v51  ;;  %2521 = vmatpush1.bf16.msra.mxu0 %v2520_v24  ;;  %v3728_v46 = vpack.c.bf16 %v875_v39, %v874_v62  ;;  %v877_v24 = vld [vmem:[%s4565_s1 + $0x3d8] sm:$0xff]  ;;  %v879_v62 = vld [vmem:[%s4565_s1 + $0x3e8] sm:$0xff] }
  0x7a   : > { %2522 = vmatprep.subr.bf16.mxu0 %v4582_v3  ;;  %2643 = vmatpush1.bf16.msra.mxu1 %v3679_v40  ;;  %v3767_v39 = vld [vmem:[#allocation2 + $0xaa] sm:$0xff] }
  0x7b   : > { %1018 = vmatmul.mubr.f32.gmra.mrb[22].mxu1 %v570_v45  ;;  %2628 = vmatprep.subr.bf16.mxu1 %v4582_v3  ;;  %v2526_v45 = vpack.c.bf16 %v843_v61, %v842_v50  ;;  %v3753_v50 = vpack.c.bf16 %v877_v24, %v876_v27  ;;  %v878_v61 = vld [vmem:[%s4565_s1 + $0x3e0] sm:$0xff]  ;;  %v880_v27 = vld [vmem:[%s4565_s1 + $0x3f0] sm:$0xff]  ;;  %v881_v24 = vld [vmem:[%s4565_s1 + $0x3f8] sm:$0xff] }
  0x7c   : > { %1243 = vmatmul.mubr.f32.gmra.mrb[22].mxu0 %v3692_v16  ;;  %1022 = vmatprep.mubr.f32.mxu1 %v3217_v63 }
  0x7d   : > { %1247 = vmatprep.mubr.f32.mxu0 %v3694_v52  ;;  %2524 = vmatpush1.bf16.msra.mxu0 %v2523_v48  ;;  %v847_v48 = vld [vmem:[%s4565_s1 + $0x2e8] sm:$0xff] }
  0x7e   : > { %2525 = vmatprep.subr.bf16.mxu0 %v4582_v3  ;;  %2644 = vmatpush1.bf16.msra.mxu1 %v3704_v47 }
  0x7f   : > { %1023 = vmatmul.mubr.f32.gmra.mrb[24].mxu1 %v3644_v53  ;;  %2629 = vmatprep.subr.bf16.mxu1 %v4582_v3 }
  0x80   : > { %1248 = vmatmul.mubr.f32.gmra.mrb[24].mxu0 %v3716_v11  ;;  %1027 = vmatprep.mubr.f32.mxu1 %v3227_v6 }
  0x81   : > { %1252 = vmatprep.mubr.f32.mxu0 %v3718_v42  ;;  %2527 = vmatpush1.bf16.msra.mxu0 %v2526_v45  ;;  %v2532_v45 = vpack.c.bf16 %v847_v48, %v846_v35  ;;  %v882_v35 = vld [vmem:[%s4565_s1 + $0x400] sm:$0xff]  ;;  %v883_v48 = vld [vmem:[%s4565_s1 + $0x408] sm:$0xff] }
  0x82   : > { %2528 = vmatprep.subr.bf16.mxu0 %v4582_v3  ;;  %2645 = vmatpush1.bf16.msra.mxu1 %v3728_v46 }
  0x83   : > { %1028 = vmatmul.mubr.f32.gmra.mrb[26].mxu1 %v3669_v51  ;;  %2630 = vmatprep.subr.bf16.mxu1 %v4582_v3 }
  0x84   : > { %1253 = vmatmul.mubr.f32.gmra.mrb[26].mxu0 %v3741_v56  ;;  %1032 = vmatprep.mubr.f32.mxu1 %v358_v12  ;;  %v3779_v12 = vpack.c.bf16 %v879_v62, %v878_v61  ;;  %v3799_v61 = vld [vmem:[#allocation2 + $0xb2] sm:$0xff]  ;;  %v2535_v62 = vpack.c.bf16 %v849_v0, %v848_v59  ;;  %v3817_v59 = vld [vmem:[#allocation2 + $0xe0] sm:$0xff] }
  0x85   : > { %1257 = vmatprep.mubr.f32.mxu0 %v3743_v54  ;;  %2530 = vmatpush1.bf16.msra.mxu0 %v2529_v4  ;;  %v4616_v4 = vmax.f32 %v3237_v13, 0.0  ;;  %v3805_v13 = vpack.c.bf16 %v881_v24, %v880_v27  ;;  %v3829_v0 = vld [vmem:[#allocation2 + $0xf0] sm:$0xff]  ;;  %v4619_v27 = vmax.f32 %v3261_v31, 0.0  ;;  %v3836_v24 = vld [vmem:[#allocation2 + $0xda] sm:$0xff]  ;;  %v4622_v31 = vmax.f32 %v3280_v43, 0.0 }
  0x86   : > { %2531 = vmatprep.subr.bf16.mxu0 %v4582_v3  ;;  %2646 = vmatpush1.bf16.msra.mxu1 %v3753_v50  ;;  %v4626_v43 = vmax.f32 %v3331_v25, 0.0  ;;  %v4630_v25 = vmax.f32 %v3378_v26, 0.0  ;;  %v3906_v26 = vld [vmem:[#allocation2 + $0x13a] sm:$0xff] }
  0x87   : > { %1033 = vmatmul.mubr.f32.gmra.mrb[28].mxu1 %v3694_v52  ;;  %2631 = vmatprep.subr.bf16.mxu1 %v4582_v3  ;;  %4633 = vst [vmem:[#allocation13_spill] sm:$0xff] %v3906_v26 }
  0x88   : > { %1258 = vmatmul.mubr.f32.gmra.mrb[28].mxu0 %v3767_v39  ;;  %1037 = vmatprep.mubr.f32.mxu1 %v4616_v4  ;;  %v3809_v4 = vpack.c.bf16 %v883_v48, %v882_v35  ;;  %v3838_v35 = vld [vmem:[#allocation2 + $0xf8] sm:$0xff]  ;;  %v3845_v48 = vld [vmem:[#allocation2 + $0xe2] sm:$0xff] }
  0x89   : > { %1262 = vmatprep.mubr.f32.mxu0 %v3769_v15  ;;  %2533 = vmatpush1.bf16.msra.mxu0 %v2532_v45  ;;  %v3815_v45 = vld [vmem:[#allocation2 + $0xc2] sm:$0xff]  ;;  %4621 = vst [vmem:[#allocation6_spill] sm:$0xff] %v3845_v48 }
  0x8a   : > { %2534 = vmatprep.subr.bf16.mxu0 %v4582_v3  ;;  %2647 = vmatpush1.bf16.msra.mxu1 %v3779_v12 }
  0x8b   : > { %1038 = vmatmul.mubr.f32.gmra.mrb[30].mxu1 %v3718_v42  ;;  %2632 = vmatprep.subr.bf16.mxu1 %v4582_v3 }
  0x8c   : > { %1263 = vmatmul.mubr.f32.gmra.mrb[30].mxu0 %v3799_v61  ;;  %1042 = vmatprep.mubr.f32.mxu1 %v4617_v37  ;;  %v3827_v37 = vld [vmem:[#allocation2 + $0xca] sm:$0xff] }
  0x8d   : > { %1267 = vmatprep.mubr.f32.mxu0 %v3801_v49  ;;  %2536 = vmatpush1.bf16.msra.mxu0 %v2535_v62  ;;  %v3847_v62 = vld [vmem:[#allocation2 + $0x108] sm:$0xff] }
  0x8e   : > { %2648 = vmatpush1.bf16.msra.mxu1 %v3805_v13  ;;  %2537 = vmatprep.subr.bf16.mxu0 %v4582_v3  ;;  %v3865_v3 = vld [vmem:[#allocation2 + $0x120] sm:$0xff] }
  0x8f   : > { %1043 = vmatmul.mubr.f32.gmra.mrb[32].mxu1 %v3743_v54  ;;  %2586 = vmatprep.subr.bf16.mxu1 %v3809_v4 }
  0x90   : > { %1268 = vmatmul.mubr.f32.gmra.mrb[32].mxu0 %v3815_v45  ;;  %1047 = vmatprep.mubr.f32.mxu1 %v4618_v23  ;;  %v3854_v23 = vld [vmem:[#allocation2 + $0xf2] sm:$0xff] }
  0x91   : > { %1272 = vmatprep.mubr.f32.mxu0 %v3817_v59  ;;  %4623 = vst [vmem:[#allocation7_spill] sm:$0xff] %v3854_v23 }
  0x93   : > { %1048 = vmatmul.mubr.f32.gmra.mrb[34].mxu1 %v3769_v15 }
  0x94   : > { %1273 = vmatmul.mubr.f32.gmra.mrb[34].mxu0 %v3827_v37  ;;  %1052 = vmatprep.mubr.f32.mxu1 %v4619_v27  ;;  %v3856_v27 = vld [vmem:[#allocation2 + $0x110] sm:$0xff] }
  0x95   : > { %1277 = vmatprep.mubr.f32.mxu0 %v3829_v0 }
  0x97   : > { %1053 = vmatmul.mubr.f32.gmra.mrb[36].mxu1 %v3801_v49 }
  0x98   : > { %1278 = vmatmul.mubr.f32.gmra.mrb[36].mxu0 %v3836_v24  ;;  %1057 = vmatprep.mubr.f32.mxu1 %v4620_v30  ;;  %v3863_v30 = vld [vmem:[#allocation2 + $0xfa] sm:$0xff] }
  0x99   : > { %1282 = vmatprep.mubr.f32.mxu0 %v3838_v35  ;;  %4625 = vst [vmem:[#allocation8_spill] sm:$0xff] %v3863_v30 }
  0x9b   : > { %1058 = vmatmul.mubr.f32.gmra.mrb[38].mxu1 %v3817_v59 }
  0x9c   : > { %1283 = vmatmul.mubr.f32.gmra.mrb[38].mxu0 %v3845_v48  ;;  %1062 = vmatprep.mubr.f32.mxu1 %v4622_v31  ;;  %v3872_v31 = vld [vmem:[#allocation2 + $0x10a] sm:$0xff] }
  0x9d   : > { %1287 = vmatprep.mubr.f32.mxu0 %v3847_v62  ;;  %4627 = vst [vmem:[#allocation9_spill] sm:$0xff] %v3872_v31  ;;  %v3940_v48 = vld [vmem:[#allocation2 + $0x188] sm:$0xff] }
  0x9e   : > { %4642 = vst [vmem:[#allocation22_spill] sm:$0xff] %v3940_v48 }
  0x9f   : > { %1063 = vmatmul.mubr.f32.gmra.mrb[40].mxu1 %v3829_v0 }
  0xa0   : > { %1288 = vmatmul.mubr.f32.gmra.mrb[40].mxu0 %v3854_v23  ;;  %1067 = vmatprep.mubr.f32.mxu1 %v4624_v38  ;;  %v3881_v38 = vld [vmem:[#allocation2 + $0x112] sm:$0xff]  ;;  %v3932_v23 = vld [vmem:[#allocation2 + $0x180] sm:$0xff] }
  0xa1   : > { %1292 = vmatprep.mubr.f32.mxu0 %v3856_v27  ;;  %4629 = vst [vmem:[#allocation10_spill] sm:$0xff] %v3881_v38  ;;  %4640 = vst [vmem:[#allocation20_spill] sm:$0xff] %v3932_v23 }
  0xa3   : > { %1068 = vmatmul.mubr.f32.gmra.mrb[42].mxu1 %v3838_v35 }
  0xa4   : > { %1293 = vmatmul.mubr.f32.gmra.mrb[42].mxu0 %v3863_v30  ;;  %1072 = vmatprep.mubr.f32.mxu1 %v4626_v43  ;;  %v3890_v43 = vld [vmem:[#allocation2 + $0x122] sm:$0xff]  ;;  %v3924_v30 = vld [vmem:[#allocation2 + $0x170] sm:$0xff] }
  0xa5   : > { %1297 = vmatprep.mubr.f32.mxu0 %v3865_v3  ;;  %4631 = vst [vmem:[#allocation11_spill] sm:$0xff] %v3890_v43  ;;  %4638 = vst [vmem:[#allocation18_spill] sm:$0xff] %v3924_v30 }
  0xa7   : > { %1073 = vmatmul.mubr.f32.gmra.mrb[44].mxu1 %v3847_v62 }
  0xa8   : > { %1298 = vmatmul.mubr.f32.gmra.mrb[44].mxu0 %v3872_v31  ;;  %1077 = vmatprep.mubr.f32.mxu1 %v4628_v5  ;;  %v3892_v31 = vld [vmem:[#allocation2 + $0x140] sm:$0xff]  ;;  %v3900_v5 = vld [vmem:[#allocation2 + $0x150] sm:$0xff] }
  0xa9   : > { %1302 = vmatprep.mubr.f32.mxu0 %v3874_v29 }
  0xab   : > { %1078 = vmatmul.mubr.f32.gmra.mrb[46].mxu1 %v3856_v27 }
  0xac   : > { %1303 = vmatmul.mubr.f32.gmra.mrb[46].mxu0 %v3881_v38  ;;  %1082 = vmatprep.mubr.f32.mxu1 %v4630_v25  ;;  %v3908_v25 = vld [vmem:[#allocation2 + $0x158] sm:$0xff]  ;;  %v3916_v38 = vld [vmem:[#allocation2 + $0x168] sm:$0xff] }
  0xad   : > { %1307 = vmatprep.mubr.f32.mxu0 %v3883_v34  ;;  %4634 = vst [vmem:[#allocation14_spill] sm:$0xff] %v3908_v25  ;;  %4636 = vst [vmem:[#allocation16_spill] sm:$0xff] %v3916_v38 }
  0xaf   : > { %1083 = vmatmul.mubr.f32.gmra.mrb[48].mxu1 %v3865_v3 }
  0xb0   : > { %1308 = vmatmul.mubr.f32.gmra.mrb[48].mxu0 %v3890_v43  ;;  %1087 = vmatprep.mubr.f32.mxu1 %v3399_v10  ;;  %v3914_v43 = vld [vmem:[#allocation2 + $0x142] sm:$0xff] }
  0xb1   : > { %1312 = vmatprep.mubr.f32.mxu0 %v3892_v31  ;;  %4635 = vst [vmem:[#allocation15_spill] sm:$0xff] %v3914_v43 }
  0xb3   : > { %1088 = vmatmul.mubr.f32.gmra.mrb[50].mxu1 %v3874_v29 }
  0xb4   : > { %1313 = vmatmul.mubr.f32.gmra.mrb[50].mxu0 %v3898_v57  ;;  %1092 = vmatprep.mubr.f32.mxu1 %v3408_v32  ;;  %v3922_v57 = vld [vmem:[#allocation2 + $0x152] sm:$0xff] }
  0xb5   : > { %1317 = vmatprep.mubr.f32.mxu0 %v3900_v5  ;;  %4637 = vst [vmem:[#allocation17_spill] sm:$0xff] %v3922_v57 }
  0xb7   : > { %1093 = vmatmul.mubr.f32.gmra.mrb[52].mxu1 %v3883_v34 }
  0xb8   : > { %1318 = vmatmul.mubr.f32.gmra.mrb[52].mxu0 %v3906_v26  ;;  %1097 = vmatprep.mubr.f32.mxu1 %v3418_v7  ;;  %v3930_v26 = vld [vmem:[#allocation2 + $0x15a] sm:$0xff] }
  0xb9   : > { %1322 = vmatprep.mubr.f32.mxu0 %v3908_v25  ;;  %4639 = vst [vmem:[#allocation19_spill] sm:$0xff] %v3930_v26 }
  0xbb   : > { %1098 = vmatmul.mubr.f32.gmra.mrb[54].mxu1 %v3892_v31 }
  0xbc   : > { %1323 = vmatmul.mubr.f32.gmra.mrb[54].mxu0 %v3914_v43  ;;  %1102 = vmatprep.mubr.f32.mxu1 %v3432_v14  ;;  %v3938_v43 = vld [vmem:[#allocation2 + $0x16a] sm:$0xff] }
  0xbd   : > { %1327 = vmatprep.mubr.f32.mxu0 %v3916_v38  ;;  %4641 = vst [vmem:[#allocation21_spill] sm:$0xff] %v3938_v43 }
  0xbf   : > { %1103 = vmatmul.mubr.f32.gmra.mrb[56].mxu1 %v3900_v5 }
  0xc0   : > { %1328 = vmatmul.mubr.f32.gmra.mrb[56].mxu0 %v3922_v57  ;;  %1107 = vmatprep.mubr.f32.mxu1 %v3446_v20  ;;  %v3946_v57 = vld [vmem:[#allocation2 + $0x172] sm:$0xff] }
  0xc1   : > { %1332 = vmatprep.mubr.f32.mxu0 %v3924_v30  ;;  %4643 = vst [vmem:[#allocation23_spill] sm:$0xff] %v3946_v57 }
  0xc3   : > { %1108 = vmatmul.mubr.f32.gmra.mrb[58].mxu1 %v3908_v25  ;;  %v625_v25 = vld [vmem:[#allocation2 + $0x1a] sm:$0xff] }
  0xc4   : > { %1333 = vmatmul.mubr.f32.gmra.mrb[58].mxu0 %v3930_v26  ;;  %1112 = vmatprep.mubr.f32.mxu1 %v3454_v41  ;;  %v884_v26 = vld [vmem:[%s4565_s1 + $0x410] sm:$0xff] }
  0xc5   : > { %1337 = vmatprep.mubr.f32.mxu0 %v3932_v23  ;;  %v593_v23 = vld [vmem:[#allocation2 + $0x19] sm:$0xff] }
  0xc7   : > { %1113 = vmatmul.mubr.f32.gmra.mrb[60].mxu1 %v3916_v38  ;;  %v4644_v38 = vmov 0.0|0.0  }
  0xc8   : > { %1338 = vmatmul.mubr.f32.gmra.mrb[60].mxu0 %v3938_v43  ;;  %1117 = vmatprep.mubr.f32.mxu1 %v3484_v8  ;;  %v885_v43 = vld [vmem:[%s4565_s1 + $0x418] sm:$0xff] }
  0xc9   : > { %1342 = vmatprep.mubr.f32.mxu0 %v3940_v48  ;;  %v626_v48 = vld [vmem:[#allocation2 + $0x22] sm:$0xff]  ;;  %v2589_v8 = vpack.c.bf16 %v885_v43, %v884_v26  ;;  %v3989_v43 = vld [vmem:[#allocation2 + $0xb1] sm:$0xff] }
  0xca   : > { %v4005_v26 = vld [vmem:[#allocation2 + $0xc1] sm:$0xff] }
  0xcb   : > { %1118 = vmatmul.mubr.f32.gmra.mrb[62].mxu1 %v3924_v30  ;;  %v3966_v30 = vld [vmem:[#allocation2 + $0x32] sm:$0xff] }
  0xcc   : > { %1343 = vmatmul.mubr.f32.gmra.mrb[62].mxu0 %v3946_v57  ;;  %1677 = vmatprep.mubr.f32.mxu1 %v3217_v63  ;;  %v886_v63 = vld [vmem:[%s4565_s1 + $0x420] sm:$0xff]  ;;  %v887_v57 = vld [vmem:[%s4565_s1 + $0x428] sm:$0xff] }
  0xcd   : > { %1412 = vmatprep.mubr.f32.mxu0 %v625_v25  ;;  %v594_v25 = vld [vmem:[#allocation2 + $0x21] sm:$0xff] }
  0xcf   : > { %1678 = vmatmul.mubr.f32.vlgmr.msra.gmra.mrb[64].mxu1 %v3644_v53  ;;  %v3971_v53 = vld [vmem:[#allocation2 + $0xa9] sm:$0xff] }
  0xd0   : > { %1413 = vmatmul.mubr.f32.vlgmr.msra.gmra.mrb[0].mxu0 %v593_v23  ;;  %1682 = vmatprep.mubr.f32.mxu1 %v3227_v6  ;;  %v2593_v6 = vpack.c.bf16 %v887_v57, %v886_v63  ;;  %v890_v57 = vld [vmem:[%s4565_s1 + $0x440] sm:$0xff]  ;;  %v892_v63 = vld [vmem:[%s4565_s1 + $0x450] sm:$0xff] }
  0xd1   : > { %2539 = vmatpush1.bf16.msra.mxu0 %v3430_v9  ;;  %1417 = vmatprep.mubr.f32.mxu0 %v626_v48  ;;  %v888_v9 = vld [vmem:[%s4565_s1 + $0x430] sm:$0xff]  ;;  %v889_v48 = vld [vmem:[%s4565_s1 + $0x438] sm:$0xff] }
  0xd2   : > { %2540 = vmatprep.subr.bf16.mxu0 %v4644_v38  ;;  %2588 = vmatpush3.bf16.msra.mxu1 %v3809_v4  ;;  %v3981_v4 = vld [vmem:[#allocation2 + $0x31] sm:$0xff]  ;;  %v2597_v23 = vpack.c.bf16 %v889_v48, %v888_v9  ;;  %v4037_v48 = vld [vmem:[#allocation2 + $0xd9] sm:$0xff] }
  0xd3   : > { %1683 = vmatmul.mubr.f32.gmra.mrb[66].mxu1 %v3669_v51  ;;  %2590 = vmatprep.subr.bf16.mxu1 %v2589_v8  ;;  %v3984_v51 = vld [vmem:[#allocation2 + $0x3a] sm:$0xff]  ;;  %v4031_v9 = vld [vmem:[#allocation2 + $0x51] sm:$0xff] }
  0xd4   : > { %1418 = vmatmul.mubr.f32.gmra.mrb[2].mxu0 %v594_v25  ;;  %1687 = vmatprep.mubr.f32.mxu1 %v3971_v53  ;;  %v4015_v25 = vld [vmem:[#allocation2 + $0x49] sm:$0xff] }
  0xd5   : > { %1422 = vmatprep.mubr.f32.mxu0 %v3966_v30  ;;  %2542 = vmatpush1.bf16.msra.mxu0 %v3464_v33  ;;  %v891_v33 = vld [vmem:[%s4565_s1 + $0x448] sm:$0xff] }
  0xd6   : > { %2543 = vmatprep.subr.bf16.mxu0 %v4644_v38  ;;  %2592 = vmatpush3.bf16.msra.mxu1 %v2589_v8  ;;  %v3999_v8 = vld [vmem:[#allocation2 + $0x39] sm:$0xff] }
  0xd7   : > { %1688 = vmatmul.mubr.f32.gmra.mrb[68].mxu1 %v3694_v52  ;;  %2594 = vmatprep.subr.bf16.mxu1 %v2593_v6  ;;  %v2601_v52 = vpack.c.bf16 %v891_v33, %v890_v57  ;;  %v4053_v57 = vld [vmem:[#allocation2 + $0xe1] sm:$0xff]  ;;  %v725_v33 = vld [vmem:[#allocation2 + $0x52] sm:$0xff] }
  0xd8   : > { %1423 = vmatmul.mubr.f32.gmra.mrb[4].mxu0 %v3981_v4  ;;  %1692 = vmatprep.mubr.f32.mxu1 %v3989_v43 }
  0xd9   : > { %1427 = vmatprep.mubr.f32.mxu0 %v3984_v51  ;;  %2545 = vmatpush1.bf16.msra.mxu0 %v3499_v1  ;;  %v893_v1 = vld [vmem:[%s4565_s1 + $0x458] sm:$0xff] }
  0xda   : > { %2546 = vmatprep.subr.bf16.mxu0 %v4644_v38  ;;  %2596 = vmatpush3.bf16.msra.mxu1 %v2593_v6  ;;  %v4021_v6 = vld [vmem:[#allocation2 + $0xc9] sm:$0xff] }
  0xdb   : > { %1693 = vmatmul.mubr.f32.gmra.mrb[70].mxu1 %v3718_v42  ;;  %2598 = vmatprep.subr.bf16.mxu1 %v2597_v23  ;;  %v2605_v42 = vpack.c.bf16 %v893_v1, %v892_v63 }
  0xdc   : > { %1428 = vmatmul.mubr.f32.gmra.mrb[6].mxu0 %v3999_v8  ;;  %1697 = vmatprep.mubr.f32.mxu1 %v4005_v26 }
  0xdd   : > { %1432 = vmatprep.mubr.f32.mxu0 %v3576_v58  ;;  %2548 = vmatpush1.bf16.msra.mxu0 %v3525_v2  ;;  %v894_v58 = vld [vmem:[%s4565_s1 + $0x460] sm:$0xff]  ;;  %v895_v2 = vld [vmem:[%s4565_s1 + $0x468] sm:$0xff] }
  0xde   : > { %2549 = vmatprep.subr.bf16.mxu0 %v4644_v38  ;;  %2600 = vmatpush3.bf16.msra.mxu1 %v2597_v23  ;;  %v4047_v23 = vld [vmem:[#allocation2 + $0x61] sm:$0xff] }
  0xdf   : > { %1698 = vmatmul.mubr.f32.gmra.mrb[72].mxu1 %v3743_v54  ;;  %2602 = vmatprep.subr.bf16.mxu1 %v2601_v52  ;;  %v2609_v54 = vpack.c.bf16 %v895_v2, %v894_v58  ;;  %v728_v58 = vld [vmem:[#allocation2 + $0x7a] sm:$0xff] }
  0xe0   : > { %1433 = vmatmul.mubr.f32.gmra.mrb[8].mxu0 %v4015_v25  ;;  %1702 = vmatprep.mubr.f32.mxu1 %v4021_v6 }
  0xe1   : > { %1437 = vmatprep.mubr.f32.mxu0 %v3598_v18  ;;  %2551 = vmatpush1.bf16.msra.mxu0 %v3545_v44  ;;  %v896_v18 = vld [vmem:[%s4565_s1 + $0x470] sm:$0xff]  ;;  %v897_v44 = vld [vmem:[%s4565_s1 + $0x478] sm:$0xff] }
  0xe2   : > { %2552 = vmatprep.subr.bf16.mxu0 %v4644_v38  ;;  %2604 = vmatpush3.bf16.msra.mxu1 %v2601_v52  ;;  %v4663_v52 = vld [vmem:[#allocation15_spill] sm:$0xff] }
  0xe3   : > { %1703 = vmatmul.mubr.f32.gmra.mrb[74].mxu1 %v3769_v15  ;;  %2606 = vmatprep.subr.bf16.mxu1 %v2605_v42  ;;  %v2613_v15 = vpack.c.bf16 %v897_v44, %v896_v18  ;;  %v4665_v18 = vld [vmem:[#allocation19_spill] sm:$0xff] }
  0xe4   : > { %1438 = vmatmul.mubr.f32.gmra.mrb[10].mxu0 %v4031_v9  ;;  %1707 = vmatprep.mubr.f32.mxu1 %v4037_v48  ;;  %v730_v44 = vld [vmem:[#allocation2 + $0x92] sm:$0xff] }
  0xe5   : > { %1442 = vmatprep.mubr.f32.mxu0 %v3620_v55  ;;  %2554 = vmatpush1.bf16.msra.mxu0 %v3565_v60  ;;  %v4057_v55 = vld [vmem:[#allocation2 + $0x69] sm:$0xff]  ;;  %v4067_v60 = vld [vmem:[#allocation2 + $0x79] sm:$0xff] }
  0xe6   : > { %2555 = vmatprep.subr.bf16.mxu0 %v4644_v38  ;;  %2608 = vmatpush3.bf16.msra.mxu1 %v2605_v42  ;;  %v727_v42 = vld [vmem:[#allocation2 + $0x6a] sm:$0xff] }
  0xe7   : > { %1708 = vmatmul.mubr.f32.gmra.mrb[76].mxu1 %v3801_v49  ;;  %2610 = vmatprep.subr.bf16.mxu1 %v2609_v54  ;;  %v4063_v49 = vld [vmem:[#allocation2 + $0xf1] sm:$0xff] }
  0xe8   : > { %1443 = vmatmul.mubr.f32.gmra.mrb[12].mxu0 %v4047_v23  ;;  %1712 = vmatprep.mubr.f32.mxu1 %v4053_v57 }
  0xe9   : > { %1447 = vmatprep.mubr.f32.mxu0 %v3642_v21  ;;  %2557 = vmatpush1.bf16.msra.mxu0 %v3586_v17  ;;  %v4073_v17 = vld [vmem:[#allocation2 + $0xf9] sm:$0xff]  ;;  %v4077_v21 = vld [vmem:[#allocation2 + $0x81] sm:$0xff] }
  0xea   : > { %2558 = vmatprep.subr.bf16.mxu0 %v4644_v38  ;;  %2612 = vmatpush3.bf16.msra.mxu1 %v2609_v54  ;;  %v2812_v54 = vld [vmem:[#allocation2 + $0x151] sm:$0xff] }
  0xeb   : > { %1713 = vmatmul.mubr.f32.gmra.mrb[78].mxu1 %v3817_v59  ;;  %2614 = vmatprep.subr.bf16.mxu1 %v2613_v15 }
  0xec   : > { %1448 = vmatmul.mubr.f32.gmra.mrb[14].mxu0 %v4057_v55  ;;  %1717 = vmatprep.mubr.f32.mxu1 %v4063_v49 }
  0xed   : > { %1452 = vmatprep.mubr.f32.mxu0 %v3667_v19  ;;  %2560 = vmatpush1.bf16.msra.mxu0 %v3608_v22  ;;  %v2803_v22 = vld [vmem:[#allocation2 + $0x109] sm:$0xff]  ;;  %v2804_v19 = vld [vmem:[#allocation2 + $0x91] sm:$0xff] }
  0xee   : > { %2561 = vmatprep.subr.bf16.mxu0 %v4644_v38  ;;  %2616 = vmatpush3.bf16.msra.mxu1 %v2613_v15 }
  0xef   : > { %1718 = vmatmul.mubr.f32.gmra.mrb[80].mxu1 %v3829_v0 }
  0xf0   : > { %1453 = vmatmul.mubr.f32.gmra.mrb[16].mxu0 %v4067_v60  ;;  %1722 = vmatprep.mubr.f32.mxu1 %v4073_v17 }
  0xf1   : > { %1457 = vmatprep.mubr.f32.mxu0 %v3692_v16  ;;  %2563 = vmatpush1.bf16.msra.mxu0 %v3630_v28  ;;  %v2805_v16 = vld [vmem:[#allocation2 + $0x111] sm:$0xff]  ;;  %v2806_v28 = vld [vmem:[#allocation2 + $0x99] sm:$0xff] }
  0xf2   : > { %2564 = vmatprep.subr.bf16.mxu0 %v4644_v38 }
  0xf3   : > { %1723 = vmatmul.mubr.f32.gmra.mrb[82].mxu1 %v3838_v35 }
  0xf4   : > { %1458 = vmatmul.mubr.f32.gmra.mrb[18].mxu0 %v4077_v21  ;;  %1727 = vmatprep.mubr.f32.mxu1 %v2803_v22 }
  0xf5   : > { %1462 = vmatprep.mubr.f32.mxu0 %v3716_v11  ;;  %2566 = vmatpush1.bf16.msra.mxu0 %v3654_v36  ;;  %v2807_v11 = vld [vmem:[#allocation2 + $0x121] sm:$0xff] }
  0xf6   : > { %2567 = vmatprep.subr.bf16.mxu0 %v4644_v38 }
  0xf7   : > { %1728 = vmatmul.mubr.f32.gmra.mrb[84].mxu1 %v3847_v62 }
  0xf8   : > { %1463 = vmatmul.mubr.f32.gmra.mrb[20].mxu0 %v2804_v19  ;;  %1732 = vmatprep.mubr.f32.mxu1 %v2805_v16  ;;  %v732_v19 = vld [vmem:[#allocation2 + $0xaa] sm:$0xff] }
  0xf9   : > { %1467 = vmatprep.mubr.f32.mxu0 %v3741_v56  ;;  %2569 = vmatpush1.bf16.msra.mxu0 %v3679_v40  ;;  %v4654_v40 = vld [vmem:[#allocation9_spill] sm:$0xff]  ;;  %v4658_v56 = vld [vmem:[#allocation10_spill] sm:$0xff] }
  0xfa   : > { %2570 = vmatprep.subr.bf16.mxu0 %v4644_v38 }
  0xfb   : > { %1733 = vmatmul.mubr.f32.gmra.mrb[86].mxu1 %v3856_v27  ;;  %v2809_v27 = vld [vmem:[#allocation2 + $0x129] sm:$0xff] }
  0xfc   : > { %1468 = vmatmul.mubr.f32.gmra.mrb[22].mxu0 %v2806_v28  ;;  %1737 = vmatprep.mubr.f32.mxu1 %v2807_v11 }
  0xfd   : > { %1472 = vmatprep.mubr.f32.mxu0 %v3767_v39  ;;  %2572 = vmatpush1.bf16.msra.mxu0 %v3704_v47  ;;  %v4656_v47 = vld [vmem:[#allocation5_spill] sm:$0xff] }
  0xfe   : > { %2573 = vmatprep.subr.bf16.mxu0 %v4644_v38 }
  0xff   : > { %1738 = vmatmul.mubr.f32.gmra.mrb[88].mxu1 %v3865_v3  ;;  %v4645_v3 = vld [vmem:[#allocation6_spill] sm:$0xff] }
 0x100   : > { %1473 = vmatmul.mubr.f32.gmra.mrb[24].mxu0 %v3971_v53  ;;  %1742 = vmatprep.mubr.f32.mxu1 %v3399_v10  ;;  %v4647_v10 = vld [vmem:[#allocation7_spill] sm:$0xff] }
 0x101   : > { %1477 = vmatprep.mubr.f32.mxu0 %v3799_v61  ;;  %2575 = vmatpush1.bf16.msra.mxu0 %v3728_v46  ;;  %v4657_v46 = vmax.f32 %v4656_v47, 0.0 }
 0x102   : > { %2576 = vmatprep.subr.bf16.mxu0 %v4644_v38 }
 0x103   : > { %1743 = vmatmul.mubr.f32.gmra.mrb[90].mxu1 %v3874_v29  ;;  %v4646_v29 = vld [vmem:[#allocation14_spill] sm:$0xff] }
 0x104   : > { %1478 = vmatmul.mubr.f32.gmra.mrb[26].mxu0 %v3989_v43  ;;  %1747 = vmatprep.mubr.f32.mxu1 %v3408_v32  ;;  %v4648_v32 = vld [vmem:[#allocation16_spill] sm:$0xff] }
 0x105   : > { %1482 = vmatprep.mubr.f32.mxu0 %v3815_v45  ;;  %2578 = vmatpush1.bf16.msra.mxu0 %v3753_v50  ;;  %v720_v50 = vld [vmem:[#allocation2 + $0x199] sm:$0xff]  ;;  %v721_v45 = vld [vmem:[#allocation2 + $0x1a1] sm:$0xff] }
 0x106   : > { %2579 = vmatprep.subr.bf16.mxu0 %v4644_v38  ;;  %v2810_v43 = vld [vmem:[#allocation2 + $0x139] sm:$0xff] }
 0x107   : > { %1748 = vmatmul.mubr.f32.gmra.mrb[92].mxu1 %v3883_v34  ;;  %v4651_v34 = vld [vmem:[#allocation18_spill] sm:$0xff] }
 0x108   : > { %1483 = vmatmul.mubr.f32.gmra.mrb[28].mxu0 %v4005_v26  ;;  %1752 = vmatprep.mubr.f32.mxu1 %v3418_v7  ;;  %v4649_v7 = vld [vmem:[#allocation4_spill] sm:$0xff]  ;;  %v726_v26 = vld [vmem:[#allocation2 + $0x62] sm:$0xff] }
 0x109   : > { %1487 = vmatprep.mubr.f32.mxu0 %v3827_v37  ;;  %2581 = vmatpush1.bf16.msra.mxu0 %v3779_v12  ;;  %v4659_v12 = vld [vmem:[#allocation22_spill] sm:$0xff]  ;;  %v2808_v37 = vld [vmem:[#allocation2] sm:$0xff] }
 0x10a   : > { %2582 = vmatprep.subr.bf16.mxu0 %v4644_v38  ;;  %v724_v38 = vld [vmem:[#allocation2 + $0x4a] sm:$0xff] }
 0x10b   : > { %1753 = vmatmul.mubr.f32.gmra.mrb[94].mxu1 %v3892_v31  ;;  %v4662_v31 = vld [vmem:[#allocation13_spill] sm:$0xff] }
 0x10c   : > { %1488 = vmatmul.mubr.f32.gmra.mrb[30].mxu0 %v4021_v6  ;;  %1757 = vmatprep.mubr.f32.mxu1 %v3432_v14  ;;  %v4650_v14 = vld [vmem:[#allocation8_spill] sm:$0xff]  ;;  %v4664_v6 = vld [vmem:[#allocation17_spill] sm:$0xff] }
 0x10d   : > { %1492 = vmatprep.mubr.f32.mxu0 %v3836_v24  ;;  %2584 = vmatpush1.bf16.msra.mxu0 %v3805_v13  ;;  %v4660_v13 = vld [vmem:[#allocation11_spill] sm:$0xff]  ;;  %v4661_v24 = vld [vmem:[#allocation12_spill] sm:$0xff] }
 0x10f   : > { %1758 = vmatmul.mubr.f32.gmra.mrb[96].mxu1 %v3900_v5 }
 0x110   : > { %1493 = vmatmul.mubr.f32.gmra.mrb[32].mxu0 %v4037_v48  ;;  %1762 = vmatprep.mubr.f32.mxu1 %v3446_v20  ;;  %v4652_v20 = vld [vmem:[#allocation3_spill] sm:$0xff]  ;;  %v729_v48 = vld [vmem:[#allocation2 + $0x82] sm:$0xff] }
 0x111   : > { %1497 = vmatprep.mubr.f32.mxu0 %v4645_v3  ;;  %v4653_v36 = vmax.f32 %v4652_v20, 0.0  ;;  %v733_v3 = vld [vmem:[#allocation2 + $0xb2] sm:$0xff]  ;;  %v735_v20 = vld [vmem:[#allocation2 + $0xca] sm:$0xff] }
 0x113   : > { %1763 = vmatmul.mubr.f32.gmra.mrb[98].mxu1 %v4646_v29  ;;  %v4667_v29 = vld [vmem:[#allocation23_spill] sm:$0xff] }
 0x114   : > { %1498 = vmatmul.mubr.f32.gmra.mrb[34].mxu0 %v4053_v57  ;;  %1767 = vmatprep.mubr.f32.mxu1 %v3454_v41  ;;  %v4655_v41 = vld [vmem:[#allocation20_spill] sm:$0xff] }
 0x115   : > { %1502 = vmatprep.mubr.f32.mxu0 %v4647_v10  ;;  %v734_v10 = vld [vmem:[#allocation2 + $0xc2] sm:$0xff] }
 0x117   : > { %1768 = vmatmul.mubr.f32.gmra.mrb[100].mxu1 %v4648_v32  ;;  %v4165_v32 = vld [vmem:[#allocation2 + $0x182] sm:$0xff] }
 0x118   : > { %1503 = vmatmul.mubr.f32.gmra.mrb[36].mxu0 %v4063_v49  ;;  %1772 = vmatprep.mubr.f32.mxu1 %v4649_v7  ;;  %v2813_v49 = vld [vmem:[#allocation2 + $0x159] sm:$0xff] }
 0x119   : > { %1507 = vmatprep.mubr.f32.mxu0 %v4650_v14 }
 0x11b   : > { %1773 = vmatmul.mubr.f32.gmra.mrb[102].mxu1 %v4651_v34  ;;  %v2815_v34 = vld [vmem:[#allocation2 + $0x171] sm:$0xff] }
 0x11c   : > { %1508 = vmatmul.mubr.f32.gmra.mrb[38].mxu0 %v4073_v17  ;;  %1777 = vmatprep.mubr.f32.mxu1 %v4653_v36  ;;  %v731_v17 = vld [vmem:[#allocation2 + $0x9a] sm:$0xff] }
 0x11d   : > { %1512 = vmatprep.mubr.f32.mxu0 %v4654_v40  ;;  %v736_v36 = vld [vmem:[#allocation2 + $0xda] sm:$0xff]  ;;  %v4170_v40 = vld [vmem:[#allocation2 + $0x18a] sm:$0xff] }
 0x11f   : > { %1778 = vmatmul.mubr.f32.gmra.mrb[104].mxu1 %v4655_v41 }
 0x120   : > { %1513 = vmatmul.mubr.f32.gmra.mrb[40].mxu0 %v2803_v22  ;;  %1782 = vmatprep.mubr.f32.mxu1 %v4657_v46  ;;  %v4666_v22 = vld [vmem:[#allocation21_spill] sm:$0xff] }
 0x121   : > { %1517 = vmatprep.mubr.f32.mxu0 %v4658_v56  ;;  %v2816_v46 = vld [vmem:[#allocation2 + $0x181] sm:$0xff] }
 0x122   : > { %v4138_v39 = vpop.f32.mrb[0].mxu1  ;;  %v737_v56 = vld [vmem:[#allocation2 + $0xe2] sm:$0xff] }
 0x123   : > { %1783 = vmatmul.mubr.f32.gmra.mrb[106].mxu1 %v4659_v12  ;;  %v966_v61 = vpop.f32.mrb[1].mxu1 }
 0x124   : > { %1518 = vmatmul.mubr.f32.gmra.mrb[42].mxu0 %v2805_v16  ;;  %1787 = vmatprep.mubr.f32.mxu1 %v720_v50  ;;  %v738_v50 = vld [vmem:[#allocation2 + $0xf2] sm:$0xff] }
 0x125   : > { %1522 = vmatprep.mubr.f32.mxu0 %v4660_v13 }
 0x126   : > { %v4142_v59 = vpop.f32.mrb[2].mxu1 }
 0x127   : > { %1788 = vmatmul.mubr.f32.gmra.mrb[108].mxu1 %v2808_v37  ;;  %v971_v0 = vpop.f32.mrb[3].mxu1 }
 0x128   : > { %1523 = vmatmul.mubr.f32.gmra.mrb[44].mxu0 %v2807_v11  ;;  %1792 = vmatprep.mubr.f32.mxu1 %v721_v45  ;;  %v2814_v11 = vld [vmem:[#allocation2 + $0x169] sm:$0xff] }
 0x129   : > { %1527 = vmatprep.mubr.f32.mxu0 %v4661_v24  ;;  %v2817_v45 = vld [vmem:[#allocation2 + $0x189] sm:$0xff] }
 0x12a   : > { %v4145_v35 = vpop.f32.mrb[4].mxu1  ;;  %v658_v0 = vld [vmem:[#allocation2 + $0x30] sm:$0xff] }
 0x12b   : > { %1793 = vmatmul.mubr.f32.gmra.mrb[110].mxu1 %v2808_v37  ;;  %v976_v62 = vpop.f32.mrb[5].mxu1  ;;  %v739_v37 = vld [vmem:[#allocation2 + $0xfa] sm:$0xff] }
 0x12c   : > { %1528 = vmatmul.mubr.f32.gmra.mrb[46].mxu0 %v2809_v27  ;;  %2345 = vmatprep.mubr.f32.mxu1 %v3966_v30  ;;  %v2811_v30 = vld [vmem:[#allocation2 + $0x141] sm:$0xff]  ;;  %v740_v62 = vld [vmem:[#allocation2 + $0x10a] sm:$0xff] }
 0x12d   : > { %1532 = vmatprep.mubr.f32.mxu0 %v4662_v31 }
 0x12e   : > { %v4149_v5 = vpop.f32.mrb[6].mxu1 }
 0x12f   : > { %2346 = vmatmul.mubr.f32.vlgmr.msra.gmra.mrb[112].mxu1 %v3984_v51  ;;  %v981_v53 = vpop.f32.mrb[7].mxu1 }
 0x130   : > { %1533 = vmatmul.mubr.f32.gmra.mrb[48].mxu0 %v2810_v43  ;;  %2348 = vmatprep.mubr.f32.mxu1 %v724_v38  ;;  %v741_v53 = vld [vmem:[#allocation2 + $0x112] sm:$0xff] }
 0x131   : > { %1537 = vmatprep.mubr.f32.mxu0 %v4663_v52  ;;  %v659_v43 = vld [vmem:[#allocation2 + $0x38] sm:$0xff] }
 0x132   : > { %v4153_v63 = vpop.f32.mrb[8].mxu1 }
 0x133   : > { %2349 = vmatmul.mubr.f32.gmra.mrb[114].mxu1 %v725_v33  ;;  %v986_v1 = vpop.f32.mrb[9].mxu1 }
 0x134   : > { %1538 = vmatmul.mubr.f32.gmra.mrb[50].mxu0 %v2811_v30  ;;  %2351 = vmatprep.mubr.f32.mxu1 %v726_v26 }
 0x135   : > { %1542 = vmatprep.mubr.f32.mxu0 %v4664_v6 }
 0x136   : > { %v4156_v51 = vpop.f32.mrb[10].mxu1 }
 0x137   : > { %2352 = vmatmul.mubr.f32.gmra.mrb[116].mxu1 %v727_v42  ;;  %v991_v2 = vpop.f32.mrb[11].mxu1 }
 0x138   : > { %1543 = vmatmul.mubr.f32.gmra.mrb[52].mxu0 %v2812_v54  ;;  %2354 = vmatprep.mubr.f32.mxu1 %v728_v58 }
 0x139   : > { %1547 = vmatprep.mubr.f32.mxu0 %v4665_v18 }
 0x13a   : > { %v4159_v15 = vpop.f32.mrb[12].mxu1 }
 0x13b   : > { %2355 = vmatmul.mubr.f32.gmra.mrb[118].mxu1 %v729_v48  ;;  %v996_v57 = vpop.f32.mrb[13].mxu1  ;;  %v665_v48 = vld [vmem:[#allocation2 + $0x80] sm:$0xff] }
 0x13c   : > { %1548 = vmatmul.mubr.f32.gmra.mrb[54].mxu0 %v2813_v49  ;;  %2357 = vmatprep.mubr.f32.mxu1 %v730_v44 }
 0x13d   : > { %1552 = vmatprep.mubr.f32.mxu0 %v4666_v22 }
 0x13e   : > { %v4162_v16 = vpop.f32.mrb[14].mxu1 }
 0x13f   : > { %2358 = vmatmul.mubr.f32.gmra.mrb[120].mxu1 %v731_v17  ;;  %v1001_v28 = vpop.f32.mrb[15].mxu1 }
 0x140   : > { %1553 = vmatmul.mubr.f32.gmra.mrb[56].mxu0 %v2814_v11  ;;  %2360 = vmatprep.mubr.f32.mxu1 %v732_v19 }
 0x141   : > { %1557 = vmatprep.mubr.f32.mxu0 %v4667_v29 }
 0x142   : > { %v4167_v7 = vpop.f32.mrb[16].mxu1 }
 0x143   : > { %2361 = vmatmul.mubr.f32.gmra.mrb[122].mxu1 %v733_v3  ;;  %v1006_v14 = vpop.f32.mrb[17].mxu1 }
 0x144   : > { %1558 = vmatmul.mubr.f32.gmra.mrb[58].mxu0 %v2815_v34  ;;  %2363 = vmatprep.mubr.f32.mxu1 %v734_v10 }
 0x145   : > { %1562 = vmatprep.mubr.f32.mxu0 %v4165_v32 }
 0x146   : > { %v4172_v41 = vpop.f32.mrb[18].mxu1 }
 0x147   : > { %2364 = vmatmul.mubr.f32.gmra.mrb[124].mxu1 %v735_v20  ;;  %v1011_v47 = vpop.f32.mrb[19].mxu1 }
 0x148   : > { %1563 = vmatmul.mubr.f32.gmra.mrb[60].mxu0 %v2816_v46  ;;  %2366 = vmatprep.mubr.f32.mxu1 %v736_v36 }
 0x149   : > { %1567 = vmatprep.mubr.f32.mxu0 %v4170_v40 }
 0x14a   : > { %v4175_v12 = vpop.f32.mrb[20].mxu1 }
 0x14b   : > { %2367 = vmatmul.mubr.f32.gmra.mrb[126].mxu1 %v737_v56  ;;  %v1016_v61 = vpop.f32.mrb[21].mxu1 }
 0x14c   : > { %1568 = vmatmul.mubr.f32.gmra.mrb[62].mxu0 %v2817_v45  ;;  %2369 = vmatprep.mubr.f32.mxu1 %v738_v50 }
 0x14d   : > { %1637 = vmatprep.mubr.f32.mxu0 %v3981_v4  ;;  %v660_v4 = vld [vmem:[#allocation2 + $0x48] sm:$0xff] }
 0x14e   : > { %v4178_v27 = vpop.f32.mrb[22].mxu1 }
 0x14f   : > { %2370 = vmatmul.mubr.f32.gmra.mrb[128].mxu1 %v739_v37  ;;  %v1021_v38 = vpop.f32.mrb[23].mxu1 }
 0x150   : > { %1638 = vmatmul.mubr.f32.vlgmr.msra.gmra.mrb[0].mxu0 %v658_v0  ;;  %2372 = vmatprep.mubr.f32.mxu1 %v740_v62 }
 0x151   : > { %1642 = vmatprep.mubr.f32.mxu0 %v3999_v8  ;;  %v661_v8 = vld [vmem:[#allocation2 + $0x50] sm:$0xff] }
 0x152   : > { %v4181_v33 = vpop.f32.mrb[24].mxu1 }
 0x153   : > { %2373 = vmatmul.mubr.f32.gmra.mrb[130].mxu1 %v741_v53  ;;  %v1026_v26 = vpop.f32.mrb[25].mxu1 }
 0x154   : > { %1643 = vmatmul.mubr.f32.gmra.mrb[2].mxu0 %v659_v43  ;;  %2375 = vmatprep.mubr.f32.mxu1 %v4660_v13 }
 0x155   : > { %1647 = vmatprep.mubr.f32.mxu0 %v4015_v25  ;;  %v662_v25 = vld [vmem:[#allocation2 + $0x60] sm:$0xff] }
 0x156   : > { %v4185_v1 = vpop.f32.mrb[26].mxu1 }
 0x157   : > { %2376 = vmatmul.mubr.f32.gmra.mrb[132].mxu1 %v4661_v24  ;;  %v1031_v30 = vpop.f32.mrb[27].mxu1 }
 0x158   : > { %1648 = vmatmul.mubr.f32.gmra.mrb[4].mxu0 %v660_v4  ;;  %2378 = vmatprep.mubr.f32.mxu1 %v4662_v31 }
 0x159   : > { %1652 = vmatprep.mubr.f32.mxu0 %v4031_v9  ;;  %v663_v9 = vld [vmem:[#allocation2 + $0x68] sm:$0xff] }
 0x15a   : > { %v4190_v42 = vpop.f32.mrb[28].mxu1 }
 0x15b   : > { %2379 = vmatmul.mubr.f32.gmra.mrb[134].mxu1 %v4663_v52  ;;  %v1036_v58 = vpop.f32.mrb[29].mxu1 }
 0x15c   : > { %1653 = vmatmul.mubr.f32.gmra.mrb[6].mxu0 %v661_v8  ;;  %2381 = vmatprep.mubr.f32.mxu1 %v4664_v6  ;;  %v752_v6 = vld [vmem:[#allocation2 + $0x19a] sm:$0xff] }
 0x15d   : > { %1657 = vmatprep.mubr.f32.mxu0 %v4047_v23  ;;  %v664_v23 = vld [vmem:[#allocation2 + $0x78] sm:$0xff] }
 0x15e   : > { %v4195_v13 = vpop.f32.mrb[30].mxu1 }
 0x15f   : > { %2382 = vmatmul.mubr.f32.gmra.mrb[136].mxu1 %v4665_v18  ;;  %v1041_v24 = vpop.f32.mrb[31].mxu1 }
 0x160   : > { %1658 = vmatmul.mubr.f32.gmra.mrb[8].mxu0 %v662_v25  ;;  %2384 = vmatprep.mubr.f32.mxu1 %v4666_v22 }
 0x161   : > { %1662 = vmatprep.mubr.f32.mxu0 %v4057_v55  ;;  %v753_v55 = vld [vmem:[#allocation2 + $0x1a2] sm:$0xff] }
 0x162   : > { %v4200_v31 = vpop.f32.mrb[32].mxu1 }
 0x163   : > { %2385 = vmatmul.mubr.f32.gmra.mrb[138].mxu1 %v4667_v29  ;;  %v1046_v52 = vpop.f32.mrb[33].mxu1 }
 0x164   : > { %1663 = vmatmul.mubr.f32.gmra.mrb[10].mxu0 %v663_v9  ;;  %2387 = vmatprep.mubr.f32.mxu1 %v4165_v32 }
 0x165   : > { %1667 = vmatprep.mubr.f32.mxu0 %v4067_v60 }
 0x166   : > { %v4205_v2 = vpop.f32.mrb[34].mxu1 }
 0x167   : > { %2388 = vmatmul.mubr.f32.gmra.mrb[140].mxu1 %v4170_v40  ;;  %v1051_v54 = vpop.f32.mrb[35].mxu1 }
 0x168   : > { %1668 = vmatmul.mubr.f32.gmra.mrb[12].mxu0 %v664_v23  ;;  %2390 = vmatprep.mubr.f32.mxu1 %v752_v6 }
 0x169   : > { %1672 = vmatprep.mubr.f32.mxu0 %v4077_v21 }
 0x16a   : > { %v4209_v18 = vpop.f32.mrb[36].mxu1 }
 0x16b   : > { %2391 = vmatmul.mubr.f32.gmra.mrb[142].mxu1 %v753_v55  ;;  %v1056_v44 = vpop.f32.mrb[37].mxu1 }
 0x16c   : > { %1673 = vmatmul.mubr.f32.gmra.mrb[14].mxu0 %v665_v48 }
 0x16e   : > { %v4211_v57 = vpop.f32.mrb[38].mxu1 }
 0x16f   : > { %v1061_v60 = vpop.f32.mrb[39].mxu1 }
 0x172   : > { %v4213_v49 = vpop.f32.mrb[40].mxu1 }
 0x173   : > { %v1066_v17 = vpop.f32.mrb[41].mxu1 }
 0x176   : > { %v4215_v22 = vpop.f32.mrb[42].mxu1 }
 0x177   : > { %v1071_v19 = vpop.f32.mrb[43].mxu1 }
 0x17a   : > { %v4217_v28 = vpop.f32.mrb[44].mxu1 }
 0x17b   : > { %v1076_v11 = vpop.f32.mrb[45].mxu1 }
 0x17e   : > { %v4219_v3 = vpop.f32.mrb[46].mxu1 }
 0x17f   : > { %v1081_v21 = vpop.f32.mrb[47].mxu1 }
 0x182   : > { %v4221_v29 = vpop.f32.mrb[48].mxu1 }
 0x183   : > { %v1086_v10 = vpop.f32.mrb[49].mxu1 }
 0x186   : > { %v4223_v32 = vpop.f32.mrb[50].mxu1 }
 0x187   : > { %v1091_v14 = vpop.f32.mrb[51].mxu1 }
 0x18a   : > { %v4225_v34 = vpop.f32.mrb[52].mxu1 }
 0x18b   : > { %v1096_v20 = vpop.f32.mrb[53].mxu1 }
 0x18e   : > { %v4227_v36 = vpop.f32.mrb[54].mxu1 }
 0x18f   : > { %v1101_v40 = vpop.f32.mrb[55].mxu1 }
 0x192   : > { %v4229_v47 = vpop.f32.mrb[56].mxu1 }
 0x193   : > { %v1106_v46 = vpop.f32.mrb[57].mxu1 }
 0x196   : > { %v4231_v56 = vpop.f32.mrb[58].mxu1 }
 0x197   : > { %v1111_v50 = vpop.f32.mrb[59].mxu1 }
 0x19a   : > { %v4233_v61 = vpop.f32.mrb[60].mxu1 }
 0x19b   : > { %v1116_v45 = vpop.f32.mrb[61].mxu1 }
 0x19e   : > { %v4235_v37 = vpop.f32.mrb[62].mxu1 }
 0x19f   : > { %v1121_v0 = vpop.f32.mrb[63].mxu1 }
 0x1a2   : > { %v1679_v62 = vpop.f32.mrb[64].mxu1 }
 0x1a3   : > { %v1681_v38 = vpop.f32.mrb[65].mxu1 }
 0x1a6   : > { %v1684_v53 = vpop.f32.mrb[66].mxu1 }
 0x1a7   : > { %v1686_v43 = vpop.f32.mrb[67].mxu1 }
 0x1aa   : > { %v1689_v26 = vpop.f32.mrb[68].mxu1 }
 0x1ab   : > { %v1691_v4 = vpop.f32.mrb[69].mxu1 }
 0x1ae   : > { %v1694_v30 = vpop.f32.mrb[70].mxu1 }
 0x1af   : > { %v1696_v8 = vpop.f32.mrb[71].mxu1 }
 0x1b2   : > { %v1699_v58 = vpop.f32.mrb[72].mxu1 }
 0x1b3   : > { %v1701_v25 = vpop.f32.mrb[73].mxu1 }
 0x1b6   : > { %v1704_v24 = vpop.f32.mrb[74].mxu1 }
 0x1b7   : > { %v1706_v9 = vpop.f32.mrb[75].mxu1 }
 0x1ba   : > { %v1709_v52 = vpop.f32.mrb[76].mxu1 }
 0x1bb   : > { %v1711_v23 = vpop.f32.mrb[77].mxu1 }
 0x1be   : > { %v1714_v6 = vpop.f32.mrb[78].mxu1 }
 0x1bf   : > { %v1716_v54 = vpop.f32.mrb[79].mxu1 }
 0x1c2   : > { %v1719_v55 = vpop.f32.mrb[80].mxu1 }
 0x1c3   : > { %v1454_v48 = vpop.f32.mrb[16].mxu0  ;;  %v1721_v44 = vpop.f32.mrb[81].mxu1 }
 0x1c4   : > { %v2657_v60 = vadd.f32 %v1454_v48, %v4167_v7  ;;  %v1456_v17 = vpop.f32.mrb[17].mxu0 }
 0x1c6   : > { %v4238_v19 = vadd.f32 %v2657_v60, %v1679_v62  ;;  %v1724_v11 = vpop.f32.mrb[82].mxu1 }
 0x1c7   : > { %v1459_v21 = vpop.f32.mrb[18].mxu0  ;;  %v1726_v10 = vpop.f32.mrb[83].mxu1 }
 0x1c8   : > { %v2659_v14 = vadd.f32 %v1459_v21, %v4172_v41  ;;  %v1461_v20 = vpop.f32.mrb[19].mxu0 }
 0x1ca   : > { %v4241_v40 = vadd.f32 %v2659_v14, %v1684_v53  ;;  %v1729_v46 = vpop.f32.mrb[84].mxu1 }
 0x1cb   : > { %v1464_v50 = vpop.f32.mrb[20].mxu0  ;;  %v1731_v45 = vpop.f32.mrb[85].mxu1 }
 0x1cc   : > { %v2661_v0 = vadd.f32 %v1464_v50, %v4175_v12  ;;  %v1466_v38 = vpop.f32.mrb[21].mxu0 }
 0x1ce   : > { %v4244_v43 = vadd.f32 %v2661_v0, %v1689_v26  ;;  %v1734_v7 = vpop.f32.mrb[86].mxu1 }
 0x1cf   : > { %v1469_v4 = vpop.f32.mrb[22].mxu0  ;;  %v1736_v62 = vpop.f32.mrb[87].mxu1 }
 0x1d0   : > { %v2663_v8 = vadd.f32 %v1469_v4, %v4178_v27  ;;  %v1471_v25 = vpop.f32.mrb[23].mxu0 }
 0x1d2   : > { %v4247_v9 = vadd.f32 %v2663_v8, %v1694_v30  ;;  %v1739_v41 = vpop.f32.mrb[88].mxu1 }
 0x1d3   : > { %v1474_v23 = vpop.f32.mrb[24].mxu0  ;;  %v1741_v53 = vpop.f32.mrb[89].mxu1 }
 0x1d4   : > { %v2665_v54 = vadd.f32 %v1474_v23, %v4181_v33  ;;  %v1476_v48 = vpop.f32.mrb[25].mxu0 }
 0x1d6   : > { %v4250_v44 = vadd.f32 %v2665_v54, %v1699_v58  ;;  %v1744_v12 = vpop.f32.mrb[90].mxu1 }
 0x1d7   : > { %v1479_v60 = vpop.f32.mrb[26].mxu0  ;;  %v1746_v26 = vpop.f32.mrb[91].mxu1 }
 0x1d8   : > { %v2667_v17 = vadd.f32 %v1479_v60, %v4185_v1  ;;  %v1481_v21 = vpop.f32.mrb[27].mxu0 }
 0x1da   : > { %v4253_v10 = vadd.f32 %v2667_v17, %v1704_v24  ;;  %v1749_v27 = vpop.f32.mrb[92].mxu1 }
 0x1db   : > { %v1484_v14 = vpop.f32.mrb[28].mxu0  ;;  %v1751_v30 = vpop.f32.mrb[93].mxu1 }
 0x1dc   : > { %v2669_v20 = vadd.f32 %v1484_v14, %v4190_v42  ;;  %v1486_v50 = vpop.f32.mrb[29].mxu0 }
 0x1de   : > { %v4256_v45 = vadd.f32 %v2669_v20, %v1709_v52  ;;  %v1754_v33 = vpop.f32.mrb[94].mxu1 }
 0x1df   : > { %v1489_v0 = vpop.f32.mrb[30].mxu0  ;;  %v1756_v58 = vpop.f32.mrb[95].mxu1 }
 0x1e0   : > { %v2671_v38 = vadd.f32 %v1489_v0, %v4195_v13  ;;  %v1491_v4 = vpop.f32.mrb[31].mxu0 }
 0x1e2   : > { %v4259_v62 = vadd.f32 %v2671_v38, %v1714_v6  ;;  %v1759_v1 = vpop.f32.mrb[96].mxu1 }
 0x1e3   : > { %v1494_v8 = vpop.f32.mrb[32].mxu0  ;;  %v1761_v24 = vpop.f32.mrb[97].mxu1 }
 0x1e4   : > { %v2673_v25 = vadd.f32 %v1494_v8, %v4200_v31  ;;  %v1496_v23 = vpop.f32.mrb[33].mxu0 }
 0x1e6   : > { %v4262_v53 = vadd.f32 %v2673_v25, %v1719_v55  ;;  %v1764_v42 = vpop.f32.mrb[98].mxu1 }
 0x1e7   : > { %v1499_v54 = vpop.f32.mrb[34].mxu0  ;;  %v1766_v52 = vpop.f32.mrb[99].mxu1 }
 0x1e8   : > { %v2675_v48 = vadd.f32 %v1499_v54, %v4205_v2  ;;  %v1501_v60 = vpop.f32.mrb[35].mxu0 }
 0x1ea   : > { %v4265_v26 = vadd.f32 %v2675_v48, %v1724_v11  ;;  %v1769_v13 = vpop.f32.mrb[100].mxu1 }
 0x1eb   : > { %v1504_v17 = vpop.f32.mrb[36].mxu0  ;;  %v1771_v6 = vpop.f32.mrb[101].mxu1 }
 0x1ec   : > { %v2677_v21 = vadd.f32 %v1504_v17, %v4209_v18  ;;  %v1506_v14 = vpop.f32.mrb[37].mxu0 }
 0x1ee   : > { %v4268_v30 = vadd.f32 %v2677_v21, %v1729_v46  ;;  %v1774_v31 = vpop.f32.mrb[102].mxu1 }
 0x1ef   : > { %v1509_v20 = vpop.f32.mrb[38].mxu0  ;;  %v1776_v55 = vpop.f32.mrb[103].mxu1 }
 0x1f0   : > { %v2679_v50 = vadd.f32 %v1509_v20, %v4211_v57  ;;  %v1511_v0 = vpop.f32.mrb[39].mxu0 }
 0x1f2   : > { %v4271_v58 = vadd.f32 %v2679_v50, %v1734_v7  ;;  %v1779_v2 = vpop.f32.mrb[104].mxu1 }
 0x1f3   : > { %v1514_v38 = vpop.f32.mrb[40].mxu0  ;;  %v1781_v11 = vpop.f32.mrb[105].mxu1 }
 0x1f4   : > { %v2681_v4 = vadd.f32 %v1514_v38, %v4213_v49  ;;  %v1516_v8 = vpop.f32.mrb[41].mxu0 }
 0x1f6   : > { %v4274_v24 = vadd.f32 %v2681_v4, %v1739_v41  ;;  %v4276_v18 = vpop.f32.mrb[106].mxu1 }
 0x1f7   : > { %v1519_v46 = vpop.f32.mrb[42].mxu0  ;;  %v1786_v25 = vpop.f32.mrb[107].mxu1 }
 0x1f8   : > { %v2683_v23 = vadd.f32 %v1519_v46, %v4215_v22  ;;  %v1521_v54 = vpop.f32.mrb[43].mxu0 }
 0x1fa   : > { %v4279_v52 = vpop.f32.mrb[108].mxu1  ;;  %v4281_v57 = vadd.f32 %v2683_v23, %v1744_v12 }
 0x1fb   : > { %v1524_v7 = vpop.f32.mrb[44].mxu0  ;;  %v1791_v48 = vpop.f32.mrb[109].mxu1 }
 0x1fc   : > { %v2685_v60 = vadd.f32 %v1524_v7, %v4217_v28  ;;  %v1526_v17 = vpop.f32.mrb[45].mxu0 }
 0x1fe   : > { %v4284_v49 = vpop.f32.mrb[110].mxu1  ;;  %v4286_v41 = vadd.f32 %v2685_v60, %v1749_v27 }
 0x1ff   : > { %v1529_v6 = vpop.f32.mrb[46].mxu0  ;;  %v1796_v21 = vpop.f32.mrb[111].mxu1 }
 0x200   : > { %v2687_v14 = vadd.f32 %v1529_v6, %v4219_v3  ;;  %v1531_v20 = vpop.f32.mrb[47].mxu0 }
 0x202   : > { %v4289_v22 = vpop.f32.mrb[112].mxu1  ;;  %v4291_v55 = vadd.f32 %v2687_v14, %v1754_v33 }
 0x203   : > { %v1534_v12 = vpop.f32.mrb[48].mxu0  ;;  %v4293_v50 = vpop.f32.mrb[113].mxu1 }
 0x204   : > { %v2689_v0 = vadd.f32 %v1534_v12, %v4221_v29  ;;  %v1536_v28 = vpop.f32.mrb[49].mxu0 }
 0x206   : > { %v4296_v38 = vpop.f32.mrb[114].mxu1  ;;  %v4298_v11 = vadd.f32 %v2689_v0, %v1759_v1 }
 0x207   : > { %v1539_v27 = vpop.f32.mrb[50].mxu0  ;;  %v4300_v4 = vpop.f32.mrb[115].mxu1 }
 0x208   : > { %v2691_v3 = vadd.f32 %v1539_v27, %v4223_v32  ;;  %v1541_v8 = vpop.f32.mrb[51].mxu0 }
 0x20a   : > { %v4303_v46 = vpop.f32.mrb[116].mxu1  ;;  %v4305_v33 = vadd.f32 %v2691_v3, %v1764_v42 }
 0x20b   : > { %v1544_v25 = vpop.f32.mrb[52].mxu0  ;;  %v4307_v23 = vpop.f32.mrb[117].mxu1 }
 0x20c   : > { %v2693_v29 = vadd.f32 %v1544_v25, %v4225_v34  ;;  %v1546_v54 = vpop.f32.mrb[53].mxu0 }
 0x20e   : > { %v4310_v7 = vpop.f32.mrb[118].mxu1  ;;  %v4312_v1 = vadd.f32 %v2693_v29, %v1769_v13 }
 0x20f   : > { %v1549_v48 = vpop.f32.mrb[54].mxu0  ;;  %v4314_v60 = vpop.f32.mrb[119].mxu1 }
 0x210   : > { %v2695_v32 = vadd.f32 %v1549_v48, %v4227_v36  ;;  %v1551_v17 = vpop.f32.mrb[55].mxu0 }
 0x212   : > { %v2359_v34 = vpop.f32.mrb[120].mxu1  ;;  %v4324_v42 = vadd.f32 %v2695_v32, %v1774_v31 }
 0x213   : > { %v1554_v6 = vpop.f32.mrb[56].mxu0  ;;  %v4327_v13 = vadd.f32 %v4241_v40, %v2359_v34  ;;  %v1904_v21 = vpop.f32.mrb[121].mxu1 }
 0x214   : > { %v2697_v36 = vadd.f32 %v1554_v6, %v4229_v47  ;;  %v1556_v14 = vpop.f32.mrb[57].mxu0  ;;  %v4331_v20 = vadd.f32 %v4238_v19, %v1904_v21 }
 0x215   : > { %2032 = vst [vmem:[%s4322_s9 + $0x48] sm:$0xff] %v4327_v13 }
 0x216   : > { %2031 = vst [vmem:[%s4322_s9 + $0x40] sm:$0xff] %v4331_v20  ;;  %v2362_v12 = vpop.f32.mrb[122].mxu1  ;;  %v4337_v31 = vadd.f32 %v2697_v36, %v1779_v2 }
 0x217   : > { %v1559_v0 = vpop.f32.mrb[58].mxu0  ;;  %v4340_v40 = vadd.f32 %v4247_v9, %v2362_v12  ;;  %v1914_v28 = vpop.f32.mrb[123].mxu1 }
 0x218   : > { %v2699_v47 = vadd.f32 %v1559_v0, %v4231_v56  ;;  %v1561_v27 = vpop.f32.mrb[59].mxu0  ;;  %v4344_v19 = vadd.f32 %v4244_v43, %v1914_v28 }
 0x219   : > { %2034 = vst [vmem:[%s4322_s9 + $0x58] sm:$0xff] %v4340_v40 }
 0x21a   : > { %2033 = vst [vmem:[%s4322_s9 + $0x50] sm:$0xff] %v4344_v19  ;;  %v2365_v3 = vpop.f32.mrb[124].mxu1  ;;  %v4351_v2 = vadd.f32 %v2699_v47, %v4276_v18 }
 0x21b   : > { %v1564_v8 = vpop.f32.mrb[60].mxu0  ;;  %v4354_v9 = vadd.f32 %v4253_v10, %v2365_v3  ;;  %v1924_v25 = vpop.f32.mrb[125].mxu1 }
 0x21c   : > { %v2701_v56 = vadd.f32 %v1564_v8, %v4233_v61  ;;  %v1566_v29 = vpop.f32.mrb[61].mxu0  ;;  %v4358_v43 = vadd.f32 %v4250_v44, %v1924_v25 }
 0x21d   : > { %2036 = vst [vmem:[%s4322_s9 + $0x68] sm:$0xff] %v4354_v9 }
 0x21e   : > { %2035 = vst [vmem:[%s4322_s9 + $0x60] sm:$0xff] %v4358_v43  ;;  %v2368_v54 = vpop.f32.mrb[126].mxu1  ;;  %v4365_v18 = vadd.f32 %v2701_v56, %v4279_v52 }
 0x21f   : > { %v1569_v48 = vpop.f32.mrb[62].mxu0  ;;  %v4368_v10 = vadd.f32 %v4259_v62, %v2368_v54  ;;  %v1934_v32 = vpop.f32.mrb[127].mxu1 }
 0x220   : > { %v2703_v61 = vadd.f32 %v1569_v48, %v4235_v37  ;;  %v1571_v17 = vpop.f32.mrb[63].mxu0  ;;  %v4372_v44 = vadd.f32 %v4256_v45, %v1934_v32 }
 0x221   : > { %2038 = vst [vmem:[%s4322_s9 + $0x78] sm:$0xff] %v4368_v10 }
 0x222   : > { %2037 = vst [vmem:[%s4322_s9 + $0x70] sm:$0xff] %v4372_v44  ;;  %v2371_v52 = vpop.f32.mrb[128].mxu1  ;;  %v4379_v34 = vadd.f32 %v2703_v61, %v4284_v49 }
 0x223   : > { %v1639_v6 = vpop.f32.mrb[0].mxu0  ;;  %v4382_v62 = vadd.f32 %v4265_v26, %v2371_v52  ;;  %v1944_v21 = vpop.f32.mrb[129].mxu1 }
 0x224   : > { %v2649_v37 = vadd.f32 %v1639_v6, %v4138_v39  ;;  %v1641_v45 = vpop.f32.mrb[1].mxu0  ;;  %v4386_v36 = vadd.f32 %v4262_v53, %v1944_v21 }
 0x225   : > { %2040 = vst [vmem:[%s4322_s9 + $0x88] sm:$0xff] %v4382_v62 }
 0x226   : > { %v1865_v14 = vadd.f32 %v2649_v37, %v4293_v50  ;;  %2039 = vst [vmem:[%s4322_s9 + $0x80] sm:$0xff] %v4386_v36  ;;  %v2374_v49 = vpop.f32.mrb[130].mxu1 }
 0x227   : > { %v1644_v12 = vpop.f32.mrb[2].mxu0  ;;  %v4394_v26 = vadd.f32 %v4271_v58, %v2374_v49  ;;  %v1954_v0 = vpop.f32.mrb[131].mxu1 }
 0x228   : > { %2023 = vst [vmem:[%s4322_s9] sm:$0xff] %v1865_v14  ;;  %v2650_v39 = vadd.f32 %v1644_v12, %v4142_v59  ;;  %v1646_v28 = vpop.f32.mrb[3].mxu0  ;;  %v4399_v53 = vadd.f32 %v4268_v30, %v1954_v0  ;;  %v2093_v27 = vmul.f32 %v1865_v14, %v1865_v14 }
 0x229   : > { %2042 = vst [vmem:[%s4322_s9 + $0x98] sm:$0xff] %v4394_v26 }
 0x22a   : > { %v1870_v50 = vadd.f32 %v2650_v39, %v4289_v22  ;;  %2041 = vst [vmem:[%s4322_s9 + $0x90] sm:$0xff] %v4399_v53  ;;  %v2377_v47 = vpop.f32.mrb[132].mxu1 }
 0x22b   : > { %v1649_v58 = vpop.f32.mrb[4].mxu0  ;;  %v4407_v3 = vadd.f32 %v4281_v57, %v2377_v47  ;;  %v1964_v59 = vpop.f32.mrb[133].mxu1 }
 0x22c   : > { %2024 = vst [vmem:[%s4322_s9 + $0x8] sm:$0xff] %v1870_v50  ;;  %v2055_v8 = vadd.f32 %v1870_v50, %v1865_v14  ;;  %v2094_v25 = vmul.f32 %v1870_v50, %v1870_v50  ;;  %v2651_v30 = vadd.f32 %v1649_v58, %v4145_v35  ;;  %v1651_v56 = vpop.f32.mrb[5].mxu0  ;;  %v4412_v22 = vadd.f32 %v4274_v24, %v1964_v59 }
 0x22d   : > { %2044 = vst [vmem:[%s4322_s9 + $0xa8] sm:$0xff] %v4407_v3 }
 0x22e   : > { %v2125_v29 = vadd.f32 %v2094_v25, %v2093_v27  ;;  %v1875_v54 = vadd.f32 %v2651_v30, %v4300_v4  ;;  %2043 = vst [vmem:[%s4322_s9 + $0xa0] sm:$0xff] %v4412_v22  ;;  %v2380_v57 = vpop.f32.mrb[134].mxu1 }
 0x22f   : > { %v1654_v48 = vpop.f32.mrb[6].mxu0  ;;  %v4420_v32 = vadd.f32 %v4291_v55, %v2380_v57  ;;  %v1974_v35 = vpop.f32.mrb[135].mxu1 }
 0x230   : > { %2025 = vst [vmem:[%s4322_s9 + $0x10] sm:$0xff] %v1875_v54  ;;  %v2056_v61 = vadd.f32 %v2055_v8, %v1875_v54  ;;  %v2095_v17 = vmul.f32 %v1875_v54, %v1875_v54  ;;  %v2652_v24 = vadd.f32 %v1654_v48, %v4149_v5  ;;  %v1656_v52 = vpop.f32.mrb[7].mxu0  ;;  %v4425_v6 = vadd.f32 %v4286_v41, %v1974_v35 }
 0x231   : > { %2046 = vst [vmem:[%s4322_s9 + $0xb8] sm:$0xff] %v4420_v32 }
 0x232   : > { %v2126_v4 = vadd.f32 %v2125_v29, %v2095_v17  ;;  %v1880_v21 = vadd.f32 %v2652_v24, %v4296_v38  ;;  %2045 = vst [vmem:[%s4322_s9 + $0xb0] sm:$0xff] %v4425_v6  ;;  %v2383_v55 = vpop.f32.mrb[136].mxu1 }
 0x233   : > { %v1659_v37 = vpop.f32.mrb[8].mxu0  ;;  %v4433_v45 = vadd.f32 %v4305_v33, %v2383_v55  ;;  %v1984_v5 = vpop.f32.mrb[137].mxu1 }
 0x234   : > { %2026 = vst [vmem:[%s4322_s9 + $0x18] sm:$0xff] %v1880_v21  ;;  %v2057_v14 = vadd.f32 %v2056_v61, %v1880_v21  ;;  %v2096_v49 = vmul.f32 %v1880_v21, %v1880_v21  ;;  %v2653_v41 = vadd.f32 %v1659_v37, %v4153_v63  ;;  %v1661_v12 = vpop.f32.mrb[9].mxu0  ;;  %v4438_v0 = vadd.f32 %v4298_v11, %v1984_v5 }
 0x235   : > { %2048 = vst [vmem:[%s4322_s9 + $0xc8] sm:$0xff] %v4433_v45  ;;  %v2101_v37 = vmul.f32 %v4331_v20, %v4331_v20 }
 0x236   : > { %v2127_v38 = vadd.f32 %v2126_v4, %v2096_v49  ;;  %v1885_v39 = vadd.f32 %v2653_v41, %v4307_v23  ;;  %2047 = vst [vmem:[%s4322_s9 + $0xc0] sm:$0xff] %v4438_v0  ;;  %v2386_v33 = vpop.f32.mrb[138].mxu1 }
 0x237   : > { %v1664_v28 = vpop.f32.mrb[10].mxu0  ;;  %v4446_v50 = vadd.f32 %v4324_v42, %v2386_v33  ;;  %v1994_v63 = vpop.f32.mrb[139].mxu1 }
 0x238   : > { %2027 = vst [vmem:[%s4322_s9 + $0x20] sm:$0xff] %v1885_v39  ;;  %v2058_v47 = vadd.f32 %v2057_v14, %v1885_v39  ;;  %v2097_v27 = vmul.f32 %v1885_v39, %v1885_v39  ;;  %v2654_v11 = vadd.f32 %v1664_v28, %v4156_v51  ;;  %v1666_v58 = vpop.f32.mrb[11].mxu0  ;;  %v4451_v59 = vadd.f32 %v4312_v1, %v1994_v63 }
 0x239   : > { %2050 = vst [vmem:[%s4322_s9 + $0xd8] sm:$0xff] %v4446_v50 }
 0x23a   : > { %v2128_v23 = vadd.f32 %v2127_v38, %v2097_v27  ;;  %v1890_v8 = vadd.f32 %v2654_v11, %v4303_v46  ;;  %2049 = vst [vmem:[%s4322_s9 + $0xd0] sm:$0xff] %v4451_v59  ;;  %v2389_v42 = vpop.f32.mrb[140].mxu1  ;;  %v2104_v38 = vmul.f32 %v4340_v40, %v4340_v40 }
 0x23b   : > { %v1669_v25 = vpop.f32.mrb[12].mxu0  ;;  %v4459_v30 = vadd.f32 %v4351_v2, %v2389_v42  ;;  %v2004_v51 = vpop.f32.mrb[141].mxu1 }
 0x23c   : > { %2028 = vst [vmem:[%s4322_s9 + $0x28] sm:$0xff] %v1890_v8  ;;  %v2059_v56 = vadd.f32 %v2058_v47, %v1890_v8  ;;  %v2098_v29 = vmul.f32 %v1890_v8, %v1890_v8  ;;  %v2655_v1 = vadd.f32 %v1669_v25, %v4159_v15  ;;  %v1671_v54 = vpop.f32.mrb[13].mxu0  ;;  %v4464_v57 = vadd.f32 %v4337_v31, %v2004_v51 }
 0x23d   : > { %2052 = vst [vmem:[%s4322_s9 + $0xe8] sm:$0xff] %v4459_v30 }
 0x23e   : > { %v2129_v46 = vadd.f32 %v2128_v23, %v2098_v29  ;;  %v1895_v48 = vadd.f32 %v2655_v1, %v4314_v60  ;;  %2051 = vst [vmem:[%s4322_s9 + $0xe0] sm:$0xff] %v4464_v57  ;;  %v2392_v2 = vpop.f32.mrb[142].mxu1 }
 0x23f   : > { %v1674_v35 = vpop.f32.mrb[14].mxu0  ;;  %v4472_v61 = vadd.f32 %v4379_v34, %v2392_v2  ;;  %v2014_v15 = vpop.f32.mrb[143].mxu1 }
 0x240   : > { %2029 = vst [vmem:[%s4322_s9 + $0x30] sm:$0xff] %v1895_v48  ;;  %v2060_v17 = vadd.f32 %v2059_v56, %v1895_v48  ;;  %v2099_v24 = vmul.f32 %v1895_v48, %v1895_v48  ;;  %v2656_v31 = vadd.f32 %v1674_v35, %v4162_v16  ;;  %v1676_v52 = vpop.f32.mrb[15].mxu0  ;;  %v4477_v4 = vadd.f32 %v4365_v18, %v2014_v15 }
 0x241   : > { %2054 = vst [vmem:[%s4322_s9 + $0xf8] sm:$0xff] %v4472_v61  ;;  %v2102_v18 = vmul.f32 %v4327_v13, %v4327_v13 }
 0x242   : > { %v2130_v60 = vadd.f32 %v2129_v46, %v2099_v24  ;;  %v1900_v21 = vadd.f32 %v2656_v31, %v4310_v7  ;;  %2053 = vst [vmem:[%s4322_s9 + $0xf0] sm:$0xff] %v4477_v4  ;;  %v2103_v7 = vmul.f32 %v4344_v19, %v4344_v19 }
 0x244   : > { %2030 = vst [vmem:[%s4322_s9 + $0x38] sm:$0xff] %v1900_v21  ;;  %v2061_v34 = vadd.f32 %v2060_v17, %v1900_v21  ;;  %v2100_v55 = vmul.f32 %v1900_v21, %v1900_v21 }
 0x246   : > { %v2062_v5 = vadd.f32 %v2061_v34, %v4331_v20  ;;  %v2131_v16 = vadd.f32 %v2130_v60, %v2100_v55  ;;  %v2105_v20 = vmul.f32 %v4358_v43, %v4358_v43 }
 0x248   : > { %v2063_v14 = vadd.f32 %v2062_v5, %v4327_v13  ;;  %v2132_v49 = vadd.f32 %v2131_v16, %v2101_v37  ;;  %v2106_v13 = vmul.f32 %v4354_v9, %v4354_v9 }
 0x24a   : > { %v2064_v41 = vadd.f32 %v2063_v14, %v4344_v19  ;;  %v2133_v12 = vadd.f32 %v2132_v49, %v2102_v18  ;;  %v2107_v19 = vmul.f32 %v4372_v44, %v4372_v44 }
 0x24c   : > { %v2065_v39 = vadd.f32 %v2064_v41, %v4340_v40  ;;  %v2134_v33 = vadd.f32 %v2133_v12, %v2103_v7  ;;  %v2108_v40 = vmul.f32 %v4368_v10, %v4368_v10  ;;  %v2123_v12 = vmul.f32 %v4477_v4, %v4477_v4 }
 0x24e   : > { %v2066_v28 = vadd.f32 %v2065_v39, %v4358_v43  ;;  %v2135_v63 = vadd.f32 %v2134_v33, %v2104_v38  ;;  %v2109_v43 = vmul.f32 %v4386_v36, %v4386_v36  ;;  %v2124_v38 = vmul.f32 %v4472_v61, %v4472_v61 }
 0x250   : > { %v2067_v47 = vadd.f32 %v2066_v28, %v4354_v9  ;;  %v2136_v27 = vadd.f32 %v2135_v63, %v2105_v20  ;;  %v2110_v9 = vmul.f32 %v4382_v62, %v4382_v62 }
 0x252   : > { %v2068_v11 = vadd.f32 %v2067_v47, %v4372_v44  ;;  %v2137_v58 = vadd.f32 %v2136_v27, %v2106_v13  ;;  %v2111_v44 = vmul.f32 %v4399_v53, %v4399_v53 }
 0x254   : > { %v2069_v23 = vadd.f32 %v2068_v11, %v4368_v10  ;;  %v2138_v8 = vadd.f32 %v2137_v58, %v2107_v19  ;;  %v2112_v10 = vmul.f32 %v4394_v26, %v4394_v26 }
 0x256   : > { %v2070_v42 = vadd.f32 %v2069_v23, %v4386_v36  ;;  %v2139_v25 = vadd.f32 %v2138_v8, %v2108_v40  ;;  %v2113_v36 = vmul.f32 %v4412_v22, %v4412_v22 }
 0x258   : > { %v2071_v51 = vadd.f32 %v2070_v42, %v4382_v62  ;;  %v2140_v56 = vadd.f32 %v2139_v25, %v2109_v43  ;;  %v2114_v62 = vmul.f32 %v4407_v3, %v4407_v3 }
 0x25a   : > { %v2141_v29 = vadd.f32 %v2140_v56, %v2110_v9  ;;  %v2072_v1 = vadd.f32 %v2071_v51, %v4399_v53  ;;  %v2115_v53 = vmul.f32 %v4425_v6, %v4425_v6 }
 0x25c   : > { %v2073_v54 = vadd.f32 %v2072_v1, %v4394_v26  ;;  %v2142_v46 = vadd.f32 %v2141_v29, %v2111_v44  ;;  %v2116_v26 = vmul.f32 %v4420_v32, %v4420_v32 }
 0x25e   : > { %v2074_v48 = vadd.f32 %v2073_v54, %v4412_v22  ;;  %v2143_v2 = vadd.f32 %v2142_v46, %v2112_v10  ;;  %v2117_v22 = vmul.f32 %v4438_v0, %v4438_v0 }
 0x260   : > { %v2075_v35 = vadd.f32 %v2074_v48, %v4407_v3  ;;  %v2144_v15 = vadd.f32 %v2143_v2, %v2113_v36  ;;  %v2118_v3 = vmul.f32 %v4433_v45, %v4433_v45 }
 0x262   : > { %v2076_v17 = vadd.f32 %v2075_v35, %v4425_v6  ;;  %v2145_v24 = vadd.f32 %v2144_v15, %v2114_v62  ;;  %v2119_v6 = vmul.f32 %v4451_v59, %v4451_v59 }
 0x264   : > { %v2077_v31 = vadd.f32 %v2076_v17, %v4420_v32  ;;  %v2146_v52 = vadd.f32 %v2145_v24, %v2115_v53  ;;  %v2120_v32 = vmul.f32 %v4446_v50, %v4446_v50 }
 0x266   : > { %v2078_v60 = vadd.f32 %v2077_v31, %v4438_v0  ;;  %v2147_v21 = vadd.f32 %v2146_v52, %v2116_v26  ;;  %v2121_v0 = vmul.f32 %v4464_v57, %v4464_v57 }
 0x268   : > { %v2079_v34 = vadd.f32 %v2078_v60, %v4433_v45  ;;  %v2148_v55 = vadd.f32 %v2147_v21, %v2117_v22  ;;  %v2122_v45 = vmul.f32 %v4459_v30, %v4459_v30 }
 0x26a   : > { %v2080_v37 = vadd.f32 %v2079_v34, %v4451_v59  ;;  %v2149_v5 = vadd.f32 %v2148_v55, %v2118_v3 }
 0x26c   : > { %v2081_v16 = vadd.f32 %v2080_v37, %v4446_v50  ;;  %v2150_v18 = vadd.f32 %v2149_v5, %v2119_v6 }
 0x26e   : > { %v2082_v14 = vadd.f32 %v2081_v16, %v4464_v57  ;;  %v2151_v49 = vadd.f32 %v2150_v18, %v2120_v32 }
 0x270   : > { %v2083_v7 = vadd.f32 %v2082_v14, %v4459_v30  ;;  %v2152_v59 = vadd.f32 %v2151_v49, %v2121_v0 }
 0x272   : > { %v2084_v41 = vadd.f32 %v2083_v7, %v4477_v4  ;;  %v2153_v50 = vadd.f32 %v2152_v59, %v2122_v45 }
 0x274   : > { %v2085_v39 = vadd.f32 %v2084_v41, %v4472_v61  ;;  %v2154_v57 = vadd.f32 %v2153_v50, %v2123_v12 }
 0x276   : > { %v2086_v33 = vrot.slane %v2085_v39, 4  ;;  %v2155_v20 = vadd.f32 %v2154_v57, %v2124_v38 }
 0x278   : > { %v2087_v28 = vadd.f32 %v2086_v33, %v2085_v39  ;;  %v2156_v63 = vrot.slane %v2155_v20, 4 }
 0x27a   : > { %v2088_v13 = vrot.slane %v2087_v28, 2  ;;  %v2157_v47 = vadd.f32 %v2156_v63, %v2155_v20 }
 0x27c   : > { %v2089_v30 = vadd.f32 %v2088_v13, %v2087_v28  ;;  %v2158_v27 = vrot.slane %v2157_v47, 2 }
 0x27e   : > { %v2090_v19 = vrot.slane %v2089_v30, 1  ;;  %v2159_v11 = vadd.f32 %v2158_v27, %v2157_v47 }
 0x280   : > { %v2091_v4 = vadd.f32 %v2090_v19, %v2089_v30  ;;  %v2160_v58 = vrot.slane %v2159_v11, 1 }
 0x282   : > { %2092 = vst [vmem:[%s235_s13] sm:$0x1] %v2091_v4  ;;  %v2161_v61 = vadd.f32 %v2160_v58, %v2159_v11 }
 0x284   : > { %2162 = vst [vmem:[%s235_s13 + $0x1] sm:$0x1] %v2161_v61 }
 0x285 PF: > { %s16_s18 = sadd.s32 1, %s2824_s18  }
 0x286   : > { %p13_p4 = scmp.ge.s32.totalorder %s16_s18, 4  }
 0x288   :  { %15 = sbr.rel (!%p13_p4) target bundleno = 1 (0x1), region = 80 }

</bundles_post_ra>
